<compile_context>
chip_gen: v6e
topology: v6e:2x2x1
jax: 0.10.0
libtpu: 0.0.40
codegen_flags: <defaults>
</compile_context>

<pallas_src>
import functools
import math

import jax
import jax.numpy as jnp
from jax.experimental import pallas as pl
from jax.experimental.pallas import tpu as pltpu


BN_EPS = 1e-5
BN_SCALE = 1.0 / math.sqrt(1.0 + BN_EPS)   # eval BatchNorm, default stats/affine


# --------------------------- in-kernel helpers ------------------------------

def _row_pad(a, pad):
    """Zero-pad rows (sublane axis) of a 2-D value via a constant 0/1 matmul."""
    if pad == 0:
        return a
    h = a.shape[0]
    hp = h + 2 * pad
    r = jax.lax.broadcasted_iota(jnp.int32, (hp, h), 0)
    c = jax.lax.broadcasted_iota(jnp.int32, (hp, h), 1)
    p = (r == c + pad).astype(jnp.float32)
    return jnp.dot(p, a, preferred_element_type=jnp.float32)


def _row_subsample(a, stride, ho):
    """Select rows 0, stride, 2*stride, ... (ho rows) via a 0/1 matmul."""
    hf = a.shape[0]
    if ho == 1:
        return a[0:1, :]
    r = jax.lax.broadcasted_iota(jnp.int32, (ho, hf), 0)
    c = jax.lax.broadcasted_iota(jnp.int32, (ho, hf), 1)
    sel = (c == stride * r).astype(jnp.float32)
    return jnp.dot(sel, a, preferred_element_type=jnp.float32)


def _conv1d(a, w_ref, bias, *, stride=1, pad=0, relu=False):
    """Conv with kernel (Kh,1) on a=(H,Cin); w_ref=(Kh,Cin,Cout); bias=(1,Cout)."""
    kh = w_ref.shape[0]
    a = _row_pad(a, pad)
    hp = a.shape[0]
    hf = hp - kh + 1                                   # stride-1 output rows
    acc = jnp.dot(a[0:hf, :], w_ref[0], preferred_element_type=jnp.float32)
    for k in range(1, kh):
        acc = acc + jnp.dot(a[k:k + hf, :], w_ref[k],
                            preferred_element_type=jnp.float32)
    if stride > 1:
        ho = (hp - kh) // stride + 1
        acc = _row_subsample(acc, stride, ho)
    acc = acc + bias
    if relu:
        acc = jnp.maximum(acc, 0.0)
    return acc


def _pool_rows(t, k, mode):
    """Max/Avg pool with window (k,1), stride 1, along rows of t=(H,C)."""
    ho = t.shape[0] - k + 1
    r = t[0:ho, :]
    for i in range(1, k):
        w = t[i:i + ho, :]
        r = jnp.maximum(r, w) if mode == "max" else r + w
    return r if mode == "max" else r * (1.0 / k)


# ------------------------------ fused kernel --------------------------------

def _cnn1_kernel(x_ref,
                 wA_ref, bA_ref, w2_ref, b2_ref, w3b_ref, b3b_ref,
                 wB_ref, bB_ref, w4b_ref, b4b_ref,
                 w5b_ref, b5b_ref, w5c_ref, b5c_ref, w5d_ref, b5d_ref,
                 wC_ref, bC_ref, w71_ref, b71_ref, w8b_ref, b8b_ref,
                 w22_ref, b22_ref,
                 fc1w_ref, fc1b_ref, fc2w_ref, fc2b_ref,
                 out_ref, *, c, pool_k):
    xb = x_ref[...]                                    # (H, Cin) for this batch

    # -- first-stage branches (grouped by identical input + conv geometry) ----
    gA = _conv1d(xb, wA_ref, bA_ref[...])              # (13, 3c): l1 | l21 | l3a
    x1 = jnp.maximum(gA[:, 0:c], 0.0)                  # linear_1 (BN folded)
    x21 = gA[:, c:2 * c]                               # linear_21 (dropout = id)
    t3 = jnp.maximum(gA[:, 2 * c:3 * c], 0.0)          # linear_3 stage 1

    x2 = _conv1d(xb, w2_ref, b2_ref[...], stride=2, pad=3, relu=True)   # linear_2
    x3 = _conv1d(t3, w3b_ref, b3b_ref[...], stride=2, relu=True)        # linear_3

    gB = _conv1d(xb, wB_ref, bB_ref[...], relu=True)   # (22, 2c): l4a | l5a
    t4 = gB[:, 0:c]
    t5 = gB[:, c:2 * c]
    x4 = _conv1d(t4, w4b_ref, b4b_ref[...], pad=1, relu=True)           # linear_4
    t5 = _conv1d(t5, w5b_ref, b5b_ref[...], relu=True)
    t5 = _conv1d(t5, w5c_ref, b5c_ref[...], relu=True)
    x5 = _conv1d(t5, w5d_ref, b5d_ref[...], stride=2, relu=True)        # linear_5

    gC = _conv1d(xb, wC_ref, bC_ref[...], stride=2, pad=1)  # (13, 2c): l7 | l8a
    t7 = gC[:, 0:c]                                    # l7 conv (BN after pool)
    t8 = jnp.maximum(gC[:, c:2 * c], 0.0)              # l8a conv + relu
    x7 = jnp.maximum(_pool_rows(t7, pool_k, "max") * BN_SCALE, 0.0)     # linear_7
    t71 = _conv1d(xb, w71_ref, b71_ref[...], stride=2, pad=1)
    x71 = jnp.maximum(_pool_rows(t71, pool_k, "avg") * BN_SCALE, 0.0)   # linear_71
    x8 = _conv1d(t8, w8b_ref, b8b_ref[...], stride=2, pad=1, relu=True)  # linear_8

    # -- branch merges (x3 is (1,c): broadcasts over rows like the NCHW add) --
    x10 = x1 + x2 + x21 + x3 + x4
    x11 = x5 + x7 + x71 + x8
    x12 = _conv1d(x10, w22_ref, b22_ref[...], stride=2, pad=2, relu=True)  # l22
    x13 = x11 + x12                                    # (8, c)

    # -- classifier head: NCHW flatten contracted without materializing it ----
    acc = fc1b_ref[...]
    for h in range(fc1w_ref.shape[0]):
        acc = acc + jnp.dot(x13[h:h + 1, :], fc1w_ref[h],
                            preferred_element_type=jnp.float32)
    h1 = jnp.maximum(acc, 0.0)                         # fc1 + relu (dropout = id)
    logits = jnp.dot(h1, fc2w_ref[...],
                     preferred_element_type=jnp.float32) + fc2b_ref[...]
    m = jnp.max(logits, axis=1, keepdims=True)
    e = jnp.exp(logits - m)
    out_ref[...] = e / jnp.sum(e, axis=1, keepdims=True)


# ------------------------------- wrappers ------------------------------------

def _full_spec(arr):
    zeros = (0,) * arr.ndim
    return pl.BlockSpec(arr.shape, lambda b, _z=zeros: _z)


def cnn1_forward(x, operands, *, sci_l_second, kernel_x, classes):
    """Eval-mode forward of CNN1; one fused Pallas kernel. Returns (softmax, x)."""
    B, Cin, H, W = x.shape
    assert W == 1, "this model uses width-1 feature maps"
    x_bhc = jnp.transpose(x[:, :, :, 0], (0, 2, 1))     # (B, H, Cin)
    kernel = functools.partial(_cnn1_kernel, c=sci_l_second,
                               pool_k=kernel_x // 2)
    in_specs = [pl.BlockSpec((None, H, Cin), lambda b: (b, 0, 0))]
    in_specs += [_full_spec(op) for op in operands]
    out = pl.pallas_call(
        kernel,
        out_shape=jax.ShapeDtypeStruct((B, 1, classes), jnp.float32),
        grid=(B,),
        in_specs=in_specs,
        out_specs=pl.BlockSpec((None, 1, classes), lambda b: (b, 0, 0)),
        compiler_params=pltpu.CompilerParams(
            dimension_semantics=("parallel",)),          # 2nd TC on v7x
    )(x_bhc, *operands)
    return out.reshape(B, classes), x


def prepare_operands(params, sci_l_second):
    """Fold eval BatchNorm into conv weights/biases, reshape to (Kh,Cin,Cout),
    concat branches sharing input + geometry, pre-permute fc1 for the kernel."""
    s = BN_SCALE

    def w(name, fold_bn):
        wt = jnp.transpose(params[name + "_w"][:, :, :, 0], (2, 1, 0))
        return wt * s if fold_bn else wt                # (Kh, Cin, Cout)

    def b(name, fold_bn):
        bt = params[name + "_b"].reshape(1, -1)
        return bt * s if fold_bn else bt                # (1, Cout)

    c = sci_l_second
    wA = jnp.concatenate([w("l1", True), w("l21", False), w("l3a", True)], axis=2)
    bA = jnp.concatenate([b("l1", True), b("l21", False), b("l3a", True)], axis=1)
    wB = jnp.concatenate([w("l4a", True), w("l5a", True)], axis=2)
    bB = jnp.concatenate([b("l4a", True), b("l5a", True)], axis=1)
    wC = jnp.concatenate([w("l7", False), w("l8a", False)], axis=2)
    bC = jnp.concatenate([b("l7", False), b("l8a", False)], axis=1)
    hs = params["fc1_w"].shape[0] // c                  # spatial size of x13 (=8)
    # fc1p[h, ci, j] == fc1_w[ci*hs + h, j]  (matches the NCHW .view flatten)
    fc1p = jnp.transpose(params["fc1_w"].reshape(c, hs, c), (1, 0, 2))
    return [
        wA, bA, w("l2", True), b("l2", True), w("l3b", True), b("l3b", True),
        wB, bB, w("l4b", True), b("l4b", True),
        w("l5b", True), b("l5b", True), w("l5c", True), b("l5c", True),
        w("l5d", True), b("l5d", True),
        wC, bC, w("l71", False), b("l71", False), w("l8b", False), b("l8b", False),
        w("l22", True), b("l22", True),
        fc1p, params["fc1_b"].reshape(1, -1),
        params["fc2_w"], params["fc2_b"].reshape(1, -1),
    ]


def init_params(key, cin, c, kx, classes):
    k2, k4, k6, k8 = kx // 2, kx // 4, int(kx / 6), kx // 8
    conv_specs = {
        "l1": (cin, kx), "l2": (cin, k2), "l21": (cin, kx), "l22": (c, k4),
        "l3a": (cin, kx), "l3b": (c, kx),
        "l4a": (cin, k4), "l4b": (c, kx),
        "l5a": (cin, k4), "l5b": (c, k4), "l5c": (c, k4), "l5d": (c, k4),
        "l7": (cin, k8), "l71": (cin, k6),
        "l8a": (cin, k8), "l8b": (c, k8),
    }
    keys = jax.random.split(key, 2 * len(conv_specs) + 4)
    ki = iter(range(len(keys)))
    params = {}
    for name, (in_c, kh) in conv_specs.items():
        fan = in_c * kh
        params[name + "_w"] = jax.random.normal(
            keys[next(ki)], (c, in_c, kh, 1), jnp.float32) / math.sqrt(fan)
        params[name + "_b"] = jax.random.normal(
            keys[next(ki)], (c,), jnp.float32) * 0.01
    params["fc1_w"] = jax.random.normal(
        keys[next(ki)], (c * 8, c), jnp.float32) / math.sqrt(c * 8)
    params["fc1_b"] = jax.random.normal(keys[next(ki)], (c,), jnp.float32) * 0.01
    params["fc2_w"] = jax.random.normal(
        keys[next(ki)], (c, classes), jnp.float32) / math.sqrt(c)
    params["fc2_b"] = jax.random.normal(
        keys[next(ki)], (classes,), jnp.float32) * 0.01
    return params


def ref_forward(params, x, kx):
    """Pure-JAX (XLA) reference of the CNN1 eval-mode forward, for validation."""
    s = BN_SCALE

    def conv(h, name, stride, pad):
        y = jax.lax.conv_general_dilated(
            h, params[name + "_w"], window_strides=(stride, 1),
            padding=((pad, pad), (0, 0)),
            dimension_numbers=("NCHW", "OIHW", "NCHW"))
        return y + params[name + "_b"][None, :, None, None]

    def bnrelu(y):
        return jnp.maximum(y * s, 0.0)

    x1 = bnrelu(conv(x, "l1", 1, 0))
    x2 = bnrelu(conv(x, "l2", 2, 3))
    x21 = conv(x, "l21", 1, 0)
    x3 = bnrelu(conv(bnrelu(conv(x, "l3a", 1, 0)), "l3b", 2, 0))
    x4 = bnrelu(conv(bnrelu(conv(x, "l4a", 1, 0)), "l4b", 1, 1))
    t = bnrelu(conv(x, "l5a", 1, 0))
    t = bnrelu(conv(t, "l5b", 1, 0))
    t = bnrelu(conv(t, "l5c", 1, 0))
    x5 = bnrelu(conv(t, "l5d", 2, 0))
    k2 = kx // 2
    t = conv(x, "l7", 2, 1)
    t = jax.lax.reduce_window(t, -jnp.inf, jax.lax.max,
                              (1, 1, k2, 1), (1, 1, 1, 1), "VALID")
    x7 = bnrelu(t)
    t = conv(x, "l71", 2, 1)
    t = jax.lax.reduce_window(t, 0.0, jax.lax.add,
                              (1, 1, k2, 1), (1, 1, 1, 1), "VALID") / k2
    x71 = bnrelu(t)
    t = jnp.maximum(conv(x, "l8a", 2, 1), 0.0)
    x8 = jnp.maximum(conv(t, "l8b", 2, 1), 0.0)
    x10 = x1 + x2 + x21 + x3 + x4
    x11 = x5 + x7 + x71 + x8
    x12 = bnrelu(conv(x10, "l22", 2, 2))
    x13 = x11 + x12
    x9 = x13.reshape(x13.shape[0], -1)
    h = jnp.maximum(x9 @ params["fc1_w"] + params["fc1_b"], 0.0)
    logits = h @ params["fc2_w"] + params["fc2_b"]
    return jax.nn.softmax(logits, axis=1)


if __name__ == "__main__":
    # TODO(synk): Dropout / BatchNorm use eval-mode (inference) semantics;
    # train-mode batch statistics and RNG dropout masks are not reproduced.
    L_FIRST, SCI_L_SECOND, KERNEL_X, CLASSES = 4, 16, 12, 5
    B, H, W = 2, 24, 1

    key = jax.random.PRNGKey(0)
    kx_key, kp_key = jax.random.split(key)
    x = jax.random.normal(kx_key, (B, L_FIRST, H, W), jnp.float32)
    params = init_params(kp_key, L_FIRST, SCI_L_SECOND, KERNEL_X, CLASSES)
    operands = prepare_operands(params, SCI_L_SECOND)

    fwd = jax.jit(functools.partial(
        cnn1_forward, sci_l_second=SCI_L_SECOND, kernel_x=KERNEL_X,
        classes=CLASSES))
    out, x_ret = fwd(x, operands)
    jax.block_until_ready((out, x_ret))

    out_ref = ref_forward(params, x, KERNEL_X)
    assert out.shape == (B, CLASSES)
    assert x_ret.shape == (B, L_FIRST, H, W)
    assert bool(jnp.all(jnp.abs(jnp.sum(out, axis=1) - 1.0) < 1e-4))
    assert float(jnp.max(jnp.abs(out - out_ref))) < 1e-3
    print("KERNEL_OK")
</pallas_src>

<mosaic_0001>
module attributes {stable_mosaic.version = 11 : i64} {
  func.func @_cnn1_kernel(%arg0: i32, %arg1: memref<1x24x4xf32, #tpu.memory_space<vmem>>, %arg2: memref<12x4x48xf32, #tpu.memory_space<vmem>>, %arg3: memref<1x48xf32, #tpu.memory_space<vmem>>, %arg4: memref<6x4x16xf32, #tpu.memory_space<vmem>>, %arg5: memref<1x16xf32, #tpu.memory_space<vmem>>, %arg6: memref<12x16x16xf32, #tpu.memory_space<vmem>>, %arg7: memref<1x16xf32, #tpu.memory_space<vmem>>, %arg8: memref<3x4x32xf32, #tpu.memory_space<vmem>>, %arg9: memref<1x32xf32, #tpu.memory_space<vmem>>, %arg10: memref<12x16x16xf32, #tpu.memory_space<vmem>>, %arg11: memref<1x16xf32, #tpu.memory_space<vmem>>, %arg12: memref<3x16x16xf32, #tpu.memory_space<vmem>>, %arg13: memref<1x16xf32, #tpu.memory_space<vmem>>, %arg14: memref<3x16x16xf32, #tpu.memory_space<vmem>>, %arg15: memref<1x16xf32, #tpu.memory_space<vmem>>, %arg16: memref<3x16x16xf32, #tpu.memory_space<vmem>>, %arg17: memref<1x16xf32, #tpu.memory_space<vmem>>, %arg18: memref<1x4x32xf32, #tpu.memory_space<vmem>>, %arg19: memref<1x32xf32, #tpu.memory_space<vmem>>, %arg20: memref<2x4x16xf32, #tpu.memory_space<vmem>>, %arg21: memref<1x16xf32, #tpu.memory_space<vmem>>, %arg22: memref<1x16x16xf32, #tpu.memory_space<vmem>>, %arg23: memref<1x16xf32, #tpu.memory_space<vmem>>, %arg24: memref<3x16x16xf32, #tpu.memory_space<vmem>>, %arg25: memref<1x16xf32, #tpu.memory_space<vmem>>, %arg26: memref<8x16x16xf32, #tpu.memory_space<vmem>>, %arg27: memref<1x16xf32, #tpu.memory_space<vmem>>, %arg28: memref<16x5xf32, #tpu.memory_space<vmem>>, %arg29: memref<1x5xf32, #tpu.memory_space<vmem>>, %arg30: memref<1x1x5xf32, #tpu.memory_space<vmem>>) attributes {dimension_semantics = [#tpu.dimension_semantics<parallel>], iteration_bounds = array<i64: 2>, scalar_prefetch = 0 : i64, scratch_operands = 0 : i64, tpu.core_type = #tpu.core_type<tc>, window_params = [{transform_indices = @transform_0, window_bounds = array<i64: 1, 24, 4>}, {pipeline_mode = #tpu.pipeline_mode<synchronous>, transform_indices = @transform_1, window_bounds = array<i64: 12, 4, 48>}, {pipeline_mode = #tpu.pipeline_mode<synchronous>, transform_indices = @transform_2, window_bounds = array<i64: 1, 48>}, {pipeline_mode = #tpu.pipeline_mode<synchronous>, transform_indices = @transform_3, window_bounds = array<i64: 6, 4, 16>}, {pipeline_mode = #tpu.pipeline_mode<synchronous>, transform_indices = @transform_4, window_bounds = array<i64: 1, 16>}, {pipeline_mode = #tpu.pipeline_mode<synchronous>, transform_indices = @transform_5, window_bounds = array<i64: 12, 16, 16>}, {pipeline_mode = #tpu.pipeline_mode<synchronous>, transform_indices = @transform_6, window_bounds = array<i64: 1, 16>}, {pipeline_mode = #tpu.pipeline_mode<synchronous>, transform_indices = @transform_7, window_bounds = array<i64: 3, 4, 32>}, {pipeline_mode = #tpu.pipeline_mode<synchronous>, transform_indices = @transform_8, window_bounds = array<i64: 1, 32>}, {pipeline_mode = #tpu.pipeline_mode<synchronous>, transform_indices = @transform_9, window_bounds = array<i64: 12, 16, 16>}, {pipeline_mode = #tpu.pipeline_mode<synchronous>, transform_indices = @transform_10, window_bounds = array<i64: 1, 16>}, {pipeline_mode = #tpu.pipeline_mode<synchronous>, transform_indices = @transform_11, window_bounds = array<i64: 3, 16, 16>}, {pipeline_mode = #tpu.pipeline_mode<synchronous>, transform_indices = @transform_12, window_bounds = array<i64: 1, 16>}, {pipeline_mode = #tpu.pipeline_mode<synchronous>, transform_indices = @transform_13, window_bounds = array<i64: 3, 16, 16>}, {pipeline_mode = #tpu.pipeline_mode<synchronous>, transform_indices = @transform_14, window_bounds = array<i64: 1, 16>}, {pipeline_mode = #tpu.pipeline_mode<synchronous>, transform_indices = @transform_15, window_bounds = array<i64: 3, 16, 16>}, {pipeline_mode = #tpu.pipeline_mode<synchronous>, transform_indices = @transform_16, window_bounds = array<i64: 1, 16>}, {pipeline_mode = #tpu.pipeline_mode<synchronous>, transform_indices = @transform_17, window_bounds = array<i64: 1, 4, 32>}, {pipeline_mode = #tpu.pipeline_mode<synchronous>, transform_indices = @transform_18, window_bounds = array<i64: 1, 32>}, {pipeline_mode = #tpu.pipeline_mode<synchronous>, transform_indices = @transform_19, window_bounds = array<i64: 2, 4, 16>}, {pipeline_mode = #tpu.pipeline_mode<synchronous>, transform_indices = @transform_20, window_bounds = array<i64: 1, 16>}, {pipeline_mode = #tpu.pipeline_mode<synchronous>, transform_indices = @transform_21, window_bounds = array<i64: 1, 16, 16>}, {pipeline_mode = #tpu.pipeline_mode<synchronous>, transform_indices = @transform_22, window_bounds = array<i64: 1, 16>}, {pipeline_mode = #tpu.pipeline_mode<synchronous>, transform_indices = @transform_23, window_bounds = array<i64: 3, 16, 16>}, {pipeline_mode = #tpu.pipeline_mode<synchronous>, transform_indices = @transform_24, window_bounds = array<i64: 1, 16>}, {pipeline_mode = #tpu.pipeline_mode<synchronous>, transform_indices = @transform_25, window_bounds = array<i64: 8, 16, 16>}, {pipeline_mode = #tpu.pipeline_mode<synchronous>, transform_indices = @transform_26, window_bounds = array<i64: 1, 16>}, {pipeline_mode = #tpu.pipeline_mode<synchronous>, transform_indices = @transform_27, window_bounds = array<i64: 16, 5>}, {pipeline_mode = #tpu.pipeline_mode<synchronous>, transform_indices = @transform_28, window_bounds = array<i64: 1, 5>}, {transform_indices = @transform_29, window_bounds = array<i64: 1, 1, 5>}]} {
    %c0 = arith.constant 0 : index
    %c0_0 = arith.constant 0 : index
    %c0_1 = arith.constant 0 : index
    %0 = vector.load %arg1[%c0, %c0_0, %c0_1] : memref<1x24x4xf32, #tpu.memory_space<vmem>>, vector<1x24x4xf32>
    %1 = vector.shape_cast %0 : vector<1x24x4xf32> to vector<24x4xf32>
    %c0_2 = arith.constant 0 : index
    %c0_3 = arith.constant 0 : index
    %2 = vector.load %arg3[%c0_2, %c0_3] : memref<1x48xf32, #tpu.memory_space<vmem>>, vector<1x48xf32>
    %3 = vector.extract_strided_slice %1 {offsets = [0, 0], sizes = [13, 4], strides = [1, 1]} : vector<24x4xf32> to vector<13x4xf32>
    %c0_4 = arith.constant 0 : index
    %c0_5 = arith.constant 0 : index
    %c0_6 = arith.constant 0 : index
    %4 = vector.load %arg2[%c0_4, %c0_5, %c0_6] : memref<12x4x48xf32, #tpu.memory_space<vmem>>, vector<1x4x48xf32>
    %5 = vector.shape_cast %4 : vector<1x4x48xf32> to vector<4x48xf32>
    %cst = arith.constant dense<0.000000e+00> : vector<13x48xf32>
    %6 = tpu.matmul %3, %5, %cst {dimension_numbers = #tpu.dot_dimension_numbers<[1], [0], [0], [1], [0, 0, 1, 1], [], []>} : vector<13x4xf32>, vector<4x48xf32>, vector<13x48xf32> -> vector<13x48xf32>
    %7 = vector.extract_strided_slice %1 {offsets = [1, 0], sizes = [13, 4], strides = [1, 1]} : vector<24x4xf32> to vector<13x4xf32>
    %c1 = arith.constant 1 : index
    %c0_7 = arith.constant 0 : index
    %c0_8 = arith.constant 0 : index
    %8 = vector.load %arg2[%c1, %c0_7, %c0_8] : memref<12x4x48xf32, #tpu.memory_space<vmem>>, vector<1x4x48xf32>
    %9 = vector.shape_cast %8 : vector<1x4x48xf32> to vector<4x48xf32>
    %cst_9 = arith.constant dense<0.000000e+00> : vector<13x48xf32>
    %10 = tpu.matmul %7, %9, %cst_9 {dimension_numbers = #tpu.dot_dimension_numbers<[1], [0], [0], [1], [0, 0, 1, 1], [], []>} : vector<13x4xf32>, vector<4x48xf32>, vector<13x48xf32> -> vector<13x48xf32>
    %11 = arith.addf %6, %10 : vector<13x48xf32>
    %12 = vector.extract_strided_slice %1 {offsets = [2, 0], sizes = [13, 4], strides = [1, 1]} : vector<24x4xf32> to vector<13x4xf32>
    %c2 = arith.constant 2 : index
    %c0_10 = arith.constant 0 : index
    %c0_11 = arith.constant 0 : index
    %13 = vector.load %arg2[%c2, %c0_10, %c0_11] : memref<12x4x48xf32, #tpu.memory_space<vmem>>, vector<1x4x48xf32>
    %14 = vector.shape_cast %13 : vector<1x4x48xf32> to vector<4x48xf32>
    %cst_12 = arith.constant dense<0.000000e+00> : vector<13x48xf32>
    %15 = tpu.matmul %12, %14, %cst_12 {dimension_numbers = #tpu.dot_dimension_numbers<[1], [0], [0], [1], [0, 0, 1, 1], [], []>} : vector<13x4xf32>, vector<4x48xf32>, vector<13x48xf32> -> vector<13x48xf32>
    %16 = arith.addf %11, %15 : vector<13x48xf32>
    %17 = vector.extract_strided_slice %1 {offsets = [3, 0], sizes = [13, 4], strides = [1, 1]} : vector<24x4xf32> to vector<13x4xf32>
    %c3 = arith.constant 3 : index
    %c0_13 = arith.constant 0 : index
    %c0_14 = arith.constant 0 : index
    %18 = vector.load %arg2[%c3, %c0_13, %c0_14] : memref<12x4x48xf32, #tpu.memory_space<vmem>>, vector<1x4x48xf32>
    %19 = vector.shape_cast %18 : vector<1x4x48xf32> to vector<4x48xf32>
    %cst_15 = arith.constant dense<0.000000e+00> : vector<13x48xf32>
    %20 = tpu.matmul %17, %19, %cst_15 {dimension_numbers = #tpu.dot_dimension_numbers<[1], [0], [0], [1], [0, 0, 1, 1], [], []>} : vector<13x4xf32>, vector<4x48xf32>, vector<13x48xf32> -> vector<13x48xf32>
    %21 = arith.addf %16, %20 : vector<13x48xf32>
    %22 = vector.extract_strided_slice %1 {offsets = [4, 0], sizes = [13, 4], strides = [1, 1]} : vector<24x4xf32> to vector<13x4xf32>
    %c4 = arith.constant 4 : index
    %c0_16 = arith.constant 0 : index
    %c0_17 = arith.constant 0 : index
    %23 = vector.load %arg2[%c4, %c0_16, %c0_17] : memref<12x4x48xf32, #tpu.memory_space<vmem>>, vector<1x4x48xf32>
    %24 = vector.shape_cast %23 : vector<1x4x48xf32> to vector<4x48xf32>
    %cst_18 = arith.constant dense<0.000000e+00> : vector<13x48xf32>
    %25 = tpu.matmul %22, %24, %cst_18 {dimension_numbers = #tpu.dot_dimension_numbers<[1], [0], [0], [1], [0, 0, 1, 1], [], []>} : vector<13x4xf32>, vector<4x48xf32>, vector<13x48xf32> -> vector<13x48xf32>
    %26 = arith.addf %21, %25 : vector<13x48xf32>
    %27 = vector.extract_strided_slice %1 {offsets = [5, 0], sizes = [13, 4], strides = [1, 1]} : vector<24x4xf32> to vector<13x4xf32>
    %c5 = arith.constant 5 : index
    %c0_19 = arith.constant 0 : index
    %c0_20 = arith.constant 0 : index
    %28 = vector.load %arg2[%c5, %c0_19, %c0_20] : memref<12x4x48xf32, #tpu.memory_space<vmem>>, vector<1x4x48xf32>
    %29 = vector.shape_cast %28 : vector<1x4x48xf32> to vector<4x48xf32>
    %cst_21 = arith.constant dense<0.000000e+00> : vector<13x48xf32>
    %30 = tpu.matmul %27, %29, %cst_21 {dimension_numbers = #tpu.dot_dimension_numbers<[1], [0], [0], [1], [0, 0, 1, 1], [], []>} : vector<13x4xf32>, vector<4x48xf32>, vector<13x48xf32> -> vector<13x48xf32>
    %31 = arith.addf %26, %30 : vector<13x48xf32>
    %32 = vector.extract_strided_slice %1 {offsets = [6, 0], sizes = [13, 4], strides = [1, 1]} : vector<24x4xf32> to vector<13x4xf32>
    %c6 = arith.constant 6 : index
    %c0_22 = arith.constant 0 : index
    %c0_23 = arith.constant 0 : index
    %33 = vector.load %arg2[%c6, %c0_22, %c0_23] : memref<12x4x48xf32, #tpu.memory_space<vmem>>, vector<1x4x48xf32>
    %34 = vector.shape_cast %33 : vector<1x4x48xf32> to vector<4x48xf32>
    %cst_24 = arith.constant dense<0.000000e+00> : vector<13x48xf32>
    %35 = tpu.matmul %32, %34, %cst_24 {dimension_numbers = #tpu.dot_dimension_numbers<[1], [0], [0], [1], [0, 0, 1, 1], [], []>} : vector<13x4xf32>, vector<4x48xf32>, vector<13x48xf32> -> vector<13x48xf32>
    %36 = arith.addf %31, %35 : vector<13x48xf32>
    %37 = vector.extract_strided_slice %1 {offsets = [7, 0], sizes = [13, 4], strides = [1, 1]} : vector<24x4xf32> to vector<13x4xf32>
    %c7 = arith.constant 7 : index
    %c0_25 = arith.constant 0 : index
    %c0_26 = arith.constant 0 : index
    %38 = vector.load %arg2[%c7, %c0_25, %c0_26] : memref<12x4x48xf32, #tpu.memory_space<vmem>>, vector<1x4x48xf32>
    %39 = vector.shape_cast %38 : vector<1x4x48xf32> to vector<4x48xf32>
    %cst_27 = arith.constant dense<0.000000e+00> : vector<13x48xf32>
    %40 = tpu.matmul %37, %39, %cst_27 {dimension_numbers = #tpu.dot_dimension_numbers<[1], [0], [0], [1], [0, 0, 1, 1], [], []>} : vector<13x4xf32>, vector<4x48xf32>, vector<13x48xf32> -> vector<13x48xf32>
    %41 = arith.addf %36, %40 : vector<13x48xf32>
    %42 = vector.extract_strided_slice %1 {offsets = [8, 0], sizes = [13, 4], strides = [1, 1]} : vector<24x4xf32> to vector<13x4xf32>
    %c8 = arith.constant 8 : index
    %c0_28 = arith.constant 0 : index
    %c0_29 = arith.constant 0 : index
    %43 = vector.load %arg2[%c8, %c0_28, %c0_29] : memref<12x4x48xf32, #tpu.memory_space<vmem>>, vector<1x4x48xf32>
    %44 = vector.shape_cast %43 : vector<1x4x48xf32> to vector<4x48xf32>
    %cst_30 = arith.constant dense<0.000000e+00> : vector<13x48xf32>
    %45 = tpu.matmul %42, %44, %cst_30 {dimension_numbers = #tpu.dot_dimension_numbers<[1], [0], [0], [1], [0, 0, 1, 1], [], []>} : vector<13x4xf32>, vector<4x48xf32>, vector<13x48xf32> -> vector<13x48xf32>
    %46 = arith.addf %41, %45 : vector<13x48xf32>
    %47 = vector.extract_strided_slice %1 {offsets = [9, 0], sizes = [13, 4], strides = [1, 1]} : vector<24x4xf32> to vector<13x4xf32>
    %c9 = arith.constant 9 : index
    %c0_31 = arith.constant 0 : index
    %c0_32 = arith.constant 0 : index
    %48 = vector.load %arg2[%c9, %c0_31, %c0_32] : memref<12x4x48xf32, #tpu.memory_space<vmem>>, vector<1x4x48xf32>
    %49 = vector.shape_cast %48 : vector<1x4x48xf32> to vector<4x48xf32>
    %cst_33 = arith.constant dense<0.000000e+00> : vector<13x48xf32>
    %50 = tpu.matmul %47, %49, %cst_33 {dimension_numbers = #tpu.dot_dimension_numbers<[1], [0], [0], [1], [0, 0, 1, 1], [], []>} : vector<13x4xf32>, vector<4x48xf32>, vector<13x48xf32> -> vector<13x48xf32>
    %51 = arith.addf %46, %50 : vector<13x48xf32>
    %52 = vector.extract_strided_slice %1 {offsets = [10, 0], sizes = [13, 4], strides = [1, 1]} : vector<24x4xf32> to vector<13x4xf32>
    %c10 = arith.constant 10 : index
    %c0_34 = arith.constant 0 : index
    %c0_35 = arith.constant 0 : index
    %53 = vector.load %arg2[%c10, %c0_34, %c0_35] : memref<12x4x48xf32, #tpu.memory_space<vmem>>, vector<1x4x48xf32>
    %54 = vector.shape_cast %53 : vector<1x4x48xf32> to vector<4x48xf32>
    %cst_36 = arith.constant dense<0.000000e+00> : vector<13x48xf32>
    %55 = tpu.matmul %52, %54, %cst_36 {dimension_numbers = #tpu.dot_dimension_numbers<[1], [0], [0], [1], [0, 0, 1, 1], [], []>} : vector<13x4xf32>, vector<4x48xf32>, vector<13x48xf32> -> vector<13x48xf32>
    %56 = arith.addf %51, %55 : vector<13x48xf32>
    %57 = vector.extract_strided_slice %1 {offsets = [11, 0], sizes = [13, 4], strides = [1, 1]} : vector<24x4xf32> to vector<13x4xf32>
    %c11 = arith.constant 11 : index
    %c0_37 = arith.constant 0 : index
    %c0_38 = arith.constant 0 : index
    %58 = vector.load %arg2[%c11, %c0_37, %c0_38] : memref<12x4x48xf32, #tpu.memory_space<vmem>>, vector<1x4x48xf32>
    %59 = vector.shape_cast %58 : vector<1x4x48xf32> to vector<4x48xf32>
    %cst_39 = arith.constant dense<0.000000e+00> : vector<13x48xf32>
    %60 = tpu.matmul %57, %59, %cst_39 {dimension_numbers = #tpu.dot_dimension_numbers<[1], [0], [0], [1], [0, 0, 1, 1], [], []>} : vector<13x4xf32>, vector<4x48xf32>, vector<13x48xf32> -> vector<13x48xf32>
    %61 = arith.addf %56, %60 : vector<13x48xf32>
    %62 = vector.broadcast %2 : vector<1x48xf32> to vector<13x48xf32>
    %63 = arith.addf %61, %62 : vector<13x48xf32>
    %64 = vector.extract_strided_slice %63 {offsets = [0, 0], sizes = [13, 16], strides = [1, 1]} : vector<13x48xf32> to vector<13x16xf32>
    %cst_40 = arith.constant 0.000000e+00 : f32
    %65 = vector.broadcast %cst_40 : f32 to vector<13x16xf32>
    %66 = arith.maximumf %64, %65 : vector<13x16xf32>
    %67 = vector.extract_strided_slice %63 {offsets = [0, 16], sizes = [13, 16], strides = [1, 1]} : vector<13x48xf32> to vector<13x16xf32>
    %68 = vector.extract_strided_slice %63 {offsets = [0, 32], sizes = [13, 16], strides = [1, 1]} : vector<13x48xf32> to vector<13x16xf32>
    %cst_41 = arith.constant 0.000000e+00 : f32
    %69 = vector.broadcast %cst_41 : f32 to vector<13x16xf32>
    %70 = arith.maximumf %68, %69 : vector<13x16xf32>
    %c0_42 = arith.constant 0 : index
    %c0_43 = arith.constant 0 : index
    %71 = vector.load %arg5[%c0_42, %c0_43] : memref<1x16xf32, #tpu.memory_space<vmem>>, vector<1x16xf32>
    %72 = tpu.iota {dimensions = array<i32: 0>} : vector<30x24xi32>
    %73 = tpu.iota {dimensions = array<i32: 1>} : vector<30x24xi32>
    %c3_i32 = arith.constant 3 : i32
    %74 = vector.broadcast %c3_i32 : i32 to vector<30x24xi32>
    %75 = arith.addi %73, %74 : vector<30x24xi32>
    %76 = arith.cmpi eq, %72, %75 : vector<30x24xi32>
    %77 = arith.extui %76 : vector<30x24xi1> to vector<30x24xi32>
    %78 = arith.sitofp %77 : vector<30x24xi32> to vector<30x24xf32>
    %cst_44 = arith.constant dense<0.000000e+00> : vector<30x4xf32>
    %79 = tpu.matmul %78, %1, %cst_44 {dimension_numbers = #tpu.dot_dimension_numbers<[1], [0], [0], [1], [0, 0, 1, 1], [], []>} : vector<30x24xf32>, vector<24x4xf32>, vector<30x4xf32> -> vector<30x4xf32>
    %80 = vector.extract_strided_slice %79 {offsets = [0, 0], sizes = [25, 4], strides = [1, 1]} : vector<30x4xf32> to vector<25x4xf32>
    %c0_45 = arith.constant 0 : index
    %c0_46 = arith.constant 0 : index
    %c0_47 = arith.constant 0 : index
    %81 = vector.load %arg4[%c0_45, %c0_46, %c0_47] : memref<6x4x16xf32, #tpu.memory_space<vmem>>, vector<1x4x16xf32>
    %82 = vector.shape_cast %81 : vector<1x4x16xf32> to vector<4x16xf32>
    %cst_48 = arith.constant dense<0.000000e+00> : vector<25x16xf32>
    %83 = tpu.matmul %80, %82, %cst_48 {dimension_numbers = #tpu.dot_dimension_numbers<[1], [0], [0], [1], [0, 0, 1, 1], [], []>} : vector<25x4xf32>, vector<4x16xf32>, vector<25x16xf32> -> vector<25x16xf32>
    %84 = vector.extract_strided_slice %79 {offsets = [1, 0], sizes = [25, 4], strides = [1, 1]} : vector<30x4xf32> to vector<25x4xf32>
    %c1_49 = arith.constant 1 : index
    %c0_50 = arith.constant 0 : index
    %c0_51 = arith.constant 0 : index
    %85 = vector.load %arg4[%c1_49, %c0_50, %c0_51] : memref<6x4x16xf32, #tpu.memory_space<vmem>>, vector<1x4x16xf32>
    %86 = vector.shape_cast %85 : vector<1x4x16xf32> to vector<4x16xf32>
    %cst_52 = arith.constant dense<0.000000e+00> : vector<25x16xf32>
    %87 = tpu.matmul %84, %86, %cst_52 {dimension_numbers = #tpu.dot_dimension_numbers<[1], [0], [0], [1], [0, 0, 1, 1], [], []>} : vector<25x4xf32>, vector<4x16xf32>, vector<25x16xf32> -> vector<25x16xf32>
    %88 = arith.addf %83, %87 : vector<25x16xf32>
    %89 = vector.extract_strided_slice %79 {offsets = [2, 0], sizes = [25, 4], strides = [1, 1]} : vector<30x4xf32> to vector<25x4xf32>
    %c2_53 = arith.constant 2 : index
    %c0_54 = arith.constant 0 : index
    %c0_55 = arith.constant 0 : index
    %90 = vector.load %arg4[%c2_53, %c0_54, %c0_55] : memref<6x4x16xf32, #tpu.memory_space<vmem>>, vector<1x4x16xf32>
    %91 = vector.shape_cast %90 : vector<1x4x16xf32> to vector<4x16xf32>
    %cst_56 = arith.constant dense<0.000000e+00> : vector<25x16xf32>
    %92 = tpu.matmul %89, %91, %cst_56 {dimension_numbers = #tpu.dot_dimension_numbers<[1], [0], [0], [1], [0, 0, 1, 1], [], []>} : vector<25x4xf32>, vector<4x16xf32>, vector<25x16xf32> -> vector<25x16xf32>
    %93 = arith.addf %88, %92 : vector<25x16xf32>
    %94 = vector.extract_strided_slice %79 {offsets = [3, 0], sizes = [25, 4], strides = [1, 1]} : vector<30x4xf32> to vector<25x4xf32>
    %c3_57 = arith.constant 3 : index
    %c0_58 = arith.constant 0 : index
    %c0_59 = arith.constant 0 : index
    %95 = vector.load %arg4[%c3_57, %c0_58, %c0_59] : memref<6x4x16xf32, #tpu.memory_space<vmem>>, vector<1x4x16xf32>
    %96 = vector.shape_cast %95 : vector<1x4x16xf32> to vector<4x16xf32>
    %cst_60 = arith.constant dense<0.000000e+00> : vector<25x16xf32>
    %97 = tpu.matmul %94, %96, %cst_60 {dimension_numbers = #tpu.dot_dimension_numbers<[1], [0], [0], [1], [0, 0, 1, 1], [], []>} : vector<25x4xf32>, vector<4x16xf32>, vector<25x16xf32> -> vector<25x16xf32>
    %98 = arith.addf %93, %97 : vector<25x16xf32>
    %99 = vector.extract_strided_slice %79 {offsets = [4, 0], sizes = [25, 4], strides = [1, 1]} : vector<30x4xf32> to vector<25x4xf32>
    %c4_61 = arith.constant 4 : index
    %c0_62 = arith.constant 0 : index
    %c0_63 = arith.constant 0 : index
    %100 = vector.load %arg4[%c4_61, %c0_62, %c0_63] : memref<6x4x16xf32, #tpu.memory_space<vmem>>, vector<1x4x16xf32>
    %101 = vector.shape_cast %100 : vector<1x4x16xf32> to vector<4x16xf32>
    %cst_64 = arith.constant dense<0.000000e+00> : vector<25x16xf32>
    %102 = tpu.matmul %99, %101, %cst_64 {dimension_numbers = #tpu.dot_dimension_numbers<[1], [0], [0], [1], [0, 0, 1, 1], [], []>} : vector<25x4xf32>, vector<4x16xf32>, vector<25x16xf32> -> vector<25x16xf32>
    %103 = arith.addf %98, %102 : vector<25x16xf32>
    %104 = vector.extract_strided_slice %79 {offsets = [5, 0], sizes = [25, 4], strides = [1, 1]} : vector<30x4xf32> to vector<25x4xf32>
    %c5_65 = arith.constant 5 : index
    %c0_66 = arith.constant 0 : index
    %c0_67 = arith.constant 0 : index
    %105 = vector.load %arg4[%c5_65, %c0_66, %c0_67] : memref<6x4x16xf32, #tpu.memory_space<vmem>>, vector<1x4x16xf32>
    %106 = vector.shape_cast %105 : vector<1x4x16xf32> to vector<4x16xf32>
    %cst_68 = arith.constant dense<0.000000e+00> : vector<25x16xf32>
    %107 = tpu.matmul %104, %106, %cst_68 {dimension_numbers = #tpu.dot_dimension_numbers<[1], [0], [0], [1], [0, 0, 1, 1], [], []>} : vector<25x4xf32>, vector<4x16xf32>, vector<25x16xf32> -> vector<25x16xf32>
    %108 = arith.addf %103, %107 : vector<25x16xf32>
    %109 = tpu.iota {dimensions = array<i32: 0>} : vector<13x25xi32>
    %110 = tpu.iota {dimensions = array<i32: 1>} : vector<13x25xi32>
    %c2_i32 = arith.constant 2 : i32
    %111 = vector.broadcast %c2_i32 : i32 to vector<13x25xi32>
    %112 = arith.muli %111, %109 : vector<13x25xi32>
    %113 = arith.cmpi eq, %110, %112 : vector<13x25xi32>
    %114 = arith.extui %113 : vector<13x25xi1> to vector<13x25xi32>
    %115 = arith.sitofp %114 : vector<13x25xi32> to vector<13x25xf32>
    %cst_69 = arith.constant dense<0.000000e+00> : vector<13x16xf32>
    %116 = tpu.matmul %115, %108, %cst_69 {dimension_numbers = #tpu.dot_dimension_numbers<[1], [0], [0], [1], [0, 0, 1, 1], [], []>} : vector<13x25xf32>, vector<25x16xf32>, vector<13x16xf32> -> vector<13x16xf32>
    %117 = vector.broadcast %71 : vector<1x16xf32> to vector<13x16xf32>
    %118 = arith.addf %116, %117 : vector<13x16xf32>
    %cst_70 = arith.constant 0.000000e+00 : f32
    %119 = vector.broadcast %cst_70 : f32 to vector<13x16xf32>
    %120 = arith.maximumf %118, %119 : vector<13x16xf32>
    %c0_71 = arith.constant 0 : index
    %c0_72 = arith.constant 0 : index
    %121 = vector.load %arg7[%c0_71, %c0_72] : memref<1x16xf32, #tpu.memory_space<vmem>>, vector<1x16xf32>
    %122 = vector.extract_strided_slice %70 {offsets = [0, 0], sizes = [2, 16], strides = [1, 1]} : vector<13x16xf32> to vector<2x16xf32>
    %c0_73 = arith.constant 0 : index
    %c0_74 = arith.constant 0 : index
    %c0_75 = arith.constant 0 : index
    %123 = vector.load %arg6[%c0_73, %c0_74, %c0_75] : memref<12x16x16xf32, #tpu.memory_space<vmem>>, vector<1x16x16xf32>
    %124 = vector.shape_cast %123 : vector<1x16x16xf32> to vector<16x16xf32>
    %cst_76 = arith.constant dense<0.000000e+00> : vector<2x16xf32>
    %125 = tpu.matmul %122, %124, %cst_76 {dimension_numbers = #tpu.dot_dimension_numbers<[1], [0], [0], [1], [0, 0, 1, 1], [], []>} : vector<2x16xf32>, vector<16x16xf32>, vector<2x16xf32> -> vector<2x16xf32>
    %126 = vector.extract_strided_slice %70 {offsets = [1, 0], sizes = [2, 16], strides = [1, 1]} : vector<13x16xf32> to vector<2x16xf32>
    %c1_77 = arith.constant 1 : index
    %c0_78 = arith.constant 0 : index
    %c0_79 = arith.constant 0 : index
    %127 = vector.load %arg6[%c1_77, %c0_78, %c0_79] : memref<12x16x16xf32, #tpu.memory_space<vmem>>, vector<1x16x16xf32>
    %128 = vector.shape_cast %127 : vector<1x16x16xf32> to vector<16x16xf32>
    %cst_80 = arith.constant dense<0.000000e+00> : vector<2x16xf32>
    %129 = tpu.matmul %126, %128, %cst_80 {dimension_numbers = #tpu.dot_dimension_numbers<[1], [0], [0], [1], [0, 0, 1, 1], [], []>} : vector<2x16xf32>, vector<16x16xf32>, vector<2x16xf32> -> vector<2x16xf32>
    %130 = arith.addf %125, %129 : vector<2x16xf32>
    %131 = vector.extract_strided_slice %70 {offsets = [2, 0], sizes = [2, 16], strides = [1, 1]} : vector<13x16xf32> to vector<2x16xf32>
    %c2_81 = arith.constant 2 : index
    %c0_82 = arith.constant 0 : index
    %c0_83 = arith.constant 0 : index
    %132 = vector.load %arg6[%c2_81, %c0_82, %c0_83] : memref<12x16x16xf32, #tpu.memory_space<vmem>>, vector<1x16x16xf32>
    %133 = vector.shape_cast %132 : vector<1x16x16xf32> to vector<16x16xf32>
    %cst_84 = arith.constant dense<0.000000e+00> : vector<2x16xf32>
    %134 = tpu.matmul %131, %133, %cst_84 {dimension_numbers = #tpu.dot_dimension_numbers<[1], [0], [0], [1], [0, 0, 1, 1], [], []>} : vector<2x16xf32>, vector<16x16xf32>, vector<2x16xf32> -> vector<2x16xf32>
    %135 = arith.addf %130, %134 : vector<2x16xf32>
    %136 = vector.extract_strided_slice %70 {offsets = [3, 0], sizes = [2, 16], strides = [1, 1]} : vector<13x16xf32> to vector<2x16xf32>
    %c3_85 = arith.constant 3 : index
    %c0_86 = arith.constant 0 : index
    %c0_87 = arith.constant 0 : index
    %137 = vector.load %arg6[%c3_85, %c0_86, %c0_87] : memref<12x16x16xf32, #tpu.memory_space<vmem>>, vector<1x16x16xf32>
    %138 = vector.shape_cast %137 : vector<1x16x16xf32> to vector<16x16xf32>
    %cst_88 = arith.constant dense<0.000000e+00> : vector<2x16xf32>
    %139 = tpu.matmul %136, %138, %cst_88 {dimension_numbers = #tpu.dot_dimension_numbers<[1], [0], [0], [1], [0, 0, 1, 1], [], []>} : vector<2x16xf32>, vector<16x16xf32>, vector<2x16xf32> -> vector<2x16xf32>
    %140 = arith.addf %135, %139 : vector<2x16xf32>
    %141 = vector.extract_strided_slice %70 {offsets = [4, 0], sizes = [2, 16], strides = [1, 1]} : vector<13x16xf32> to vector<2x16xf32>
    %c4_89 = arith.constant 4 : index
    %c0_90 = arith.constant 0 : index
    %c0_91 = arith.constant 0 : index
    %142 = vector.load %arg6[%c4_89, %c0_90, %c0_91] : memref<12x16x16xf32, #tpu.memory_space<vmem>>, vector<1x16x16xf32>
    %143 = vector.shape_cast %142 : vector<1x16x16xf32> to vector<16x16xf32>
    %cst_92 = arith.constant dense<0.000000e+00> : vector<2x16xf32>
    %144 = tpu.matmul %141, %143, %cst_92 {dimension_numbers = #tpu.dot_dimension_numbers<[1], [0], [0], [1], [0, 0, 1, 1], [], []>} : vector<2x16xf32>, vector<16x16xf32>, vector<2x16xf32> -> vector<2x16xf32>
    %145 = arith.addf %140, %144 : vector<2x16xf32>
    %146 = vector.extract_strided_slice %70 {offsets = [5, 0], sizes = [2, 16], strides = [1, 1]} : vector<13x16xf32> to vector<2x16xf32>
    %c5_93 = arith.constant 5 : index
    %c0_94 = arith.constant 0 : index
    %c0_95 = arith.constant 0 : index
    %147 = vector.load %arg6[%c5_93, %c0_94, %c0_95] : memref<12x16x16xf32, #tpu.memory_space<vmem>>, vector<1x16x16xf32>
    %148 = vector.shape_cast %147 : vector<1x16x16xf32> to vector<16x16xf32>
    %cst_96 = arith.constant dense<0.000000e+00> : vector<2x16xf32>
    %149 = tpu.matmul %146, %148, %cst_96 {dimension_numbers = #tpu.dot_dimension_numbers<[1], [0], [0], [1], [0, 0, 1, 1], [], []>} : vector<2x16xf32>, vector<16x16xf32>, vector<2x16xf32> -> vector<2x16xf32>
    %150 = arith.addf %145, %149 : vector<2x16xf32>
    %151 = vector.extract_strided_slice %70 {offsets = [6, 0], sizes = [2, 16], strides = [1, 1]} : vector<13x16xf32> to vector<2x16xf32>
    %c6_97 = arith.constant 6 : index
    %c0_98 = arith.constant 0 : index
    %c0_99 = arith.constant 0 : index
    %152 = vector.load %arg6[%c6_97, %c0_98, %c0_99] : memref<12x16x16xf32, #tpu.memory_space<vmem>>, vector<1x16x16xf32>
    %153 = vector.shape_cast %152 : vector<1x16x16xf32> to vector<16x16xf32>
    %cst_100 = arith.constant dense<0.000000e+00> : vector<2x16xf32>
    %154 = tpu.matmul %151, %153, %cst_100 {dimension_numbers = #tpu.dot_dimension_numbers<[1], [0], [0], [1], [0, 0, 1, 1], [], []>} : vector<2x16xf32>, vector<16x16xf32>, vector<2x16xf32> -> vector<2x16xf32>
    %155 = arith.addf %150, %154 : vector<2x16xf32>
    %156 = vector.extract_strided_slice %70 {offsets = [7, 0], sizes = [2, 16], strides = [1, 1]} : vector<13x16xf32> to vector<2x16xf32>
    %c7_101 = arith.constant 7 : index
    %c0_102 = arith.constant 0 : index
    %c0_103 = arith.constant 0 : index
    %157 = vector.load %arg6[%c7_101, %c0_102, %c0_103] : memref<12x16x16xf32, #tpu.memory_space<vmem>>, vector<1x16x16xf32>
    %158 = vector.shape_cast %157 : vector<1x16x16xf32> to vector<16x16xf32>
    %cst_104 = arith.constant dense<0.000000e+00> : vector<2x16xf32>
    %159 = tpu.matmul %156, %158, %cst_104 {dimension_numbers = #tpu.dot_dimension_numbers<[1], [0], [0], [1], [0, 0, 1, 1], [], []>} : vector<2x16xf32>, vector<16x16xf32>, vector<2x16xf32> -> vector<2x16xf32>
    %160 = arith.addf %155, %159 : vector<2x16xf32>
    %161 = vector.extract_strided_slice %70 {offsets = [8, 0], sizes = [2, 16], strides = [1, 1]} : vector<13x16xf32> to vector<2x16xf32>
    %c8_105 = arith.constant 8 : index
    %c0_106 = arith.constant 0 : index
    %c0_107 = arith.constant 0 : index
    %162 = vector.load %arg6[%c8_105, %c0_106, %c0_107] : memref<12x16x16xf32, #tpu.memory_space<vmem>>, vector<1x16x16xf32>
    %163 = vector.shape_cast %162 : vector<1x16x16xf32> to vector<16x16xf32>
    %cst_108 = arith.constant dense<0.000000e+00> : vector<2x16xf32>
    %164 = tpu.matmul %161, %163, %cst_108 {dimension_numbers = #tpu.dot_dimension_numbers<[1], [0], [0], [1], [0, 0, 1, 1], [], []>} : vector<2x16xf32>, vector<16x16xf32>, vector<2x16xf32> -> vector<2x16xf32>
    %165 = arith.addf %160, %164 : vector<2x16xf32>
    %166 = vector.extract_strided_slice %70 {offsets = [9, 0], sizes = [2, 16], strides = [1, 1]} : vector<13x16xf32> to vector<2x16xf32>
    %c9_109 = arith.constant 9 : index
    %c0_110 = arith.constant 0 : index
    %c0_111 = arith.constant 0 : index
    %167 = vector.load %arg6[%c9_109, %c0_110, %c0_111] : memref<12x16x16xf32, #tpu.memory_space<vmem>>, vector<1x16x16xf32>
    %168 = vector.shape_cast %167 : vector<1x16x16xf32> to vector<16x16xf32>
    %cst_112 = arith.constant dense<0.000000e+00> : vector<2x16xf32>
    %169 = tpu.matmul %166, %168, %cst_112 {dimension_numbers = #tpu.dot_dimension_numbers<[1], [0], [0], [1], [0, 0, 1, 1], [], []>} : vector<2x16xf32>, vector<16x16xf32>, vector<2x16xf32> -> vector<2x16xf32>
    %170 = arith.addf %165, %169 : vector<2x16xf32>
    %171 = vector.extract_strided_slice %70 {offsets = [10, 0], sizes = [2, 16], strides = [1, 1]} : vector<13x16xf32> to vector<2x16xf32>
    %c10_113 = arith.constant 10 : index
    %c0_114 = arith.constant 0 : index
    %c0_115 = arith.constant 0 : index
    %172 = vector.load %arg6[%c10_113, %c0_114, %c0_115] : memref<12x16x16xf32, #tpu.memory_space<vmem>>, vector<1x16x16xf32>
    %173 = vector.shape_cast %172 : vector<1x16x16xf32> to vector<16x16xf32>
    %cst_116 = arith.constant dense<0.000000e+00> : vector<2x16xf32>
    %174 = tpu.matmul %171, %173, %cst_116 {dimension_numbers = #tpu.dot_dimension_numbers<[1], [0], [0], [1], [0, 0, 1, 1], [], []>} : vector<2x16xf32>, vector<16x16xf32>, vector<2x16xf32> -> vector<2x16xf32>
    %175 = arith.addf %170, %174 : vector<2x16xf32>
    %176 = vector.extract_strided_slice %70 {offsets = [11, 0], sizes = [2, 16], strides = [1, 1]} : vector<13x16xf32> to vector<2x16xf32>
    %c11_117 = arith.constant 11 : index
    %c0_118 = arith.constant 0 : index
    %c0_119 = arith.constant 0 : index
    %177 = vector.load %arg6[%c11_117, %c0_118, %c0_119] : memref<12x16x16xf32, #tpu.memory_space<vmem>>, vector<1x16x16xf32>
    %178 = vector.shape_cast %177 : vector<1x16x16xf32> to vector<16x16xf32>
    %cst_120 = arith.constant dense<0.000000e+00> : vector<2x16xf32>
    %179 = tpu.matmul %176, %178, %cst_120 {dimension_numbers = #tpu.dot_dimension_numbers<[1], [0], [0], [1], [0, 0, 1, 1], [], []>} : vector<2x16xf32>, vector<16x16xf32>, vector<2x16xf32> -> vector<2x16xf32>
    %180 = arith.addf %175, %179 : vector<2x16xf32>
    %181 = vector.extract_strided_slice %180 {offsets = [0, 0], sizes = [1, 16], strides = [1, 1]} : vector<2x16xf32> to vector<1x16xf32>
    %182 = arith.addf %181, %121 : vector<1x16xf32>
    %cst_121 = arith.constant 0.000000e+00 : f32
    %183 = vector.broadcast %cst_121 : f32 to vector<1x16xf32>
    %184 = arith.maximumf %182, %183 : vector<1x16xf32>
    %c0_122 = arith.constant 0 : index
    %c0_123 = arith.constant 0 : index
    %185 = vector.load %arg9[%c0_122, %c0_123] : memref<1x32xf32, #tpu.memory_space<vmem>>, vector<1x32xf32>
    %186 = vector.extract_strided_slice %1 {offsets = [0, 0], sizes = [22, 4], strides = [1, 1]} : vector<24x4xf32> to vector<22x4xf32>
    %c0_124 = arith.constant 0 : index
    %c0_125 = arith.constant 0 : index
    %c0_126 = arith.constant 0 : index
    %187 = vector.load %arg8[%c0_124, %c0_125, %c0_126] : memref<3x4x32xf32, #tpu.memory_space<vmem>>, vector<1x4x32xf32>
    %188 = vector.shape_cast %187 : vector<1x4x32xf32> to vector<4x32xf32>
    %cst_127 = arith.constant dense<0.000000e+00> : vector<22x32xf32>
    %189 = tpu.matmul %186, %188, %cst_127 {dimension_numbers = #tpu.dot_dimension_numbers<[1], [0], [0], [1], [0, 0, 1, 1], [], []>} : vector<22x4xf32>, vector<4x32xf32>, vector<22x32xf32> -> vector<22x32xf32>
    %190 = vector.extract_strided_slice %1 {offsets = [1, 0], sizes = [22, 4], strides = [1, 1]} : vector<24x4xf32> to vector<22x4xf32>
    %c1_128 = arith.constant 1 : index
    %c0_129 = arith.constant 0 : index
    %c0_130 = arith.constant 0 : index
    %191 = vector.load %arg8[%c1_128, %c0_129, %c0_130] : memref<3x4x32xf32, #tpu.memory_space<vmem>>, vector<1x4x32xf32>
    %192 = vector.shape_cast %191 : vector<1x4x32xf32> to vector<4x32xf32>
    %cst_131 = arith.constant dense<0.000000e+00> : vector<22x32xf32>
    %193 = tpu.matmul %190, %192, %cst_131 {dimension_numbers = #tpu.dot_dimension_numbers<[1], [0], [0], [1], [0, 0, 1, 1], [], []>} : vector<22x4xf32>, vector<4x32xf32>, vector<22x32xf32> -> vector<22x32xf32>
    %194 = arith.addf %189, %193 : vector<22x32xf32>
    %195 = vector.extract_strided_slice %1 {offsets = [2, 0], sizes = [22, 4], strides = [1, 1]} : vector<24x4xf32> to vector<22x4xf32>
    %c2_132 = arith.constant 2 : index
    %c0_133 = arith.constant 0 : index
    %c0_134 = arith.constant 0 : index
    %196 = vector.load %arg8[%c2_132, %c0_133, %c0_134] : memref<3x4x32xf32, #tpu.memory_space<vmem>>, vector<1x4x32xf32>
    %197 = vector.shape_cast %196 : vector<1x4x32xf32> to vector<4x32xf32>
    %cst_135 = arith.constant dense<0.000000e+00> : vector<22x32xf32>
    %198 = tpu.matmul %195, %197, %cst_135 {dimension_numbers = #tpu.dot_dimension_numbers<[1], [0], [0], [1], [0, 0, 1, 1], [], []>} : vector<22x4xf32>, vector<4x32xf32>, vector<22x32xf32> -> vector<22x32xf32>
    %199 = arith.addf %194, %198 : vector<22x32xf32>
    %200 = vector.broadcast %185 : vector<1x32xf32> to vector<22x32xf32>
    %201 = arith.addf %199, %200 : vector<22x32xf32>
    %cst_136 = arith.constant 0.000000e+00 : f32
    %202 = vector.broadcast %cst_136 : f32 to vector<22x32xf32>
    %203 = arith.maximumf %201, %202 : vector<22x32xf32>
    %204 = vector.extract_strided_slice %203 {offsets = [0, 0], sizes = [22, 16], strides = [1, 1]} : vector<22x32xf32> to vector<22x16xf32>
    %205 = vector.extract_strided_slice %203 {offsets = [0, 16], sizes = [22, 16], strides = [1, 1]} : vector<22x32xf32> to vector<22x16xf32>
    %c0_137 = arith.constant 0 : index
    %c0_138 = arith.constant 0 : index
    %206 = vector.load %arg11[%c0_137, %c0_138] : memref<1x16xf32, #tpu.memory_space<vmem>>, vector<1x16xf32>
    %207 = tpu.iota {dimensions = array<i32: 0>} : vector<24x22xi32>
    %208 = tpu.iota {dimensions = array<i32: 1>} : vector<24x22xi32>
    %c1_i32 = arith.constant 1 : i32
    %209 = vector.broadcast %c1_i32 : i32 to vector<24x22xi32>
    %210 = arith.addi %208, %209 : vector<24x22xi32>
    %211 = arith.cmpi eq, %207, %210 : vector<24x22xi32>
    %212 = arith.extui %211 : vector<24x22xi1> to vector<24x22xi32>
    %213 = arith.sitofp %212 : vector<24x22xi32> to vector<24x22xf32>
    %cst_139 = arith.constant dense<0.000000e+00> : vector<24x16xf32>
    %214 = tpu.matmul %213, %204, %cst_139 {dimension_numbers = #tpu.dot_dimension_numbers<[1], [0], [0], [1], [0, 0, 1, 1], [], []>} : vector<24x22xf32>, vector<22x16xf32>, vector<24x16xf32> -> vector<24x16xf32>
    %215 = vector.extract_strided_slice %214 {offsets = [0, 0], sizes = [13, 16], strides = [1, 1]} : vector<24x16xf32> to vector<13x16xf32>
    %c0_140 = arith.constant 0 : index
    %c0_141 = arith.constant 0 : index
    %c0_142 = arith.constant 0 : index
    %216 = vector.load %arg10[%c0_140, %c0_141, %c0_142] : memref<12x16x16xf32, #tpu.memory_space<vmem>>, vector<1x16x16xf32>
    %217 = vector.shape_cast %216 : vector<1x16x16xf32> to vector<16x16xf32>
    %cst_143 = arith.constant dense<0.000000e+00> : vector<13x16xf32>
    %218 = tpu.matmul %215, %217, %cst_143 {dimension_numbers = #tpu.dot_dimension_numbers<[1], [0], [0], [1], [0, 0, 1, 1], [], []>} : vector<13x16xf32>, vector<16x16xf32>, vector<13x16xf32> -> vector<13x16xf32>
    %219 = vector.extract_strided_slice %214 {offsets = [1, 0], sizes = [13, 16], strides = [1, 1]} : vector<24x16xf32> to vector<13x16xf32>
    %c1_144 = arith.constant 1 : index
    %c0_145 = arith.constant 0 : index
    %c0_146 = arith.constant 0 : index
    %220 = vector.load %arg10[%c1_144, %c0_145, %c0_146] : memref<12x16x16xf32, #tpu.memory_space<vmem>>, vector<1x16x16xf32>
    %221 = vector.shape_cast %220 : vector<1x16x16xf32> to vector<16x16xf32>
    %cst_147 = arith.constant dense<0.000000e+00> : vector<13x16xf32>
    %222 = tpu.matmul %219, %221, %cst_147 {dimension_numbers = #tpu.dot_dimension_numbers<[1], [0], [0], [1], [0, 0, 1, 1], [], []>} : vector<13x16xf32>, vector<16x16xf32>, vector<13x16xf32> -> vector<13x16xf32>
    %223 = arith.addf %218, %222 : vector<13x16xf32>
    %224 = vector.extract_strided_slice %214 {offsets = [2, 0], sizes = [13, 16], strides = [1, 1]} : vector<24x16xf32> to vector<13x16xf32>
    %c2_148 = arith.constant 2 : index
    %c0_149 = arith.constant 0 : index
    %c0_150 = arith.constant 0 : index
    %225 = vector.load %arg10[%c2_148, %c0_149, %c0_150] : memref<12x16x16xf32, #tpu.memory_space<vmem>>, vector<1x16x16xf32>
    %226 = vector.shape_cast %225 : vector<1x16x16xf32> to vector<16x16xf32>
    %cst_151 = arith.constant dense<0.000000e+00> : vector<13x16xf32>
    %227 = tpu.matmul %224, %226, %cst_151 {dimension_numbers = #tpu.dot_dimension_numbers<[1], [0], [0], [1], [0, 0, 1, 1], [], []>} : vector<13x16xf32>, vector<16x16xf32>, vector<13x16xf32> -> vector<13x16xf32>
    %228 = arith.addf %223, %227 : vector<13x16xf32>
    %229 = vector.extract_strided_slice %214 {offsets = [3, 0], sizes = [13, 16], strides = [1, 1]} : vector<24x16xf32> to vector<13x16xf32>
    %c3_152 = arith.constant 3 : index
    %c0_153 = arith.constant 0 : index
    %c0_154 = arith.constant 0 : index
    %230 = vector.load %arg10[%c3_152, %c0_153, %c0_154] : memref<12x16x16xf32, #tpu.memory_space<vmem>>, vector<1x16x16xf32>
    %231 = vector.shape_cast %230 : vector<1x16x16xf32> to vector<16x16xf32>
    %cst_155 = arith.constant dense<0.000000e+00> : vector<13x16xf32>
    %232 = tpu.matmul %229, %231, %cst_155 {dimension_numbers = #tpu.dot_dimension_numbers<[1], [0], [0], [1], [0, 0, 1, 1], [], []>} : vector<13x16xf32>, vector<16x16xf32>, vector<13x16xf32> -> vector<13x16xf32>
    %233 = arith.addf %228, %232 : vector<13x16xf32>
    %234 = vector.extract_strided_slice %214 {offsets = [4, 0], sizes = [13, 16], strides = [1, 1]} : vector<24x16xf32> to vector<13x16xf32>
    %c4_156 = arith.constant 4 : index
    %c0_157 = arith.constant 0 : index
    %c0_158 = arith.constant 0 : index
    %235 = vector.load %arg10[%c4_156, %c0_157, %c0_158] : memref<12x16x16xf32, #tpu.memory_space<vmem>>, vector<1x16x16xf32>
    %236 = vector.shape_cast %235 : vector<1x16x16xf32> to vector<16x16xf32>
    %cst_159 = arith.constant dense<0.000000e+00> : vector<13x16xf32>
    %237 = tpu.matmul %234, %236, %cst_159 {dimension_numbers = #tpu.dot_dimension_numbers<[1], [0], [0], [1], [0, 0, 1, 1], [], []>} : vector<13x16xf32>, vector<16x16xf32>, vector<13x16xf32> -> vector<13x16xf32>
    %238 = arith.addf %233, %237 : vector<13x16xf32>
    %239 = vector.extract_strided_slice %214 {offsets = [5, 0], sizes = [13, 16], strides = [1, 1]} : vector<24x16xf32> to vector<13x16xf32>
    %c5_160 = arith.constant 5 : index
    %c0_161 = arith.constant 0 : index
    %c0_162 = arith.constant 0 : index
    %240 = vector.load %arg10[%c5_160, %c0_161, %c0_162] : memref<12x16x16xf32, #tpu.memory_space<vmem>>, vector<1x16x16xf32>
    %241 = vector.shape_cast %240 : vector<1x16x16xf32> to vector<16x16xf32>
    %cst_163 = arith.constant dense<0.000000e+00> : vector<13x16xf32>
    %242 = tpu.matmul %239, %241, %cst_163 {dimension_numbers = #tpu.dot_dimension_numbers<[1], [0], [0], [1], [0, 0, 1, 1], [], []>} : vector<13x16xf32>, vector<16x16xf32>, vector<13x16xf32> -> vector<13x16xf32>
    %243 = arith.addf %238, %242 : vector<13x16xf32>
    %244 = vector.extract_strided_slice %214 {offsets = [6, 0], sizes = [13, 16], strides = [1, 1]} : vector<24x16xf32> to vector<13x16xf32>
    %c6_164 = arith.constant 6 : index
    %c0_165 = arith.constant 0 : index
    %c0_166 = arith.constant 0 : index
    %245 = vector.load %arg10[%c6_164, %c0_165, %c0_166] : memref<12x16x16xf32, #tpu.memory_space<vmem>>, vector<1x16x16xf32>
    %246 = vector.shape_cast %245 : vector<1x16x16xf32> to vector<16x16xf32>
    %cst_167 = arith.constant dense<0.000000e+00> : vector<13x16xf32>
    %247 = tpu.matmul %244, %246, %cst_167 {dimension_numbers = #tpu.dot_dimension_numbers<[1], [0], [0], [1], [0, 0, 1, 1], [], []>} : vector<13x16xf32>, vector<16x16xf32>, vector<13x16xf32> -> vector<13x16xf32>
    %248 = arith.addf %243, %247 : vector<13x16xf32>
    %249 = vector.extract_strided_slice %214 {offsets = [7, 0], sizes = [13, 16], strides = [1, 1]} : vector<24x16xf32> to vector<13x16xf32>
    %c7_168 = arith.constant 7 : index
    %c0_169 = arith.constant 0 : index
    %c0_170 = arith.constant 0 : index
    %250 = vector.load %arg10[%c7_168, %c0_169, %c0_170] : memref<12x16x16xf32, #tpu.memory_space<vmem>>, vector<1x16x16xf32>
    %251 = vector.shape_cast %250 : vector<1x16x16xf32> to vector<16x16xf32>
    %cst_171 = arith.constant dense<0.000000e+00> : vector<13x16xf32>
    %252 = tpu.matmul %249, %251, %cst_171 {dimension_numbers = #tpu.dot_dimension_numbers<[1], [0], [0], [1], [0, 0, 1, 1], [], []>} : vector<13x16xf32>, vector<16x16xf32>, vector<13x16xf32> -> vector<13x16xf32>
    %253 = arith.addf %248, %252 : vector<13x16xf32>
    %254 = vector.extract_strided_slice %214 {offsets = [8, 0], sizes = [13, 16], strides = [1, 1]} : vector<24x16xf32> to vector<13x16xf32>
    %c8_172 = arith.constant 8 : index
    %c0_173 = arith.constant 0 : index
    %c0_174 = arith.constant 0 : index
    %255 = vector.load %arg10[%c8_172, %c0_173, %c0_174] : memref<12x16x16xf32, #tpu.memory_space<vmem>>, vector<1x16x16xf32>
    %256 = vector.shape_cast %255 : vector<1x16x16xf32> to vector<16x16xf32>
    %cst_175 = arith.constant dense<0.000000e+00> : vector<13x16xf32>
    %257 = tpu.matmul %254, %256, %cst_175 {dimension_numbers = #tpu.dot_dimension_numbers<[1], [0], [0], [1], [0, 0, 1, 1], [], []>} : vector<13x16xf32>, vector<16x16xf32>, vector<13x16xf32> -> vector<13x16xf32>
    %258 = arith.addf %253, %257 : vector<13x16xf32>
    %259 = vector.extract_strided_slice %214 {offsets = [9, 0], sizes = [13, 16], strides = [1, 1]} : vector<24x16xf32> to vector<13x16xf32>
    %c9_176 = arith.constant 9 : index
    %c0_177 = arith.constant 0 : index
    %c0_178 = arith.constant 0 : index
    %260 = vector.load %arg10[%c9_176, %c0_177, %c0_178] : memref<12x16x16xf32, #tpu.memory_space<vmem>>, vector<1x16x16xf32>
    %261 = vector.shape_cast %260 : vector<1x16x16xf32> to vector<16x16xf32>
    %cst_179 = arith.constant dense<0.000000e+00> : vector<13x16xf32>
    %262 = tpu.matmul %259, %261, %cst_179 {dimension_numbers = #tpu.dot_dimension_numbers<[1], [0], [0], [1], [0, 0, 1, 1], [], []>} : vector<13x16xf32>, vector<16x16xf32>, vector<13x16xf32> -> vector<13x16xf32>
    %263 = arith.addf %258, %262 : vector<13x16xf32>
    %264 = vector.extract_strided_slice %214 {offsets = [10, 0], sizes = [13, 16], strides = [1, 1]} : vector<24x16xf32> to vector<13x16xf32>
    %c10_180 = arith.constant 10 : index
    %c0_181 = arith.constant 0 : index
    %c0_182 = arith.constant 0 : index
    %265 = vector.load %arg10[%c10_180, %c0_181, %c0_182] : memref<12x16x16xf32, #tpu.memory_space<vmem>>, vector<1x16x16xf32>
    %266 = vector.shape_cast %265 : vector<1x16x16xf32> to vector<16x16xf32>
    %cst_183 = arith.constant dense<0.000000e+00> : vector<13x16xf32>
    %267 = tpu.matmul %264, %266, %cst_183 {dimension_numbers = #tpu.dot_dimension_numbers<[1], [0], [0], [1], [0, 0, 1, 1], [], []>} : vector<13x16xf32>, vector<16x16xf32>, vector<13x16xf32> -> vector<13x16xf32>
    %268 = arith.addf %263, %267 : vector<13x16xf32>
    %269 = vector.extract_strided_slice %214 {offsets = [11, 0], sizes = [13, 16], strides = [1, 1]} : vector<24x16xf32> to vector<13x16xf32>
    %c11_184 = arith.constant 11 : index
    %c0_185 = arith.constant 0 : index
    %c0_186 = arith.constant 0 : index
    %270 = vector.load %arg10[%c11_184, %c0_185, %c0_186] : memref<12x16x16xf32, #tpu.memory_space<vmem>>, vector<1x16x16xf32>
    %271 = vector.shape_cast %270 : vector<1x16x16xf32> to vector<16x16xf32>
    %cst_187 = arith.constant dense<0.000000e+00> : vector<13x16xf32>
    %272 = tpu.matmul %269, %271, %cst_187 {dimension_numbers = #tpu.dot_dimension_numbers<[1], [0], [0], [1], [0, 0, 1, 1], [], []>} : vector<13x16xf32>, vector<16x16xf32>, vector<13x16xf32> -> vector<13x16xf32>
    %273 = arith.addf %268, %272 : vector<13x16xf32>
    %274 = vector.broadcast %206 : vector<1x16xf32> to vector<13x16xf32>
    %275 = arith.addf %273, %274 : vector<13x16xf32>
    %cst_188 = arith.constant 0.000000e+00 : f32
    %276 = vector.broadcast %cst_188 : f32 to vector<13x16xf32>
    %277 = arith.maximumf %275, %276 : vector<13x16xf32>
    %c0_189 = arith.constant 0 : index
    %c0_190 = arith.constant 0 : index
    %278 = vector.load %arg13[%c0_189, %c0_190] : memref<1x16xf32, #tpu.memory_space<vmem>>, vector<1x16xf32>
    %279 = vector.extract_strided_slice %205 {offsets = [0, 0], sizes = [20, 16], strides = [1, 1]} : vector<22x16xf32> to vector<20x16xf32>
    %c0_191 = arith.constant 0 : index
    %c0_192 = arith.constant 0 : index
    %c0_193 = arith.constant 0 : index
    %280 = vector.load %arg12[%c0_191, %c0_192, %c0_193] : memref<3x16x16xf32, #tpu.memory_space<vmem>>, vector<1x16x16xf32>
    %281 = vector.shape_cast %280 : vector<1x16x16xf32> to vector<16x16xf32>
    %cst_194 = arith.constant dense<0.000000e+00> : vector<20x16xf32>
    %282 = tpu.matmul %279, %281, %cst_194 {dimension_numbers = #tpu.dot_dimension_numbers<[1], [0], [0], [1], [0, 0, 1, 1], [], []>} : vector<20x16xf32>, vector<16x16xf32>, vector<20x16xf32> -> vector<20x16xf32>
    %283 = vector.extract_strided_slice %205 {offsets = [1, 0], sizes = [20, 16], strides = [1, 1]} : vector<22x16xf32> to vector<20x16xf32>
    %c1_195 = arith.constant 1 : index
    %c0_196 = arith.constant 0 : index
    %c0_197 = arith.constant 0 : index
    %284 = vector.load %arg12[%c1_195, %c0_196, %c0_197] : memref<3x16x16xf32, #tpu.memory_space<vmem>>, vector<1x16x16xf32>
    %285 = vector.shape_cast %284 : vector<1x16x16xf32> to vector<16x16xf32>
    %cst_198 = arith.constant dense<0.000000e+00> : vector<20x16xf32>
    %286 = tpu.matmul %283, %285, %cst_198 {dimension_numbers = #tpu.dot_dimension_numbers<[1], [0], [0], [1], [0, 0, 1, 1], [], []>} : vector<20x16xf32>, vector<16x16xf32>, vector<20x16xf32> -> vector<20x16xf32>
    %287 = arith.addf %282, %286 : vector<20x16xf32>
    %288 = vector.extract_strided_slice %205 {offsets = [2, 0], sizes = [20, 16], strides = [1, 1]} : vector<22x16xf32> to vector<20x16xf32>
    %c2_199 = arith.constant 2 : index
    %c0_200 = arith.constant 0 : index
    %c0_201 = arith.constant 0 : index
    %289 = vector.load %arg12[%c2_199, %c0_200, %c0_201] : memref<3x16x16xf32, #tpu.memory_space<vmem>>, vector<1x16x16xf32>
    %290 = vector.shape_cast %289 : vector<1x16x16xf32> to vector<16x16xf32>
    %cst_202 = arith.constant dense<0.000000e+00> : vector<20x16xf32>
    %291 = tpu.matmul %288, %290, %cst_202 {dimension_numbers = #tpu.dot_dimension_numbers<[1], [0], [0], [1], [0, 0, 1, 1], [], []>} : vector<20x16xf32>, vector<16x16xf32>, vector<20x16xf32> -> vector<20x16xf32>
    %292 = arith.addf %287, %291 : vector<20x16xf32>
    %293 = vector.broadcast %278 : vector<1x16xf32> to vector<20x16xf32>
    %294 = arith.addf %292, %293 : vector<20x16xf32>
    %cst_203 = arith.constant 0.000000e+00 : f32
    %295 = vector.broadcast %cst_203 : f32 to vector<20x16xf32>
    %296 = arith.maximumf %294, %295 : vector<20x16xf32>
    %c0_204 = arith.constant 0 : index
    %c0_205 = arith.constant 0 : index
    %297 = vector.load %arg15[%c0_204, %c0_205] : memref<1x16xf32, #tpu.memory_space<vmem>>, vector<1x16xf32>
    %298 = vector.extract_strided_slice %296 {offsets = [0, 0], sizes = [18, 16], strides = [1, 1]} : vector<20x16xf32> to vector<18x16xf32>
    %c0_206 = arith.constant 0 : index
    %c0_207 = arith.constant 0 : index
    %c0_208 = arith.constant 0 : index
    %299 = vector.load %arg14[%c0_206, %c0_207, %c0_208] : memref<3x16x16xf32, #tpu.memory_space<vmem>>, vector<1x16x16xf32>
    %300 = vector.shape_cast %299 : vector<1x16x16xf32> to vector<16x16xf32>
    %cst_209 = arith.constant dense<0.000000e+00> : vector<18x16xf32>
    %301 = tpu.matmul %298, %300, %cst_209 {dimension_numbers = #tpu.dot_dimension_numbers<[1], [0], [0], [1], [0, 0, 1, 1], [], []>} : vector<18x16xf32>, vector<16x16xf32>, vector<18x16xf32> -> vector<18x16xf32>
    %302 = vector.extract_strided_slice %296 {offsets = [1, 0], sizes = [18, 16], strides = [1, 1]} : vector<20x16xf32> to vector<18x16xf32>
    %c1_210 = arith.constant 1 : index
    %c0_211 = arith.constant 0 : index
    %c0_212 = arith.constant 0 : index
    %303 = vector.load %arg14[%c1_210, %c0_211, %c0_212] : memref<3x16x16xf32, #tpu.memory_space<vmem>>, vector<1x16x16xf32>
    %304 = vector.shape_cast %303 : vector<1x16x16xf32> to vector<16x16xf32>
    %cst_213 = arith.constant dense<0.000000e+00> : vector<18x16xf32>
    %305 = tpu.matmul %302, %304, %cst_213 {dimension_numbers = #tpu.dot_dimension_numbers<[1], [0], [0], [1], [0, 0, 1, 1], [], []>} : vector<18x16xf32>, vector<16x16xf32>, vector<18x16xf32> -> vector<18x16xf32>
    %306 = arith.addf %301, %305 : vector<18x16xf32>
    %307 = vector.extract_strided_slice %296 {offsets = [2, 0], sizes = [18, 16], strides = [1, 1]} : vector<20x16xf32> to vector<18x16xf32>
    %c2_214 = arith.constant 2 : index
    %c0_215 = arith.constant 0 : index
    %c0_216 = arith.constant 0 : index
    %308 = vector.load %arg14[%c2_214, %c0_215, %c0_216] : memref<3x16x16xf32, #tpu.memory_space<vmem>>, vector<1x16x16xf32>
    %309 = vector.shape_cast %308 : vector<1x16x16xf32> to vector<16x16xf32>
    %cst_217 = arith.constant dense<0.000000e+00> : vector<18x16xf32>
    %310 = tpu.matmul %307, %309, %cst_217 {dimension_numbers = #tpu.dot_dimension_numbers<[1], [0], [0], [1], [0, 0, 1, 1], [], []>} : vector<18x16xf32>, vector<16x16xf32>, vector<18x16xf32> -> vector<18x16xf32>
    %311 = arith.addf %306, %310 : vector<18x16xf32>
    %312 = vector.broadcast %297 : vector<1x16xf32> to vector<18x16xf32>
    %313 = arith.addf %311, %312 : vector<18x16xf32>
    %cst_218 = arith.constant 0.000000e+00 : f32
    %314 = vector.broadcast %cst_218 : f32 to vector<18x16xf32>
    %315 = arith.maximumf %313, %314 : vector<18x16xf32>
    %c0_219 = arith.constant 0 : index
    %c0_220 = arith.constant 0 : index
    %316 = vector.load %arg17[%c0_219, %c0_220] : memref<1x16xf32, #tpu.memory_space<vmem>>, vector<1x16xf32>
    %317 = vector.extract_strided_slice %315 {offsets = [0, 0], sizes = [16, 16], strides = [1, 1]} : vector<18x16xf32> to vector<16x16xf32>
    %c0_221 = arith.constant 0 : index
    %c0_222 = arith.constant 0 : index
    %c0_223 = arith.constant 0 : index
    %318 = vector.load %arg16[%c0_221, %c0_222, %c0_223] : memref<3x16x16xf32, #tpu.memory_space<vmem>>, vector<1x16x16xf32>
    %319 = vector.shape_cast %318 : vector<1x16x16xf32> to vector<16x16xf32>
    %cst_224 = arith.constant dense<0.000000e+00> : vector<16x16xf32>
    %320 = tpu.matmul %317, %319, %cst_224 {dimension_numbers = #tpu.dot_dimension_numbers<[1], [0], [0], [1], [0, 0, 1, 1], [], []>} : vector<16x16xf32>, vector<16x16xf32>, vector<16x16xf32> -> vector<16x16xf32>
    %321 = vector.extract_strided_slice %315 {offsets = [1, 0], sizes = [16, 16], strides = [1, 1]} : vector<18x16xf32> to vector<16x16xf32>
    %c1_225 = arith.constant 1 : index
    %c0_226 = arith.constant 0 : index
    %c0_227 = arith.constant 0 : index
    %322 = vector.load %arg16[%c1_225, %c0_226, %c0_227] : memref<3x16x16xf32, #tpu.memory_space<vmem>>, vector<1x16x16xf32>
    %323 = vector.shape_cast %322 : vector<1x16x16xf32> to vector<16x16xf32>
    %cst_228 = arith.constant dense<0.000000e+00> : vector<16x16xf32>
    %324 = tpu.matmul %321, %323, %cst_228 {dimension_numbers = #tpu.dot_dimension_numbers<[1], [0], [0], [1], [0, 0, 1, 1], [], []>} : vector<16x16xf32>, vector<16x16xf32>, vector<16x16xf32> -> vector<16x16xf32>
    %325 = arith.addf %320, %324 : vector<16x16xf32>
    %326 = vector.extract_strided_slice %315 {offsets = [2, 0], sizes = [16, 16], strides = [1, 1]} : vector<18x16xf32> to vector<16x16xf32>
    %c2_229 = arith.constant 2 : index
    %c0_230 = arith.constant 0 : index
    %c0_231 = arith.constant 0 : index
    %327 = vector.load %arg16[%c2_229, %c0_230, %c0_231] : memref<3x16x16xf32, #tpu.memory_space<vmem>>, vector<1x16x16xf32>
    %328 = vector.shape_cast %327 : vector<1x16x16xf32> to vector<16x16xf32>
    %cst_232 = arith.constant dense<0.000000e+00> : vector<16x16xf32>
    %329 = tpu.matmul %326, %328, %cst_232 {dimension_numbers = #tpu.dot_dimension_numbers<[1], [0], [0], [1], [0, 0, 1, 1], [], []>} : vector<16x16xf32>, vector<16x16xf32>, vector<16x16xf32> -> vector<16x16xf32>
    %330 = arith.addf %325, %329 : vector<16x16xf32>
    %331 = tpu.iota {dimensions = array<i32: 0>} : vector<8x16xi32>
    %332 = tpu.iota {dimensions = array<i32: 1>} : vector<8x16xi32>
    %c2_i32_233 = arith.constant 2 : i32
    %333 = vector.broadcast %c2_i32_233 : i32 to vector<8x16xi32>
    %334 = arith.muli %333, %331 : vector<8x16xi32>
    %335 = arith.cmpi eq, %332, %334 : vector<8x16xi32>
    %336 = arith.extui %335 : vector<8x16xi1> to vector<8x16xi32>
    %337 = arith.sitofp %336 : vector<8x16xi32> to vector<8x16xf32>
    %cst_234 = arith.constant dense<0.000000e+00> : vector<8x16xf32>
    %338 = tpu.matmul %337, %330, %cst_234 {dimension_numbers = #tpu.dot_dimension_numbers<[1], [0], [0], [1], [0, 0, 1, 1], [], []>} : vector<8x16xf32>, vector<16x16xf32>, vector<8x16xf32> -> vector<8x16xf32>
    %339 = vector.broadcast %316 : vector<1x16xf32> to vector<8x16xf32>
    %340 = arith.addf %338, %339 : vector<8x16xf32>
    %cst_235 = arith.constant 0.000000e+00 : f32
    %341 = vector.broadcast %cst_235 : f32 to vector<8x16xf32>
    %342 = arith.maximumf %340, %341 : vector<8x16xf32>
    %c0_236 = arith.constant 0 : index
    %c0_237 = arith.constant 0 : index
    %343 = vector.load %arg19[%c0_236, %c0_237] : memref<1x32xf32, #tpu.memory_space<vmem>>, vector<1x32xf32>
    %344 = tpu.iota {dimensions = array<i32: 0>} : vector<26x24xi32>
    %345 = tpu.iota {dimensions = array<i32: 1>} : vector<26x24xi32>
    %c1_i32_238 = arith.constant 1 : i32
    %346 = vector.broadcast %c1_i32_238 : i32 to vector<26x24xi32>
    %347 = arith.addi %345, %346 : vector<26x24xi32>
    %348 = arith.cmpi eq, %344, %347 : vector<26x24xi32>
    %349 = arith.extui %348 : vector<26x24xi1> to vector<26x24xi32>
    %350 = arith.sitofp %349 : vector<26x24xi32> to vector<26x24xf32>
    %cst_239 = arith.constant dense<0.000000e+00> : vector<26x4xf32>
    %351 = tpu.matmul %350, %1, %cst_239 {dimension_numbers = #tpu.dot_dimension_numbers<[1], [0], [0], [1], [0, 0, 1, 1], [], []>} : vector<26x24xf32>, vector<24x4xf32>, vector<26x4xf32> -> vector<26x4xf32>
    %c0_240 = arith.constant 0 : index
    %c0_241 = arith.constant 0 : index
    %c0_242 = arith.constant 0 : index
    %352 = vector.load %arg18[%c0_240, %c0_241, %c0_242] : memref<1x4x32xf32, #tpu.memory_space<vmem>>, vector<1x4x32xf32>
    %353 = vector.shape_cast %352 : vector<1x4x32xf32> to vector<4x32xf32>
    %cst_243 = arith.constant dense<0.000000e+00> : vector<26x32xf32>
    %354 = tpu.matmul %351, %353, %cst_243 {dimension_numbers = #tpu.dot_dimension_numbers<[1], [0], [0], [1], [0, 0, 1, 1], [], []>} : vector<26x4xf32>, vector<4x32xf32>, vector<26x32xf32> -> vector<26x32xf32>
    %355 = tpu.iota {dimensions = array<i32: 0>} : vector<13x26xi32>
    %356 = tpu.iota {dimensions = array<i32: 1>} : vector<13x26xi32>
    %c2_i32_244 = arith.constant 2 : i32
    %357 = vector.broadcast %c2_i32_244 : i32 to vector<13x26xi32>
    %358 = arith.muli %357, %355 : vector<13x26xi32>
    %359 = arith.cmpi eq, %356, %358 : vector<13x26xi32>
    %360 = arith.extui %359 : vector<13x26xi1> to vector<13x26xi32>
    %361 = arith.sitofp %360 : vector<13x26xi32> to vector<13x26xf32>
    %cst_245 = arith.constant dense<0.000000e+00> : vector<13x32xf32>
    %362 = tpu.matmul %361, %354, %cst_245 {dimension_numbers = #tpu.dot_dimension_numbers<[1], [0], [0], [1], [0, 0, 1, 1], [], []>} : vector<13x26xf32>, vector<26x32xf32>, vector<13x32xf32> -> vector<13x32xf32>
    %363 = vector.broadcast %343 : vector<1x32xf32> to vector<13x32xf32>
    %364 = arith.addf %362, %363 : vector<13x32xf32>
    %365 = vector.extract_strided_slice %364 {offsets = [0, 0], sizes = [13, 16], strides = [1, 1]} : vector<13x32xf32> to vector<13x16xf32>
    %366 = vector.extract_strided_slice %364 {offsets = [0, 16], sizes = [13, 16], strides = [1, 1]} : vector<13x32xf32> to vector<13x16xf32>
    %cst_246 = arith.constant 0.000000e+00 : f32
    %367 = vector.broadcast %cst_246 : f32 to vector<13x16xf32>
    %368 = arith.maximumf %366, %367 : vector<13x16xf32>
    %369 = vector.extract_strided_slice %365 {offsets = [0, 0], sizes = [8, 16], strides = [1, 1]} : vector<13x16xf32> to vector<8x16xf32>
    %370 = vector.extract_strided_slice %365 {offsets = [1, 0], sizes = [8, 16], strides = [1, 1]} : vector<13x16xf32> to vector<8x16xf32>
    %371 = arith.maximumf %369, %370 : vector<8x16xf32>
    %372 = vector.extract_strided_slice %365 {offsets = [2, 0], sizes = [8, 16], strides = [1, 1]} : vector<13x16xf32> to vector<8x16xf32>
    %373 = arith.maximumf %371, %372 : vector<8x16xf32>
    %374 = vector.extract_strided_slice %365 {offsets = [3, 0], sizes = [8, 16], strides = [1, 1]} : vector<13x16xf32> to vector<8x16xf32>
    %375 = arith.maximumf %373, %374 : vector<8x16xf32>
    %376 = vector.extract_strided_slice %365 {offsets = [4, 0], sizes = [8, 16], strides = [1, 1]} : vector<13x16xf32> to vector<8x16xf32>
    %377 = arith.maximumf %375, %376 : vector<8x16xf32>
    %378 = vector.extract_strided_slice %365 {offsets = [5, 0], sizes = [8, 16], strides = [1, 1]} : vector<13x16xf32> to vector<8x16xf32>
    %379 = arith.maximumf %377, %378 : vector<8x16xf32>
    %cst_247 = arith.constant 0.999994993 : f32
    %380 = vector.broadcast %cst_247 : f32 to vector<8x16xf32>
    %381 = arith.mulf %379, %380 : vector<8x16xf32>
    %cst_248 = arith.constant 0.000000e+00 : f32
    %382 = vector.broadcast %cst_248 : f32 to vector<8x16xf32>
    %383 = arith.maximumf %381, %382 : vector<8x16xf32>
    %c0_249 = arith.constant 0 : index
    %c0_250 = arith.constant 0 : index
    %384 = vector.load %arg21[%c0_249, %c0_250] : memref<1x16xf32, #tpu.memory_space<vmem>>, vector<1x16xf32>
    %385 = tpu.iota {dimensions = array<i32: 0>} : vector<26x24xi32>
    %386 = tpu.iota {dimensions = array<i32: 1>} : vector<26x24xi32>
    %c1_i32_251 = arith.constant 1 : i32
    %387 = vector.broadcast %c1_i32_251 : i32 to vector<26x24xi32>
    %388 = arith.addi %386, %387 : vector<26x24xi32>
    %389 = arith.cmpi eq, %385, %388 : vector<26x24xi32>
    %390 = arith.extui %389 : vector<26x24xi1> to vector<26x24xi32>
    %391 = arith.sitofp %390 : vector<26x24xi32> to vector<26x24xf32>
    %cst_252 = arith.constant dense<0.000000e+00> : vector<26x4xf32>
    %392 = tpu.matmul %391, %1, %cst_252 {dimension_numbers = #tpu.dot_dimension_numbers<[1], [0], [0], [1], [0, 0, 1, 1], [], []>} : vector<26x24xf32>, vector<24x4xf32>, vector<26x4xf32> -> vector<26x4xf32>
    %393 = vector.extract_strided_slice %392 {offsets = [0, 0], sizes = [25, 4], strides = [1, 1]} : vector<26x4xf32> to vector<25x4xf32>
    %c0_253 = arith.constant 0 : index
    %c0_254 = arith.constant 0 : index
    %c0_255 = arith.constant 0 : index
    %394 = vector.load %arg20[%c0_253, %c0_254, %c0_255] : memref<2x4x16xf32, #tpu.memory_space<vmem>>, vector<1x4x16xf32>
    %395 = vector.shape_cast %394 : vector<1x4x16xf32> to vector<4x16xf32>
    %cst_256 = arith.constant dense<0.000000e+00> : vector<25x16xf32>
    %396 = tpu.matmul %393, %395, %cst_256 {dimension_numbers = #tpu.dot_dimension_numbers<[1], [0], [0], [1], [0, 0, 1, 1], [], []>} : vector<25x4xf32>, vector<4x16xf32>, vector<25x16xf32> -> vector<25x16xf32>
    %397 = vector.extract_strided_slice %392 {offsets = [1, 0], sizes = [25, 4], strides = [1, 1]} : vector<26x4xf32> to vector<25x4xf32>
    %c1_257 = arith.constant 1 : index
    %c0_258 = arith.constant 0 : index
    %c0_259 = arith.constant 0 : index
    %398 = vector.load %arg20[%c1_257, %c0_258, %c0_259] : memref<2x4x16xf32, #tpu.memory_space<vmem>>, vector<1x4x16xf32>
    %399 = vector.shape_cast %398 : vector<1x4x16xf32> to vector<4x16xf32>
    %cst_260 = arith.constant dense<0.000000e+00> : vector<25x16xf32>
    %400 = tpu.matmul %397, %399, %cst_260 {dimension_numbers = #tpu.dot_dimension_numbers<[1], [0], [0], [1], [0, 0, 1, 1], [], []>} : vector<25x4xf32>, vector<4x16xf32>, vector<25x16xf32> -> vector<25x16xf32>
    %401 = arith.addf %396, %400 : vector<25x16xf32>
    %402 = tpu.iota {dimensions = array<i32: 0>} : vector<13x25xi32>
    %403 = tpu.iota {dimensions = array<i32: 1>} : vector<13x25xi32>
    %c2_i32_261 = arith.constant 2 : i32
    %404 = vector.broadcast %c2_i32_261 : i32 to vector<13x25xi32>
    %405 = arith.muli %404, %402 : vector<13x25xi32>
    %406 = arith.cmpi eq, %403, %405 : vector<13x25xi32>
    %407 = arith.extui %406 : vector<13x25xi1> to vector<13x25xi32>
    %408 = arith.sitofp %407 : vector<13x25xi32> to vector<13x25xf32>
    %cst_262 = arith.constant dense<0.000000e+00> : vector<13x16xf32>
    %409 = tpu.matmul %408, %401, %cst_262 {dimension_numbers = #tpu.dot_dimension_numbers<[1], [0], [0], [1], [0, 0, 1, 1], [], []>} : vector<13x25xf32>, vector<25x16xf32>, vector<13x16xf32> -> vector<13x16xf32>
    %410 = vector.broadcast %384 : vector<1x16xf32> to vector<13x16xf32>
    %411 = arith.addf %409, %410 : vector<13x16xf32>
    %412 = vector.extract_strided_slice %411 {offsets = [0, 0], sizes = [8, 16], strides = [1, 1]} : vector<13x16xf32> to vector<8x16xf32>
    %413 = vector.extract_strided_slice %411 {offsets = [1, 0], sizes = [8, 16], strides = [1, 1]} : vector<13x16xf32> to vector<8x16xf32>
    %414 = arith.addf %412, %413 : vector<8x16xf32>
    %415 = vector.extract_strided_slice %411 {offsets = [2, 0], sizes = [8, 16], strides = [1, 1]} : vector<13x16xf32> to vector<8x16xf32>
    %416 = arith.addf %414, %415 : vector<8x16xf32>
    %417 = vector.extract_strided_slice %411 {offsets = [3, 0], sizes = [8, 16], strides = [1, 1]} : vector<13x16xf32> to vector<8x16xf32>
    %418 = arith.addf %416, %417 : vector<8x16xf32>
    %419 = vector.extract_strided_slice %411 {offsets = [4, 0], sizes = [8, 16], strides = [1, 1]} : vector<13x16xf32> to vector<8x16xf32>
    %420 = arith.addf %418, %419 : vector<8x16xf32>
    %421 = vector.extract_strided_slice %411 {offsets = [5, 0], sizes = [8, 16], strides = [1, 1]} : vector<13x16xf32> to vector<8x16xf32>
    %422 = arith.addf %420, %421 : vector<8x16xf32>
    %cst_263 = arith.constant 0.166666672 : f32
    %423 = vector.broadcast %cst_263 : f32 to vector<8x16xf32>
    %424 = arith.mulf %422, %423 : vector<8x16xf32>
    %cst_264 = arith.constant 0.999994993 : f32
    %425 = vector.broadcast %cst_264 : f32 to vector<8x16xf32>
    %426 = arith.mulf %424, %425 : vector<8x16xf32>
    %cst_265 = arith.constant 0.000000e+00 : f32
    %427 = vector.broadcast %cst_265 : f32 to vector<8x16xf32>
    %428 = arith.maximumf %426, %427 : vector<8x16xf32>
    %c0_266 = arith.constant 0 : index
    %c0_267 = arith.constant 0 : index
    %429 = vector.load %arg23[%c0_266, %c0_267] : memref<1x16xf32, #tpu.memory_space<vmem>>, vector<1x16xf32>
    %430 = tpu.iota {dimensions = array<i32: 0>} : vector<15x13xi32>
    %431 = tpu.iota {dimensions = array<i32: 1>} : vector<15x13xi32>
    %c1_i32_268 = arith.constant 1 : i32
    %432 = vector.broadcast %c1_i32_268 : i32 to vector<15x13xi32>
    %433 = arith.addi %431, %432 : vector<15x13xi32>
    %434 = arith.cmpi eq, %430, %433 : vector<15x13xi32>
    %435 = arith.extui %434 : vector<15x13xi1> to vector<15x13xi32>
    %436 = arith.sitofp %435 : vector<15x13xi32> to vector<15x13xf32>
    %cst_269 = arith.constant dense<0.000000e+00> : vector<15x16xf32>
    %437 = tpu.matmul %436, %368, %cst_269 {dimension_numbers = #tpu.dot_dimension_numbers<[1], [0], [0], [1], [0, 0, 1, 1], [], []>} : vector<15x13xf32>, vector<13x16xf32>, vector<15x16xf32> -> vector<15x16xf32>
    %c0_270 = arith.constant 0 : index
    %c0_271 = arith.constant 0 : index
    %c0_272 = arith.constant 0 : index
    %438 = vector.load %arg22[%c0_270, %c0_271, %c0_272] : memref<1x16x16xf32, #tpu.memory_space<vmem>>, vector<1x16x16xf32>
    %439 = vector.shape_cast %438 : vector<1x16x16xf32> to vector<16x16xf32>
    %cst_273 = arith.constant dense<0.000000e+00> : vector<15x16xf32>
    %440 = tpu.matmul %437, %439, %cst_273 {dimension_numbers = #tpu.dot_dimension_numbers<[1], [0], [0], [1], [0, 0, 1, 1], [], []>} : vector<15x16xf32>, vector<16x16xf32>, vector<15x16xf32> -> vector<15x16xf32>
    %441 = tpu.iota {dimensions = array<i32: 0>} : vector<8x15xi32>
    %442 = tpu.iota {dimensions = array<i32: 1>} : vector<8x15xi32>
    %c2_i32_274 = arith.constant 2 : i32
    %443 = vector.broadcast %c2_i32_274 : i32 to vector<8x15xi32>
    %444 = arith.muli %443, %441 : vector<8x15xi32>
    %445 = arith.cmpi eq, %442, %444 : vector<8x15xi32>
    %446 = arith.extui %445 : vector<8x15xi1> to vector<8x15xi32>
    %447 = arith.sitofp %446 : vector<8x15xi32> to vector<8x15xf32>
    %cst_275 = arith.constant dense<0.000000e+00> : vector<8x16xf32>
    %448 = tpu.matmul %447, %440, %cst_275 {dimension_numbers = #tpu.dot_dimension_numbers<[1], [0], [0], [1], [0, 0, 1, 1], [], []>} : vector<8x15xf32>, vector<15x16xf32>, vector<8x16xf32> -> vector<8x16xf32>
    %449 = vector.broadcast %429 : vector<1x16xf32> to vector<8x16xf32>
    %450 = arith.addf %448, %449 : vector<8x16xf32>
    %cst_276 = arith.constant 0.000000e+00 : f32
    %451 = vector.broadcast %cst_276 : f32 to vector<8x16xf32>
    %452 = arith.maximumf %450, %451 : vector<8x16xf32>
    %453 = arith.addf %66, %120 : vector<13x16xf32>
    %454 = arith.addf %453, %67 : vector<13x16xf32>
    %455 = vector.broadcast %184 : vector<1x16xf32> to vector<13x16xf32>
    %456 = arith.addf %454, %455 : vector<13x16xf32>
    %457 = arith.addf %456, %277 : vector<13x16xf32>
    %458 = arith.addf %342, %383 : vector<8x16xf32>
    %459 = arith.addf %458, %428 : vector<8x16xf32>
    %460 = arith.addf %459, %452 : vector<8x16xf32>
    %c0_277 = arith.constant 0 : index
    %c0_278 = arith.constant 0 : index
    %461 = vector.load %arg25[%c0_277, %c0_278] : memref<1x16xf32, #tpu.memory_space<vmem>>, vector<1x16xf32>
    %462 = tpu.iota {dimensions = array<i32: 0>} : vector<17x13xi32>
    %463 = tpu.iota {dimensions = array<i32: 1>} : vector<17x13xi32>
    %c2_i32_279 = arith.constant 2 : i32
    %464 = vector.broadcast %c2_i32_279 : i32 to vector<17x13xi32>
    %465 = arith.addi %463, %464 : vector<17x13xi32>
    %466 = arith.cmpi eq, %462, %465 : vector<17x13xi32>
    %467 = arith.extui %466 : vector<17x13xi1> to vector<17x13xi32>
    %468 = arith.sitofp %467 : vector<17x13xi32> to vector<17x13xf32>
    %cst_280 = arith.constant dense<0.000000e+00> : vector<17x16xf32>
    %469 = tpu.matmul %468, %457, %cst_280 {dimension_numbers = #tpu.dot_dimension_numbers<[1], [0], [0], [1], [0, 0, 1, 1], [], []>} : vector<17x13xf32>, vector<13x16xf32>, vector<17x16xf32> -> vector<17x16xf32>
    %470 = vector.extract_strided_slice %469 {offsets = [0, 0], sizes = [15, 16], strides = [1, 1]} : vector<17x16xf32> to vector<15x16xf32>
    %c0_281 = arith.constant 0 : index
    %c0_282 = arith.constant 0 : index
    %c0_283 = arith.constant 0 : index
    %471 = vector.load %arg24[%c0_281, %c0_282, %c0_283] : memref<3x16x16xf32, #tpu.memory_space<vmem>>, vector<1x16x16xf32>
    %472 = vector.shape_cast %471 : vector<1x16x16xf32> to vector<16x16xf32>
    %cst_284 = arith.constant dense<0.000000e+00> : vector<15x16xf32>
    %473 = tpu.matmul %470, %472, %cst_284 {dimension_numbers = #tpu.dot_dimension_numbers<[1], [0], [0], [1], [0, 0, 1, 1], [], []>} : vector<15x16xf32>, vector<16x16xf32>, vector<15x16xf32> -> vector<15x16xf32>
    %474 = vector.extract_strided_slice %469 {offsets = [1, 0], sizes = [15, 16], strides = [1, 1]} : vector<17x16xf32> to vector<15x16xf32>
    %c1_285 = arith.constant 1 : index
    %c0_286 = arith.constant 0 : index
    %c0_287 = arith.constant 0 : index
    %475 = vector.load %arg24[%c1_285, %c0_286, %c0_287] : memref<3x16x16xf32, #tpu.memory_space<vmem>>, vector<1x16x16xf32>
    %476 = vector.shape_cast %475 : vector<1x16x16xf32> to vector<16x16xf32>
    %cst_288 = arith.constant dense<0.000000e+00> : vector<15x16xf32>
    %477 = tpu.matmul %474, %476, %cst_288 {dimension_numbers = #tpu.dot_dimension_numbers<[1], [0], [0], [1], [0, 0, 1, 1], [], []>} : vector<15x16xf32>, vector<16x16xf32>, vector<15x16xf32> -> vector<15x16xf32>
    %478 = arith.addf %473, %477 : vector<15x16xf32>
    %479 = vector.extract_strided_slice %469 {offsets = [2, 0], sizes = [15, 16], strides = [1, 1]} : vector<17x16xf32> to vector<15x16xf32>
    %c2_289 = arith.constant 2 : index
    %c0_290 = arith.constant 0 : index
    %c0_291 = arith.constant 0 : index
    %480 = vector.load %arg24[%c2_289, %c0_290, %c0_291] : memref<3x16x16xf32, #tpu.memory_space<vmem>>, vector<1x16x16xf32>
    %481 = vector.shape_cast %480 : vector<1x16x16xf32> to vector<16x16xf32>
    %cst_292 = arith.constant dense<0.000000e+00> : vector<15x16xf32>
    %482 = tpu.matmul %479, %481, %cst_292 {dimension_numbers = #tpu.dot_dimension_numbers<[1], [0], [0], [1], [0, 0, 1, 1], [], []>} : vector<15x16xf32>, vector<16x16xf32>, vector<15x16xf32> -> vector<15x16xf32>
    %483 = arith.addf %478, %482 : vector<15x16xf32>
    %484 = tpu.iota {dimensions = array<i32: 0>} : vector<8x15xi32>
    %485 = tpu.iota {dimensions = array<i32: 1>} : vector<8x15xi32>
    %c2_i32_293 = arith.constant 2 : i32
    %486 = vector.broadcast %c2_i32_293 : i32 to vector<8x15xi32>
    %487 = arith.muli %486, %484 : vector<8x15xi32>
    %488 = arith.cmpi eq, %485, %487 : vector<8x15xi32>
    %489 = arith.extui %488 : vector<8x15xi1> to vector<8x15xi32>
    %490 = arith.sitofp %489 : vector<8x15xi32> to vector<8x15xf32>
    %cst_294 = arith.constant dense<0.000000e+00> : vector<8x16xf32>
    %491 = tpu.matmul %490, %483, %cst_294 {dimension_numbers = #tpu.dot_dimension_numbers<[1], [0], [0], [1], [0, 0, 1, 1], [], []>} : vector<8x15xf32>, vector<15x16xf32>, vector<8x16xf32> -> vector<8x16xf32>
    %492 = vector.broadcast %461 : vector<1x16xf32> to vector<8x16xf32>
    %493 = arith.addf %491, %492 : vector<8x16xf32>
    %cst_295 = arith.constant 0.000000e+00 : f32
    %494 = vector.broadcast %cst_295 : f32 to vector<8x16xf32>
    %495 = arith.maximumf %493, %494 : vector<8x16xf32>
    %496 = arith.addf %460, %495 : vector<8x16xf32>
    %c0_296 = arith.constant 0 : index
    %c0_297 = arith.constant 0 : index
    %497 = vector.load %arg27[%c0_296, %c0_297] : memref<1x16xf32, #tpu.memory_space<vmem>>, vector<1x16xf32>
    %498 = vector.extract_strided_slice %496 {offsets = [0, 0], sizes = [1, 16], strides = [1, 1]} : vector<8x16xf32> to vector<1x16xf32>
    %c0_298 = arith.constant 0 : index
    %c0_299 = arith.constant 0 : index
    %c0_300 = arith.constant 0 : index
    %499 = vector.load %arg26[%c0_298, %c0_299, %c0_300] : memref<8x16x16xf32, #tpu.memory_space<vmem>>, vector<1x16x16xf32>
    %500 = vector.shape_cast %499 : vector<1x16x16xf32> to vector<16x16xf32>
    %cst_301 = arith.constant dense<0.000000e+00> : vector<1x16xf32>
    %501 = tpu.matmul %498, %500, %cst_301 {dimension_numbers = #tpu.dot_dimension_numbers<[1], [0], [0], [1], [0, 0, 1, 1], [], []>} : vector<1x16xf32>, vector<16x16xf32>, vector<1x16xf32> -> vector<1x16xf32>
    %502 = arith.addf %497, %501 : vector<1x16xf32>
    %503 = vector.extract_strided_slice %496 {offsets = [1, 0], sizes = [1, 16], strides = [1, 1]} : vector<8x16xf32> to vector<1x16xf32>
    %c1_302 = arith.constant 1 : index
    %c0_303 = arith.constant 0 : index
    %c0_304 = arith.constant 0 : index
    %504 = vector.load %arg26[%c1_302, %c0_303, %c0_304] : memref<8x16x16xf32, #tpu.memory_space<vmem>>, vector<1x16x16xf32>
    %505 = vector.shape_cast %504 : vector<1x16x16xf32> to vector<16x16xf32>
    %cst_305 = arith.constant dense<0.000000e+00> : vector<1x16xf32>
    %506 = tpu.matmul %503, %505, %cst_305 {dimension_numbers = #tpu.dot_dimension_numbers<[1], [0], [0], [1], [0, 0, 1, 1], [], []>} : vector<1x16xf32>, vector<16x16xf32>, vector<1x16xf32> -> vector<1x16xf32>
    %507 = arith.addf %502, %506 : vector<1x16xf32>
    %508 = vector.extract_strided_slice %496 {offsets = [2, 0], sizes = [1, 16], strides = [1, 1]} : vector<8x16xf32> to vector<1x16xf32>
    %c2_306 = arith.constant 2 : index
    %c0_307 = arith.constant 0 : index
    %c0_308 = arith.constant 0 : index
    %509 = vector.load %arg26[%c2_306, %c0_307, %c0_308] : memref<8x16x16xf32, #tpu.memory_space<vmem>>, vector<1x16x16xf32>
    %510 = vector.shape_cast %509 : vector<1x16x16xf32> to vector<16x16xf32>
    %cst_309 = arith.constant dense<0.000000e+00> : vector<1x16xf32>
    %511 = tpu.matmul %508, %510, %cst_309 {dimension_numbers = #tpu.dot_dimension_numbers<[1], [0], [0], [1], [0, 0, 1, 1], [], []>} : vector<1x16xf32>, vector<16x16xf32>, vector<1x16xf32> -> vector<1x16xf32>
    %512 = arith.addf %507, %511 : vector<1x16xf32>
    %513 = vector.extract_strided_slice %496 {offsets = [3, 0], sizes = [1, 16], strides = [1, 1]} : vector<8x16xf32> to vector<1x16xf32>
    %c3_310 = arith.constant 3 : index
    %c0_311 = arith.constant 0 : index
    %c0_312 = arith.constant 0 : index
    %514 = vector.load %arg26[%c3_310, %c0_311, %c0_312] : memref<8x16x16xf32, #tpu.memory_space<vmem>>, vector<1x16x16xf32>
    %515 = vector.shape_cast %514 : vector<1x16x16xf32> to vector<16x16xf32>
    %cst_313 = arith.constant dense<0.000000e+00> : vector<1x16xf32>
    %516 = tpu.matmul %513, %515, %cst_313 {dimension_numbers = #tpu.dot_dimension_numbers<[1], [0], [0], [1], [0, 0, 1, 1], [], []>} : vector<1x16xf32>, vector<16x16xf32>, vector<1x16xf32> -> vector<1x16xf32>
    %517 = arith.addf %512, %516 : vector<1x16xf32>
    %518 = vector.extract_strided_slice %496 {offsets = [4, 0], sizes = [1, 16], strides = [1, 1]} : vector<8x16xf32> to vector<1x16xf32>
    %c4_314 = arith.constant 4 : index
    %c0_315 = arith.constant 0 : index
    %c0_316 = arith.constant 0 : index
    %519 = vector.load %arg26[%c4_314, %c0_315, %c0_316] : memref<8x16x16xf32, #tpu.memory_space<vmem>>, vector<1x16x16xf32>
    %520 = vector.shape_cast %519 : vector<1x16x16xf32> to vector<16x16xf32>
    %cst_317 = arith.constant dense<0.000000e+00> : vector<1x16xf32>
    %521 = tpu.matmul %518, %520, %cst_317 {dimension_numbers = #tpu.dot_dimension_numbers<[1], [0], [0], [1], [0, 0, 1, 1], [], []>} : vector<1x16xf32>, vector<16x16xf32>, vector<1x16xf32> -> vector<1x16xf32>
    %522 = arith.addf %517, %521 : vector<1x16xf32>
    %523 = vector.extract_strided_slice %496 {offsets = [5, 0], sizes = [1, 16], strides = [1, 1]} : vector<8x16xf32> to vector<1x16xf32>
    %c5_318 = arith.constant 5 : index
    %c0_319 = arith.constant 0 : index
    %c0_320 = arith.constant 0 : index
    %524 = vector.load %arg26[%c5_318, %c0_319, %c0_320] : memref<8x16x16xf32, #tpu.memory_space<vmem>>, vector<1x16x16xf32>
    %525 = vector.shape_cast %524 : vector<1x16x16xf32> to vector<16x16xf32>
    %cst_321 = arith.constant dense<0.000000e+00> : vector<1x16xf32>
    %526 = tpu.matmul %523, %525, %cst_321 {dimension_numbers = #tpu.dot_dimension_numbers<[1], [0], [0], [1], [0, 0, 1, 1], [], []>} : vector<1x16xf32>, vector<16x16xf32>, vector<1x16xf32> -> vector<1x16xf32>
    %527 = arith.addf %522, %526 : vector<1x16xf32>
    %528 = vector.extract_strided_slice %496 {offsets = [6, 0], sizes = [1, 16], strides = [1, 1]} : vector<8x16xf32> to vector<1x16xf32>
    %c6_322 = arith.constant 6 : index
    %c0_323 = arith.constant 0 : index
    %c0_324 = arith.constant 0 : index
    %529 = vector.load %arg26[%c6_322, %c0_323, %c0_324] : memref<8x16x16xf32, #tpu.memory_space<vmem>>, vector<1x16x16xf32>
    %530 = vector.shape_cast %529 : vector<1x16x16xf32> to vector<16x16xf32>
    %cst_325 = arith.constant dense<0.000000e+00> : vector<1x16xf32>
    %531 = tpu.matmul %528, %530, %cst_325 {dimension_numbers = #tpu.dot_dimension_numbers<[1], [0], [0], [1], [0, 0, 1, 1], [], []>} : vector<1x16xf32>, vector<16x16xf32>, vector<1x16xf32> -> vector<1x16xf32>
    %532 = arith.addf %527, %531 : vector<1x16xf32>
    %533 = vector.extract_strided_slice %496 {offsets = [7, 0], sizes = [1, 16], strides = [1, 1]} : vector<8x16xf32> to vector<1x16xf32>
    %c7_326 = arith.constant 7 : index
    %c0_327 = arith.constant 0 : index
    %c0_328 = arith.constant 0 : index
    %534 = vector.load %arg26[%c7_326, %c0_327, %c0_328] : memref<8x16x16xf32, #tpu.memory_space<vmem>>, vector<1x16x16xf32>
    %535 = vector.shape_cast %534 : vector<1x16x16xf32> to vector<16x16xf32>
    %cst_329 = arith.constant dense<0.000000e+00> : vector<1x16xf32>
    %536 = tpu.matmul %533, %535, %cst_329 {dimension_numbers = #tpu.dot_dimension_numbers<[1], [0], [0], [1], [0, 0, 1, 1], [], []>} : vector<1x16xf32>, vector<16x16xf32>, vector<1x16xf32> -> vector<1x16xf32>
    %537 = arith.addf %532, %536 : vector<1x16xf32>
    %cst_330 = arith.constant 0.000000e+00 : f32
    %538 = vector.broadcast %cst_330 : f32 to vector<1x16xf32>
    %539 = arith.maximumf %537, %538 : vector<1x16xf32>
    %c0_331 = arith.constant 0 : index
    %c0_332 = arith.constant 0 : index
    %540 = vector.load %arg28[%c0_331, %c0_332] : memref<16x5xf32, #tpu.memory_space<vmem>>, vector<16x5xf32>
    %cst_333 = arith.constant dense<0.000000e+00> : vector<1x5xf32>
    %541 = tpu.matmul %539, %540, %cst_333 {dimension_numbers = #tpu.dot_dimension_numbers<[1], [0], [0], [1], [0, 0, 1, 1], [], []>} : vector<1x16xf32>, vector<16x5xf32>, vector<1x5xf32> -> vector<1x5xf32>
    %c0_334 = arith.constant 0 : index
    %c0_335 = arith.constant 0 : index
    %542 = vector.load %arg29[%c0_334, %c0_335] : memref<1x5xf32, #tpu.memory_space<vmem>>, vector<1x5xf32>
    %543 = arith.addf %541, %542 : vector<1x5xf32>
    %cst_336 = arith.constant dense<0xFF800000> : vector<1xf32>
    %544 = vector.multi_reduction <maximumf>, %543, %cst_336 [1] : vector<1x5xf32> to vector<1xf32>
    %545 = vector.shape_cast %544 : vector<1xf32> to vector<1x1xf32>
    %546 = vector.broadcast %545 : vector<1x1xf32> to vector<1x5xf32>
    %547 = arith.subf %543, %546 : vector<1x5xf32>
    %548 = math.exp %547 : vector<1x5xf32>
    %cst_337 = arith.constant dense<0.000000e+00> : vector<1xf32>
    %549 = vector.multi_reduction <add>, %548, %cst_337 [1] : vector<1x5xf32> to vector<1xf32>
    %550 = vector.shape_cast %549 : vector<1xf32> to vector<1x1xf32>
    %551 = vector.broadcast %550 : vector<1x1xf32> to vector<1x5xf32>
    %552 = arith.divf %548, %551 : vector<1x5xf32>
    %c0_338 = arith.constant 0 : index
    %c0_339 = arith.constant 0 : index
    %c0_340 = arith.constant 0 : index
    %553 = vector.load %arg30[%c0_338, %c0_339, %c0_340] : memref<1x1x5xf32, #tpu.memory_space<vmem>>, vector<1x1x5xf32>
    %554 = vector.shape_cast %553 : vector<1x1x5xf32> to vector<1x5xf32>
    %555 = vector.shape_cast %552 : vector<1x5xf32> to vector<1x1x5xf32>
    tpu.vector_store %arg30[%c0_338, %c0_339, %c0_340], %555 {strides = array<i32>} : memref<1x1x5xf32, #tpu.memory_space<vmem>>, vector<1x1x5xf32>,
    return
  }
  func.func @transform_0(%arg0: i32) -> (i32, i32, i32) {
    %c0_i32 = arith.constant 0 : i32
    %c0_i32_0 = arith.constant 0 : i32
    %c0_i32_1 = arith.constant 0 : i32
    return %arg0, %c0_i32, %c0_i32_0 : i32, i32, i32
  }
  func.func @transform_1(%arg0: i32) -> (i32, i32, i32) {
    %c0_i32 = arith.constant 0 : i32
    %c0_i32_0 = arith.constant 0 : i32
    %c0_i32_1 = arith.constant 0 : i32
    %c0_i32_2 = arith.constant 0 : i32
    return %c0_i32, %c0_i32_0, %c0_i32_1 : i32, i32, i32
  }
  func.func @transform_2(%arg0: i32) -> (i32, i32) {
    %c0_i32 = arith.constant 0 : i32
    %c0_i32_0 = arith.constant 0 : i32
    %c0_i32_1 = arith.constant 0 : i32
    return %c0_i32, %c0_i32_0 : i32, i32
  }
  func.func @transform_3(%arg0: i32) -> (i32, i32, i32) {
    %c0_i32 = arith.constant 0 : i32
    %c0_i32_0 = arith.constant 0 : i32
    %c0_i32_1 = arith.constant 0 : i32
    %c0_i32_2 = arith.constant 0 : i32
    return %c0_i32, %c0_i32_0, %c0_i32_1 : i32, i32, i32
  }
  func.func @transform_4(%arg0: i32) -> (i32, i32) {
    %c0_i32 = arith.constant 0 : i32
    %c0_i32_0 = arith.constant 0 : i32
    %c0_i32_1 = arith.constant 0 : i32
    return %c0_i32, %c0_i32_0 : i32, i32
  }
  func.func @transform_5(%arg0: i32) -> (i32, i32, i32) {
    %c0_i32 = arith.constant 0 : i32
    %c0_i32_0 = arith.constant 0 : i32
    %c0_i32_1 = arith.constant 0 : i32
    %c0_i32_2 = arith.constant 0 : i32
    return %c0_i32, %c0_i32_0, %c0_i32_1 : i32, i32, i32
  }
  func.func @transform_6(%arg0: i32) -> (i32, i32) {
    %c0_i32 = arith.constant 0 : i32
    %c0_i32_0 = arith.constant 0 : i32
    %c0_i32_1 = arith.constant 0 : i32
    return %c0_i32, %c0_i32_0 : i32, i32
  }
  func.func @transform_7(%arg0: i32) -> (i32, i32, i32) {
    %c0_i32 = arith.constant 0 : i32
    %c0_i32_0 = arith.constant 0 : i32
    %c0_i32_1 = arith.constant 0 : i32
    %c0_i32_2 = arith.constant 0 : i32
    return %c0_i32, %c0_i32_0, %c0_i32_1 : i32, i32, i32
  }
  func.func @transform_8(%arg0: i32) -> (i32, i32) {
    %c0_i32 = arith.constant 0 : i32
    %c0_i32_0 = arith.constant 0 : i32
    %c0_i32_1 = arith.constant 0 : i32
    return %c0_i32, %c0_i32_0 : i32, i32
  }
  func.func @transform_9(%arg0: i32) -> (i32, i32, i32) {
    %c0_i32 = arith.constant 0 : i32
    %c0_i32_0 = arith.constant 0 : i32
    %c0_i32_1 = arith.constant 0 : i32
    %c0_i32_2 = arith.constant 0 : i32
    return %c0_i32, %c0_i32_0, %c0_i32_1 : i32, i32, i32
  }
  func.func @transform_10(%arg0: i32) -> (i32, i32) {
    %c0_i32 = arith.constant 0 : i32
    %c0_i32_0 = arith.constant 0 : i32
    %c0_i32_1 = arith.constant 0 : i32
    return %c0_i32, %c0_i32_0 : i32, i32
  }
  func.func @transform_11(%arg0: i32) -> (i32, i32, i32) {
    %c0_i32 = arith.constant 0 : i32
    %c0_i32_0 = arith.constant 0 : i32
    %c0_i32_1 = arith.constant 0 : i32
    %c0_i32_2 = arith.constant 0 : i32
    return %c0_i32, %c0_i32_0, %c0_i32_1 : i32, i32, i32
  }
  func.func @transform_12(%arg0: i32) -> (i32, i32) {
    %c0_i32 = arith.constant 0 : i32
    %c0_i32_0 = arith.constant 0 : i32
    %c0_i32_1 = arith.constant 0 : i32
    return %c0_i32, %c0_i32_0 : i32, i32
  }
  func.func @transform_13(%arg0: i32) -> (i32, i32, i32) {
    %c0_i32 = arith.constant 0 : i32
    %c0_i32_0 = arith.constant 0 : i32
    %c0_i32_1 = arith.constant 0 : i32
    %c0_i32_2 = arith.constant 0 : i32
    return %c0_i32, %c0_i32_0, %c0_i32_1 : i32, i32, i32
  }
  func.func @transform_14(%arg0: i32) -> (i32, i32) {
    %c0_i32 = arith.constant 0 : i32
    %c0_i32_0 = arith.constant 0 : i32
    %c0_i32_1 = arith.constant 0 : i32
    return %c0_i32, %c0_i32_0 : i32, i32
  }
  func.func @transform_15(%arg0: i32) -> (i32, i32, i32) {
    %c0_i32 = arith.constant 0 : i32
    %c0_i32_0 = arith.constant 0 : i32
    %c0_i32_1 = arith.constant 0 : i32
    %c0_i32_2 = arith.constant 0 : i32
    return %c0_i32, %c0_i32_0, %c0_i32_1 : i32, i32, i32
  }
  func.func @transform_16(%arg0: i32) -> (i32, i32) {
    %c0_i32 = arith.constant 0 : i32
    %c0_i32_0 = arith.constant 0 : i32
    %c0_i32_1 = arith.constant 0 : i32
    return %c0_i32, %c0_i32_0 : i32, i32
  }
  func.func @transform_17(%arg0: i32) -> (i32, i32, i32) {
    %c0_i32 = arith.constant 0 : i32
    %c0_i32_0 = arith.constant 0 : i32
    %c0_i32_1 = arith.constant 0 : i32
    %c0_i32_2 = arith.constant 0 : i32
    return %c0_i32, %c0_i32_0, %c0_i32_1 : i32, i32, i32
  }
  func.func @transform_18(%arg0: i32) -> (i32, i32) {
    %c0_i32 = arith.constant 0 : i32
    %c0_i32_0 = arith.constant 0 : i32
    %c0_i32_1 = arith.constant 0 : i32
    return %c0_i32, %c0_i32_0 : i32, i32
  }
  func.func @transform_19(%arg0: i32) -> (i32, i32, i32) {
    %c0_i32 = arith.constant 0 : i32
    %c0_i32_0 = arith.constant 0 : i32
    %c0_i32_1 = arith.constant 0 : i32
    %c0_i32_2 = arith.constant 0 : i32
    return %c0_i32, %c0_i32_0, %c0_i32_1 : i32, i32, i32
  }
  func.func @transform_20(%arg0: i32) -> (i32, i32) {
    %c0_i32 = arith.constant 0 : i32
    %c0_i32_0 = arith.constant 0 : i32
    %c0_i32_1 = arith.constant 0 : i32
    return %c0_i32, %c0_i32_0 : i32, i32
  }
  func.func @transform_21(%arg0: i32) -> (i32, i32, i32) {
    %c0_i32 = arith.constant 0 : i32
    %c0_i32_0 = arith.constant 0 : i32
    %c0_i32_1 = arith.constant 0 : i32
    %c0_i32_2 = arith.constant 0 : i32
    return %c0_i32, %c0_i32_0, %c0_i32_1 : i32, i32, i32
  }
  func.func @transform_22(%arg0: i32) -> (i32, i32) {
    %c0_i32 = arith.constant 0 : i32
    %c0_i32_0 = arith.constant 0 : i32
    %c0_i32_1 = arith.constant 0 : i32
    return %c0_i32, %c0_i32_0 : i32, i32
  }
  func.func @transform_23(%arg0: i32) -> (i32, i32, i32) {
    %c0_i32 = arith.constant 0 : i32
    %c0_i32_0 = arith.constant 0 : i32
    %c0_i32_1 = arith.constant 0 : i32
    %c0_i32_2 = arith.constant 0 : i32
    return %c0_i32, %c0_i32_0, %c0_i32_1 : i32, i32, i32
  }
  func.func @transform_24(%arg0: i32) -> (i32, i32) {
    %c0_i32 = arith.constant 0 : i32
    %c0_i32_0 = arith.constant 0 : i32
    %c0_i32_1 = arith.constant 0 : i32
    return %c0_i32, %c0_i32_0 : i32, i32
  }
  func.func @transform_25(%arg0: i32) -> (i32, i32, i32) {
    %c0_i32 = arith.constant 0 : i32
    %c0_i32_0 = arith.constant 0 : i32
    %c0_i32_1 = arith.constant 0 : i32
    %c0_i32_2 = arith.constant 0 : i32
    return %c0_i32, %c0_i32_0, %c0_i32_1 : i32, i32, i32
  }
  func.func @transform_26(%arg0: i32) -> (i32, i32) {
    %c0_i32 = arith.constant 0 : i32
    %c0_i32_0 = arith.constant 0 : i32
    %c0_i32_1 = arith.constant 0 : i32
    return %c0_i32, %c0_i32_0 : i32, i32
  }
  func.func @transform_27(%arg0: i32) -> (i32, i32) {
    %c0_i32 = arith.constant 0 : i32
    %c0_i32_0 = arith.constant 0 : i32
    %c0_i32_1 = arith.constant 0 : i32
    return %c0_i32, %c0_i32_0 : i32, i32
  }
  func.func @transform_28(%arg0: i32) -> (i32, i32) {
    %c0_i32 = arith.constant 0 : i32
    %c0_i32_0 = arith.constant 0 : i32
    %c0_i32_1 = arith.constant 0 : i32
    return %c0_i32, %c0_i32_0 : i32, i32
  }
  func.func @transform_29(%arg0: i32) -> (i32, i32, i32) {
    %c0_i32 = arith.constant 0 : i32
    %c0_i32_0 = arith.constant 0 : i32
    %c0_i32_1 = arith.constant 0 : i32
    return %arg0, %c0_i32, %c0_i32_0 : i32, i32, i32
  }
}

</mosaic_0001>

<bundles_post_ra>
// kernel: cnn1_forward.1
= control target key start
LH: loop header
LB: loop body
LE: loop exit
PB: predicated region body
PF: predicated region fallthrough
CT: control target
= control target key end

     0   :  { %s11063_s6 = smov 1   ;;  %s11064_s10 = smov 2   ;;  %s12424_s0 = inlined_call_operand.smem [shape: u32[30], index: -1, kind: input, shape index: {}] }
   0x1   :  { %s11131_s5 = sld [smem:[%s12424_s0]]   ;;  %s11065_s14 = smov 3  }
   0x2   :  { %s11136_s9 = sld [smem:[%s12424_s0 + %s11063_s6]]   ;;  %s11066_s18 = smov 4  }
   0x3   :  { %s11141_s13 = sld [smem:[%s12424_s0 + %s11064_s10]]   ;;  %s11067_s22 = smov 5  }
   0x4   :  { %s11146_s17 = sld [smem:[%s12424_s0 + %s11065_s14]]   ;;  %s11068_s26 = smov 6  }
   0x5   :  { %s11151_s21 = sld [smem:[%s12424_s0 + %s11066_s18]]   ;;  %s11069_s30 = smov 7  }
   0x6   :  { %s11156_s25 = sld [smem:[%s12424_s0 + %s11067_s22]]   ;;  %s11070_s4 = smov 8  }
   0x7   :  { %12444 = sst [smem:[#allocation51_spill]] %s11131_s5  ;;  %s11071_s10 = smov 9  }
   0x8   :  { %12445 = sst [smem:[#allocation52_spill]] %s11136_s9  ;;  %s11072_s15 = smov 10  }
   0x9   :  { %s11161_s29 = sld [smem:[%s12424_s0 + %s11068_s26]]   ;;  %s11073_s20 = smov 11  }
   0xa   :  { %12446 = sst [smem:[#allocation53_spill]] %s11146_s17  ;;  %s11074_s26 = smov 12  }
   0xb   :  { %s11166_s3 = sld [smem:[%s12424_s0 + %s11069_s30]]   ;;  %s11075_s1 = smov 13  }
   0xc   :  { %12447 = sst [smem:[#allocation54_spill]] %s11156_s25  ;;  %s11076_s7 = smov 14  }
   0xd   :  { %s11171_s8 = sld [smem:[%s12424_s0 + %s11070_s4]]   ;;  %s11078_s22 = smov 16  }
   0xe   :  { %s11176_s14 = sld [smem:[%s12424_s0 + %s11071_s10]]   ;;  %s11079_s28 = smov 17  }
   0xf   :  { %s11181_s19 = sld [smem:[%s12424_s0 + %s11072_s15]]   ;;  %s11077_s15 = smov 15  }
  0x10   :  { %s11186_s24 = sld [smem:[%s12424_s0 + %s11073_s20]]  }
  0x11   :  { %12448 = sst [smem:[#allocation55_spill]] %s11166_s3 }
  0x12   :  { %s11191_s30 = sld [smem:[%s12424_s0 + %s11074_s26]]  }
  0x13   :  { %s11196_s6 = sld [smem:[%s12424_s0 + %s11075_s1]]  }
  0x14   :  { %s11201_s12 = sld [smem:[%s12424_s0 + %s11076_s7]]   ;;  %s11080_s7 = smov 18  }
  0x15   :  { %12449 = sst [smem:[#allocation56_spill]] %s11181_s19 }
  0x16   :  { %12450 = sst [smem:[#allocation57_spill]] %s11186_s24 }
  0x17   :  { %s11206_s20 = sld [smem:[%s12424_s0 + %s11077_s15]]   ;;  %s11081_s15 = smov 19  }
  0x18   :  { %12451 = sst [smem:[#allocation58_spill]] %s11191_s30 }
  0x19   :  { %s11211_s27 = sld [smem:[%s12424_s0 + %s11078_s22]]   ;;  %s11082_s22 = smov 20  }
  0x1a   :  { %12452 = sst [smem:[#allocation59_spill]] %s11201_s12 }
  0x1b   :  { %s11216_s4 = sld [smem:[%s12424_s0 + %s11079_s28]]   ;;  %s11083_s28 = smov 21  }
  0x1c   :  { %s11221_s12 = sld [smem:[%s12424_s0 + %s11080_s7]]   ;;  %s11084_s7 = smov 22  }
  0x1d   :  { %12453 = sst [smem:[#allocation60_spill]] %s11206_s20 }
  0x1e   :  { %s11226_s30 = sld [smem:[%s12424_s0 + %s11081_s15]]   ;;  %s11085_s15 = smov 23  }
  0x1f   :  { %s11231_s24 = sld [smem:[%s12424_s0 + %s11082_s22]]   ;;  %s11086_s22 = smov 24  }
  0x20   :  { %s11241_s9 = sld [smem:[%s12424_s0 + %s11084_s7]]   ;;  %s11088_s7 = smov 26  }
  0x21   :  { %12454 = sst [smem:[#allocation61_spill]] %s11216_s4 }
  0x22   :  { %12455 = sst [smem:[#allocation62_spill]] %s11221_s12 }
  0x23   :  { %s11236_s4 = sld [smem:[%s12424_s0 + %s11083_s28]]   ;;  %s11087_s28 = smov 25  }
  0x24   :  { %s11246_s5 = sld [smem:[%s12424_s0 + %s11085_s15]]   ;;  %s11089_s15 = smov 27  }
  0x25   :  { %12456 = sst [smem:[#allocation63_spill]] %s11231_s24 }
  0x26   :  { %12457 = sst [smem:[#allocation64_spill]] %s11241_s9 }
  0x27   :  { %s11251_s24 = sld [smem:[%s12424_s0 + %s11086_s22]]   ;;  %s11090_s22 = smov 28  }
  0x28   :  { %s11256_s12 = sld [smem:[%s12424_s0 + %s11087_s28]]   ;;  %s11091_s28 = smov 29  }
  0x29   :  { %s11261_s9 = sld [smem:[%s12424_s0 + %s11088_s7]]  }
  0x2a   :  { %s11266_s20 = sld [smem:[%s12424_s0 + %s11089_s15]]  }
  0x2b   :  { %s11276_s19 = sld [smem:[%s12424_s0 + %s11091_s28]]  }
  0x2d   :  { %12458 = sst [smem:[#allocation65_spill]] %s11251_s24 }
  0x2e   :  { %s11271_s24 = sld [smem:[%s12424_s0 + %s11090_s22]]  }
  0x2f   :  { %64 = vsyncpa [#allocation3], 0 }
  0x30   :  { %65 = vsyncpa [#allocation6], 0 }
  0x31   :  { %66 = vsyncpa [#allocation9], 0 }
  0x32   :  { %67 = vsyncpa [#allocation12], 0 }
  0x33   :  { %68 = vsyncpa [#allocation15], 0 }
  0x34   :  { %69 = vsyncpa [#allocation18], 0 }
  0x35   :  { %70 = vsyncpa [#allocation21], 0 }
  0x36   :  { %71 = vsyncpa [#allocation24], 0 }
  0x37   :  { %72 = vsyncpa [#allocation27], 0 }
  0x38   :  { %73 = vsyncpa [#allocation30], 0 }
  0x39   :  { %74 = vsyncpa [#allocation33], 0 }
  0x3a   :  { %75 = vsyncpa [#allocation36], 0 }
  0x3b   :  { %76 = vsyncpa [#allocation4], 0 }
  0x3c   :  { %78 = vsyncpa [#allocation4 + $0x1], 0  ;;  %s11278_s7 = smov 0   ;;  %s11280_s10 = smov 0  }
  0x3d   :  { %s11282_s0 = smov 0   ;;  %s11284_s11 = smov 0  }
  0x3e LB: > { %12459 = sst [smem:[#allocation66_spill]] %s11049_s7  ;;  %s11299_s15 = sadd.s32 4294967295, %s11061_s11   ;;  %s11061_s11 = sphi %s11284_s11, %s12520_s11   ;;  %s11057_s0 = sphi %s11282_s0, %s12522_s0   ;;  %s11053_s10 = sphi %s11280_s10, %s12524_s10   ;;  %s11049_s7 = sphi %s11278_s7, %s12523_s7  }
  0x3f   : > { %12460 = sst [smem:[#allocation67_spill]] %s11057_s0  ;;  %s8828_s16 = sadd.s32 4294967294, %s11061_s11  }
  0x40   : > { %12461 = sst [smem:[#allocation68_spill]] %s11061_s11  ;;  %s11303_s18 = sadd.s32 1, %s11061_s11  }
  0x41   : > { %12462 = sst [smem:[#allocation69_spill]] %s11303_s18  ;;  %s705_s22 = sadd.s32 1, %s11057_s0 }
  0x42   : > { %s702_s23 = ssub.s32 %s11061_s11, %s11303_s18  ;;  %p715_p0 = scmp.ne.s32.totalorder %s11057_s0, %s11053_s10 }
  0x43   : > { %p703_p1 = scmp.eq.s32.totalorder %s702_s23, 0  ;;  %p716_p2 = scmp.eq.s32.totalorder %s11299_s15, 1 }
  0x44   : > { %p721_p3 = scmp.ne.s32.totalorder %s11053_s10, %s11049_s7  ;;  %p722_p4 = scmp.eq.s32.totalorder %s8828_s16, 1 }
  0x45   : > { %s11314_s26 = scalar_select %p703_p1, %s11057_s0, %s705_s22  }
  0x46   : > { %p11316_p5 = por %p716_p2, %p715_p0  ;;  %p11320_p6 = por %p722_p4, %p721_p3 }
  0x47   : > { %12463 = sst [smem:[#allocation70_spill]] %s11314_s26  ;;  %p8829_p7 = scmp.ge.s32.totalorder %s11061_s11, 1 }
  0x48   : > { %s12464_s28 = scalar_select %p11316_p5, 1, 0 }
  0x49   : > { %s12466_s1 = scalar_select %p11320_p6, 1, 0 }
  0x4a   : > { %12465 = sst [smem:[#allocation71_spill]] %s12464_s28  ;;  %p729_p8 = scmp.lt.s32.totalorder %s11061_s11, 3 }
  0x4b   : > { %12467 = sst [smem:[#allocation72_spill]] %s12466_s1  ;;  %p12432_p9 = scmp.eq.s32.totalorder %s11299_s15, 0 }
  0x4c   : > { %p11327_p10 = pnand %p8829_p7, %p729_p8  ;;  %s11092_s23 = smov [#allocation5]  }
  0x4d   : > { %s755_s16 = sshll.u32 %s11092_s23, 4  ;;  %s11093_s26 = smov [#allocation8]   ;;  %s756_s16 = int_to_ptr.vmem [resolvable:$true] %s755_s16 }
  0x4e   : > { %s12468_s2 = scalar_select %p11327_p10, 1, 0 }
  0x4f   : > { %p10167_p11 = pneg %p11327_p10  ;;  %s779_s0 = sshll.u32 %s11093_s26, 4  ;;  %s780_s0 = int_to_ptr.vmem [resolvable:$true] %s779_s0 }
  0x50   : > { %s10392_s1 = scalar_lea.vmem %s756_s16, 384  ;;  %p10400_p3 = scmp.lt.s32.totalorder %s756_s16, %s756_s16 }
  0x51   : > { %p11335_p12 = pnand %p12432_p9, %p10167_p11  ;;  %p10393_p0 = scmp.ne.s32.totalorder %s756_s16, %s10392_s1 }
  0x52   : > { %p10401_p4 = scmp.lt.s32.totalorder %s10392_s1, %s10392_s1 }
  0x53   : > { %p11341_p13 = pneg %p11335_p12 }
  0x54   : > { %p10402_p7 = por %p10401_p4, %p10400_p3 }
  0x55   : > { %p10395_p1 = pnand %p10393_p0, %p11341_p13 }
  0x57   : > { %p10396_p2 = pneg %p10395_p1 }
  0x59   : > { %p10403_p8 = pnand %p10402_p7, %p10396_p2 }
  0x5b   : > { %10406 = shalt.err (!%p10403_p8)
}
  0x5c   : > { %s12434_s23 = smov 64   ;;  %s12471_s17 = sld [smem:[#allocation53_spill]] }
  0x5d   : > { %s12436_s26 = smov 4   ;;  %s10418_s7 = scalar_lea.vmem %s780_s0, 3072 }
  0x5e   : > { %p10419_p11 = scmp.ne.s32.totalorder %s780_s0, %s10418_s7  ;;  %p10426_p9 = scmp.lt.s32.totalorder %s780_s0, %s780_s0 }
  0x5f   : > { %p10427_p6 = scmp.lt.s32.totalorder %s10418_s7, %s10418_s7 }
  0x60   : > { %p10421_p0 = pnand %p10419_p11, %p11341_p13 }
  0x61   : > { %p10428_p3 = por %p10427_p6, %p10426_p9 }
  0x62   : > { %10173 = dma.hbm_to_vmem [thread:$0]  (!%p11335_p12), %s12471_s17, 384, %s756_s16, [#allocation6], %s12434_s23, %s12434_s23, %s12436_s26  }
  0x63   : > { %p10422_p1 = pneg %p10421_p0 }
  0x65   : > { %p10429_p2 = pnand %p10428_p3, %p10422_p1 }
  0x67   : > { %10432 = shalt.err (!%p10429_p2)
}
  0x68   : > { %s12442_s1 = smov 128   ;;  %s12472_s25 = sld [smem:[#allocation54_spill]] }
  0x69   : > { %s11097_s11 = smov 8   ;;  %s11098_s16 = smov [#allocation11]  }
  0x6a   : > { %s803_s23 = sshll.u32 %s11098_s16, 4  ;;  %s11099_s26 = smov [#allocation14]   ;;  %s804_s23 = int_to_ptr.vmem [resolvable:$true] %s803_s23 }
  0x6b   : > { %s827_s17 = sshll.u32 %s11099_s26, 4  ;;  %s10444_s7 = scalar_lea.vmem %s804_s23, 192  ;;  %s828_s17 = int_to_ptr.vmem [resolvable:$true] %s827_s17 }
  0x6c   : > { %p10445_p6 = scmp.ne.s32.totalorder %s804_s23, %s10444_s7  ;;  %p10452_p7 = scmp.lt.s32.totalorder %s804_s23, %s804_s23 }
  0x6d   : > { %p10453_p8 = scmp.lt.s32.totalorder %s10444_s7, %s10444_s7 }
  0x6e   : > { %10179 = dma.hbm_to_vmem [thread:$0]  (!%p11335_p12), %s12472_s25, 3072, %s780_s0, [#allocation9], %s12442_s1, %s12442_s1, %s11097_s11  }
  0x6f   : > { %p10447_p9 = pnand %p10445_p6, %p11341_p13  ;;  %p10454_p11 = por %p10453_p8, %p10452_p7 }
  0x71   : > { %p10448_p4 = pneg %p10447_p9 }
  0x73   : > { %p10455_p0 = pnand %p10454_p11, %p10448_p4 }
  0x75   : > { %10458 = shalt.err (!%p10455_p0)
}
  0x76   : > { %s12473_s28 = smov 4   ;;  %s12474_s0 = smov 64  }
  0x77   : > { %s12475_s3 = sld [smem:[#allocation55_spill]]  ;;  %s10470_s26 = scalar_lea.vmem %s828_s17, 3072 }
  0x78   : > { %p10471_p1 = scmp.ne.s32.totalorder %s828_s17, %s10470_s26  ;;  %p10478_p6 = scmp.lt.s32.totalorder %s828_s17, %s828_s17 }
  0x79   : > { %p10479_p9 = scmp.lt.s32.totalorder %s10470_s26, %s10470_s26 }
  0x7a   : > { %p10473_p3 = pnand %p10471_p1, %p11341_p13 }
  0x7b   : > { %p10480_p5 = por %p10479_p9, %p10478_p6 }
  0x7c   : > { %p10474_p2 = pneg %p10473_p3 }
  0x7d   : > { %10185 = dma.hbm_to_vmem [thread:$0]  (!%p11335_p12), %s12475_s3, 192, %s804_s23, [#allocation12], %s12474_s0, %s12474_s0, %s12473_s28  }
  0x7e   : > { %p10481_p10 = pnand %p10480_p5, %p10474_p2 }
  0x80   : > { %10484 = shalt.err (!%p10481_p10)
}
  0x81   : > { %10191 = dma.hbm_to_vmem [thread:$0]  (!%p11335_p12), %s11176_s14, 3072, %s828_s17, [#allocation15], %s12442_s1, %s12442_s1, %s11097_s11  }
  0x82   : > { %s11100_s16 = smov [#allocation17]   ;;  %s11101_s7 = smov [#allocation20]  }
  0x83   : > { %s857_s23 = sshll.u32 %s11100_s16, 4  ;;  %s887_s3 = sshll.u32 %s11101_s7, 4  ;;  %s858_s23 = int_to_ptr.vmem [resolvable:$true] %s857_s23  ;;  %s888_s3 = int_to_ptr.vmem [resolvable:$true] %s887_s3 }
  0x84   : > { %s10496_s25 = scalar_lea.vmem %s858_s23, 768  ;;  %p10504_p10 = scmp.lt.s32.totalorder %s858_s23, %s858_s23 }
  0x85   : > { %p10497_p4 = scmp.ne.s32.totalorder %s858_s23, %s10496_s25  ;;  %p10505_p8 = scmp.lt.s32.totalorder %s10496_s25, %s10496_s25 }
  0x87   : > { %p10499_p7 = pnand %p10497_p4, %p11341_p13  ;;  %p10506_p11 = por %p10505_p8, %p10504_p10 }
  0x89   : > { %p10500_p5 = pneg %p10499_p7 }
  0x8b   : > { %p10507_p0 = pnand %p10506_p11, %p10500_p5 }
  0x8d   : > { %10510 = shalt.err (!%p10507_p0)
}
  0x8e   : > { %10197 = dma.hbm_to_vmem [thread:$0]  (!%p11335_p12), %s11196_s6, 768, %s858_s23, [#allocation18], %s12442_s1, %s12442_s1, %s11097_s11  }
  0x8f   : > { %s10522_s17 = scalar_lea.vmem %s888_s3, 16  ;;  %s10529_s26 = scalar_lea.vmem %s888_s3, 32 }
  0x90   : > { %p10523_p1 = scmp.ne.s32.totalorder %s888_s3, %s10522_s17  ;;  %p10530_p6 = scmp.lt.s32.totalorder %s888_s3, %s888_s3 }
  0x91   : > { %p10531_p9 = scmp.lt.s32.totalorder %s10529_s26, %s10522_s17 }
  0x92   : > { %p10525_p3 = pnand %p10523_p1, %p11341_p13 }
  0x93   : > { %p10532_p4 = por %p10531_p9, %p10530_p6 }
  0x94   : > { %p10526_p2 = pneg %p10525_p3 }
  0x96   : > { %p10533_p7 = pnand %p10532_p4, %p10526_p2 }
  0x98   : > { %10536 = shalt.err (!%p10533_p7)
}
  0x99   : > { %10203 = dma.hbm_to_vmem [thread:$0]  (!%p11335_p12), %s11211_s27, 16, %s888_s3, [#allocation21]  }
  0x9a   : > { %s11102_s25 = smov [#allocation23]   ;;  %s11103_s7 = smov [#allocation26]  }
  0x9b   : > { %s911_s16 = sshll.u32 %s11102_s25, 4  ;;  %s935_s23 = sshll.u32 %s11103_s7, 4  ;;  %s912_s16 = int_to_ptr.vmem [resolvable:$true] %s911_s16  ;;  %s936_s23 = int_to_ptr.vmem [resolvable:$true] %s935_s23 }
  0x9c   : > { %s10548_s1 = scalar_lea.vmem %s912_s16, 128  ;;  %p10556_p11 = scmp.lt.s32.totalorder %s912_s16, %s912_s16 }
  0x9d   : > { %p10549_p5 = scmp.ne.s32.totalorder %s912_s16, %s10548_s1  ;;  %p10557_p0 = scmp.lt.s32.totalorder %s10548_s1, %s10548_s1 }
  0x9f   : > { %p10551_p10 = pnand %p10549_p5, %p11341_p13  ;;  %p10558_p1 = por %p10557_p0, %p10556_p11 }
  0xa1   : > { %p10552_p8 = pneg %p10551_p10 }
  0xa3   : > { %p10559_p3 = pnand %p10558_p1, %p10552_p8 }
  0xa5   : > { %10562 = shalt.err (!%p10559_p3)
}
  0xa6   : > { %10209 = dma.hbm_to_vmem [thread:$0]  (!%p11335_p12), %s11226_s30, 128, %s912_s16, [#allocation24], %s12474_s0, %s12474_s0, %s12473_s28  }
  0xa7   : > { %s10574_s3 = scalar_lea.vmem %s936_s23, 256  ;;  %p10582_p4 = scmp.lt.s32.totalorder %s936_s23, %s936_s23 }
  0xa8   : > { %p10575_p2 = scmp.ne.s32.totalorder %s936_s23, %s10574_s3  ;;  %p10583_p7 = scmp.lt.s32.totalorder %s10574_s3, %s10574_s3 }
  0xaa   : > { %p10577_p6 = pnand %p10575_p2, %p11341_p13  ;;  %p10584_p5 = por %p10583_p7, %p10582_p4 }
  0xac   : > { %p10578_p9 = pneg %p10577_p6 }
  0xae   : > { %p10585_p10 = pnand %p10584_p5, %p10578_p9 }
  0xb0   : > { %10588 = shalt.err (!%p10585_p10)
}
  0xb1   : > { %s12476_s1 = smov 128   ;;  %s11104_s17 = smov [#allocation29]  }
  0xb2   : > { %10215 = dma.hbm_to_vmem [thread:$0]  (!%p11335_p12), %s11236_s4, 256, %s936_s23, [#allocation27], %s12476_s1, %s12476_s1, %s11097_s11  }
  0xb3   : > { %s959_s28 = sshll.u32 %s11104_s17, 4  ;;  %s11105_s0 = smov [#allocation32]   ;;  %s960_s28 = int_to_ptr.vmem [resolvable:$true] %s959_s28 }
  0xb4   : > { %s983_s26 = sshll.u32 %s11105_s0, 4  ;;  %s10600_s25 = scalar_lea.vmem %s960_s28, 768  ;;  %s984_s26 = int_to_ptr.vmem [resolvable:$true] %s983_s26 }
  0xb5   : > { %p10601_p8 = scmp.ne.s32.totalorder %s960_s28, %s10600_s25  ;;  %p10608_p1 = scmp.lt.s32.totalorder %s960_s28, %s960_s28 }
  0xb6   : > { %p10609_p3 = scmp.lt.s32.totalorder %s10600_s25, %s10600_s25 }
  0xb7   : > { %p10603_p11 = pnand %p10601_p8, %p11341_p13 }
  0xb8   : > { %p10610_p2 = por %p10609_p3, %p10608_p1 }
  0xb9   : > { %p10604_p0 = pneg %p10603_p11 }
  0xbb   : > { %p10611_p6 = pnand %p10610_p2, %p10604_p0 }
  0xbd   : > { %10614 = shalt.err (!%p10611_p6)
}
  0xbe   : > { %10221 = dma.hbm_to_vmem [thread:$0]  (!%p11335_p12), %s11246_s5, 768, %s960_s28, [#allocation30], %s12476_s1, %s12476_s1, %s11097_s11  }
  0xbf   : > { %s10626_s16 = scalar_lea.vmem %s984_s26, 2048  ;;  %p10634_p5 = scmp.lt.s32.totalorder %s984_s26, %s984_s26 }
  0xc0   : > { %p10627_p9 = scmp.ne.s32.totalorder %s984_s26, %s10626_s16  ;;  %p10635_p10 = scmp.lt.s32.totalorder %s10626_s16, %s10626_s16 }
  0xc2   : > { %p10629_p4 = pnand %p10627_p9, %p11341_p13  ;;  %p10636_p8 = por %p10635_p10, %p10634_p5 }
  0xc4   : > { %p10630_p7 = pneg %p10629_p4 }
  0xc6   : > { %p10637_p11 = pnand %p10636_p8, %p10630_p7 }
  0xc8   : > { %10640 = shalt.err (!%p10637_p11)
}
  0xc9   : > { %10227 = dma.hbm_to_vmem [thread:$0]  (!%p11335_p12), %s11256_s12, 2048, %s984_s26, [#allocation33], %s12476_s1, %s12476_s1, %s11097_s11  }
  0xca   : > { %s11106_s7 = smov [#allocation2]   ;;  %s11107_s3 = smov [#allocation7]  }
  0xcb   : > { %s745_s23 = sshll.u32 %s11106_s7, 4  ;;  %s769_s17 = sshll.u32 %s11107_s3, 4  ;;  %s746_s23 = int_to_ptr.vmem [resolvable:$true] %s745_s23  ;;  %s770_s17 = int_to_ptr.vmem [resolvable:$true] %s769_s17 }
  0xcc   : > { %s10652_s28 = scalar_lea.vmem %s746_s23, 16  ;;  %s10659_s0 = scalar_lea.vmem %s746_s23, 32 }
  0xcd   : > { %p10653_p0 = scmp.ne.s32.totalorder %s746_s23, %s10652_s28  ;;  %p10660_p2 = scmp.lt.s32.totalorder %s746_s23, %s746_s23 }
  0xce   : > { %p10661_p6 = scmp.lt.s32.totalorder %s10659_s0, %s10652_s28 }
  0xcf   : > { %p10655_p1 = pnand %p10653_p0, %p11341_p13 }
  0xd0   : > { %p10662_p9 = por %p10661_p6, %p10660_p2 }
  0xd1   : > { %p10656_p3 = pneg %p10655_p1 }
  0xd3   : > { %p10663_p4 = pnand %p10662_p9, %p10656_p3 }
  0xd5   : > { %10666 = shalt.err (!%p10663_p4)
}
  0xd6   : > { %10170 = dma.hbm_to_vmem [thread:$0]  (!%p11335_p12), %s11141_s13, 16, %s746_s23, [#allocation3]  }
  0xd7   : > { %s10678_s26 = scalar_lea.vmem %s770_s17, 16  ;;  %s10685_s25 = scalar_lea.vmem %s770_s17, 32 }
  0xd8   : > { %p10679_p7 = scmp.ne.s32.totalorder %s770_s17, %s10678_s26  ;;  %p10686_p8 = scmp.lt.s32.totalorder %s770_s17, %s770_s17 }
  0xd9   : > { %p10687_p11 = scmp.lt.s32.totalorder %s10685_s25, %s10678_s26 }
  0xda   : > { %p10681_p5 = pnand %p10679_p7, %p11341_p13 }
  0xdb   : > { %p10688_p0 = por %p10687_p11, %p10686_p8 }
  0xdc   : > { %p10682_p10 = pneg %p10681_p5 }
  0xde   : > { %p10689_p1 = pnand %p10688_p0, %p10682_p10 }
  0xe0   : > { %10692 = shalt.err (!%p10689_p1)
}
  0xe1   : > { %10176 = dma.hbm_to_vmem [thread:$0]  (!%p11335_p12), %s11151_s21, 16, %s770_s17, [#allocation6]  }
  0xe2   : > { %s11108_s16 = smov [#allocation10]   ;;  %s11109_s3 = smov [#allocation13]  }
  0xe3   : > { %s793_s7 = sshll.u32 %s11108_s16, 4  ;;  %s817_s23 = sshll.u32 %s11109_s3, 4  ;;  %s794_s7 = int_to_ptr.vmem [resolvable:$true] %s793_s7  ;;  %s818_s23 = int_to_ptr.vmem [resolvable:$true] %s817_s23 }
  0xe4   : > { %s10704_s28 = scalar_lea.vmem %s794_s7, 16  ;;  %s10711_s0 = scalar_lea.vmem %s794_s7, 32 }
  0xe5   : > { %p10705_p3 = scmp.ne.s32.totalorder %s794_s7, %s10704_s28  ;;  %p10712_p9 = scmp.lt.s32.totalorder %s794_s7, %s794_s7 }
  0xe6   : > { %p10713_p4 = scmp.lt.s32.totalorder %s10711_s0, %s10704_s28 }
  0xe7   : > { %p10707_p2 = pnand %p10705_p3, %p11341_p13 }
  0xe8   : > { %p10714_p7 = por %p10713_p4, %p10712_p9 }
  0xe9   : > { %p10708_p6 = pneg %p10707_p2 }
  0xeb   : > { %p10715_p5 = pnand %p10714_p7, %p10708_p6 }
  0xed   : > { %10718 = shalt.err (!%p10715_p5)
}
  0xee   : > { %10182 = dma.hbm_to_vmem [thread:$0]  (!%p11335_p12), %s11161_s29, 16, %s794_s7, [#allocation9]  }
  0xef   : > { %s10730_s17 = scalar_lea.vmem %s818_s23, 16  ;;  %s10737_s26 = scalar_lea.vmem %s818_s23, 32 }
  0xf0   : > { %p10731_p10 = scmp.ne.s32.totalorder %s818_s23, %s10730_s17  ;;  %p10738_p0 = scmp.lt.s32.totalorder %s818_s23, %s818_s23 }
  0xf1   : > { %p10739_p1 = scmp.lt.s32.totalorder %s10737_s26, %s10730_s17 }
  0xf2   : > { %p10733_p8 = pnand %p10731_p10, %p11341_p13 }
  0xf3   : > { %p10740_p3 = por %p10739_p1, %p10738_p0 }
  0xf4   : > { %p10734_p11 = pneg %p10733_p8 }
  0xf6   : > { %p10741_p2 = pnand %p10740_p3, %p10734_p11 }
  0xf8   : > { %10744 = shalt.err (!%p10741_p2)
}
  0xf9   : > { %10188 = dma.hbm_to_vmem [thread:$0]  (!%p11335_p12), %s11171_s8, 16, %s818_s23, [#allocation12]  }
  0xfa   : > { %s11110_s25 = smov [#allocation16]   ;;  %s11111_s3 = smov [#allocation19]  }
  0xfb   : > { %s841_s16 = sshll.u32 %s11110_s25, 4  ;;  %s873_s7 = sshll.u32 %s11111_s3, 4  ;;  %s842_s16 = int_to_ptr.vmem [resolvable:$true] %s841_s16  ;;  %s874_s7 = int_to_ptr.vmem [resolvable:$true] %s873_s7 }
  0xfc   : > { %s10756_s28 = scalar_lea.vmem %s842_s16, 16  ;;  %s10763_s0 = scalar_lea.vmem %s842_s16, 32 }
  0xfd   : > { %p10757_p6 = scmp.ne.s32.totalorder %s842_s16, %s10756_s28  ;;  %p10764_p7 = scmp.lt.s32.totalorder %s842_s16, %s842_s16 }
  0xfe   : > { %p10765_p5 = scmp.lt.s32.totalorder %s10763_s0, %s10756_s28 }
  0xff   : > { %p10759_p9 = pnand %p10757_p6, %p11341_p13 }
 0x100   : > { %p10766_p10 = por %p10765_p5, %p10764_p7 }
 0x101   : > { %p10760_p4 = pneg %p10759_p9 }
 0x103   : > { %p10767_p8 = pnand %p10766_p10, %p10760_p4 }
 0x105   : > { %10770 = shalt.err (!%p10767_p8)
}
 0x106   : > { %s12477_s23 = sld [smem:[#allocation56_spill]]  ;;  %s10782_s17 = scalar_lea.vmem %s874_s7, 768 }
 0x107   : > { %p10783_p11 = scmp.ne.s32.totalorder %s874_s7, %s10782_s17  ;;  %p10790_p3 = scmp.lt.s32.totalorder %s874_s7, %s874_s7 }
 0x108   : > { %p10791_p2 = scmp.lt.s32.totalorder %s10782_s17, %s10782_s17 }
 0x109   : > { %p10785_p0 = pnand %p10783_p11, %p11341_p13 }
 0x10a   : > { %p10792_p6 = por %p10791_p2, %p10790_p3 }
 0x10b   : > { %p10786_p1 = pneg %p10785_p0 }
 0x10c   : > { %10194 = dma.hbm_to_vmem [thread:$0]  (!%p11335_p12), %s12477_s23, 16, %s842_s16, [#allocation15]  }
 0x10d   : > { %p10793_p9 = pnand %p10792_p6, %p10786_p1 }
 0x10f   : > { %10796 = shalt.err (!%p10793_p9)
}
 0x110   : > { %s12478_s26 = sld [smem:[#allocation60_spill]]  ;;  %s11112_s25 = smov [#allocation22]  }
 0x111   : > { %s901_s16 = sshll.u32 %s11112_s25, 4  ;;  %s11113_s3 = smov [#allocation25]   ;;  %s902_s16 = int_to_ptr.vmem [resolvable:$true] %s901_s16 }
 0x112   : > { %s925_s28 = sshll.u32 %s11113_s3, 4  ;;  %s10808_s0 = scalar_lea.vmem %s902_s16, 16  ;;  %s926_s28 = int_to_ptr.vmem [resolvable:$true] %s925_s28 }
 0x113   : > { %p10809_p4 = scmp.ne.s32.totalorder %s902_s16, %s10808_s0  ;;  %s10815_s23 = scalar_lea.vmem %s902_s16, 32 }
 0x114   : > { %p10816_p10 = scmp.lt.s32.totalorder %s902_s16, %s902_s16  ;;  %p10817_p8 = scmp.lt.s32.totalorder %s10815_s23, %s10808_s0 }
 0x115   : > { %p10811_p7 = pnand %p10809_p4, %p11341_p13 }
 0x116   : > { %10200 = dma.hbm_to_vmem [thread:$0]  (!%p11335_p12), %s12478_s26, 768, %s874_s7, [#allocation18], %s12476_s1, %s12476_s1, %s11097_s11  }
 0x117   : > { %p10812_p5 = pneg %p10811_p7  ;;  %p10818_p11 = por %p10817_p8, %p10816_p10 }
 0x119   : > { %p10819_p0 = pnand %p10818_p11, %p10812_p5 }
 0x11b   : > { %10822 = shalt.err (!%p10819_p0)
}
 0x11c   : > { %s12479_s11 = sld [smem:[#allocation62_spill]]  ;;  %s10834_s1 = scalar_lea.vmem %s926_s28, 16 }
 0x11d   : > { %p10835_p1 = scmp.ne.s32.totalorder %s926_s28, %s10834_s1  ;;  %s10841_s7 = scalar_lea.vmem %s926_s28, 32 }
 0x11e   : > { %p10842_p6 = scmp.lt.s32.totalorder %s926_s28, %s926_s28  ;;  %p10843_p9 = scmp.lt.s32.totalorder %s10841_s7, %s10834_s1 }
 0x11f   : > { %p10837_p3 = pnand %p10835_p1, %p11341_p13 }
 0x120   : > { %p10844_p4 = por %p10843_p9, %p10842_p6 }
 0x121   : > { %p10838_p2 = pneg %p10837_p3 }
 0x122   : > { %10206 = dma.hbm_to_vmem [thread:$0]  (!%p11335_p12), %s12479_s11, 16, %s902_s16, [#allocation21]  }
 0x123   : > { %p10845_p7 = pnand %p10844_p4, %p10838_p2 }
 0x125   : > { %10848 = shalt.err (!%p10845_p7)
}
 0x126   : > { %s12480_s17 = sld [smem:[#allocation63_spill]]  ;;  %s11114_s26 = smov [#allocation28]  }
 0x127   : > { %s949_s25 = sshll.u32 %s11114_s26, 4  ;;  %s11115_s3 = smov [#allocation31]   ;;  %s950_s25 = int_to_ptr.vmem [resolvable:$true] %s949_s25 }
 0x128   : > { %s973_s16 = sshll.u32 %s11115_s3, 4  ;;  %s10860_s0 = scalar_lea.vmem %s950_s25, 16  ;;  %s974_s16 = int_to_ptr.vmem [resolvable:$true] %s973_s16 }
 0x129   : > { %p10861_p5 = scmp.ne.s32.totalorder %s950_s25, %s10860_s0  ;;  %s10867_s23 = scalar_lea.vmem %s950_s25, 32 }
 0x12a   : > { %p10868_p11 = scmp.lt.s32.totalorder %s950_s25, %s950_s25  ;;  %p10869_p0 = scmp.lt.s32.totalorder %s10867_s23, %s10860_s0 }
 0x12b   : > { %p10863_p10 = pnand %p10861_p5, %p11341_p13 }
 0x12c   : > { %10212 = dma.hbm_to_vmem [thread:$0]  (!%p11335_p12), %s12480_s17, 16, %s926_s28, [#allocation24]  }
 0x12d   : > { %p10864_p8 = pneg %p10863_p10  ;;  %p10870_p1 = por %p10869_p0, %p10868_p11 }
 0x12f   : > { %p10871_p3 = pnand %p10870_p1, %p10864_p8 }
 0x131   : > { %10874 = shalt.err (!%p10871_p3)
}
 0x132   : > { %s12481_s28 = sld [smem:[#allocation64_spill]]  ;;  %s10886_s11 = scalar_lea.vmem %s974_s16, 16 }
 0x133   : > { %p10887_p2 = scmp.ne.s32.totalorder %s974_s16, %s10886_s11  ;;  %s10893_s1 = scalar_lea.vmem %s974_s16, 32 }
 0x134   : > { %p10894_p4 = scmp.lt.s32.totalorder %s974_s16, %s974_s16  ;;  %p10895_p7 = scmp.lt.s32.totalorder %s10893_s1, %s10886_s11 }
 0x135   : > { %p10889_p6 = pnand %p10887_p2, %p11341_p13 }
 0x136   : > { %p10896_p5 = por %p10895_p7, %p10894_p4 }
 0x137   : > { %p10890_p9 = pneg %p10889_p6 }
 0x138   : > { %10218 = dma.hbm_to_vmem [thread:$0]  (!%p11335_p12), %s12481_s28, 16, %s950_s25, [#allocation27]  }
 0x139   : > { %p10897_p10 = pnand %p10896_p5, %p10890_p9 }
 0x13b   : > { %10900 = shalt.err (!%p10897_p10)
}
 0x13c   : > { %s12482_s7 = sld [smem:[#allocation65_spill]]  ;;  %s11116_s17 = smov [#allocation34]  }
 0x13d   : > { %s997_s26 = sshll.u32 %s11116_s17, 4  ;;  %s11117_s3 = smov [#allocation35]   ;;  %s998_s26 = int_to_ptr.vmem [resolvable:$true] %s997_s26 }
 0x13e   : > { %s1011_s25 = sshll.u32 %s11117_s3, 4  ;;  %s10912_s0 = scalar_lea.vmem %s998_s26, 16  ;;  %s1012_s25 = int_to_ptr.vmem [resolvable:$true] %s1011_s25 }
 0x13f   : > { %p10913_p8 = scmp.ne.s32.totalorder %s998_s26, %s10912_s0  ;;  %s10919_s23 = scalar_lea.vmem %s998_s26, 32 }
 0x140   : > { %p10920_p1 = scmp.lt.s32.totalorder %s998_s26, %s998_s26  ;;  %p10921_p3 = scmp.lt.s32.totalorder %s10919_s23, %s10912_s0 }
 0x141   : > { %p10915_p11 = pnand %p10913_p8, %p11341_p13 }
 0x142   : > { %10224 = dma.hbm_to_vmem [thread:$0]  (!%p11335_p12), %s12482_s7, 16, %s974_s16, [#allocation30]  }
 0x143   : > { %p10916_p0 = pneg %p10915_p11  ;;  %p10922_p2 = por %p10921_p3, %p10920_p1 }
 0x145   : > { %p10923_p6 = pnand %p10922_p2, %p10916_p0 }
 0x147   : > { %10926 = shalt.err (!%p10923_p6)
}
 0x148   : > { %10230 = dma.hbm_to_vmem [thread:$0]  (!%p11335_p12), %s11261_s9, 16, %s998_s26, [#allocation33]  }
 0x149   : > { %s10938_s16 = scalar_lea.vmem %s1012_s25, 16  ;;  %s10945_s28 = scalar_lea.vmem %s1012_s25, 32 }
 0x14a   : > { %p10939_p9 = scmp.ne.s32.totalorder %s1012_s25, %s10938_s16  ;;  %p10946_p5 = scmp.lt.s32.totalorder %s1012_s25, %s1012_s25 }
 0x14b   : > { %p10947_p10 = scmp.lt.s32.totalorder %s10945_s28, %s10938_s16 }
 0x14c   : > { %p10941_p4 = pnand %p10939_p9, %p11341_p13 }
 0x14d   : > { %p10948_p8 = por %p10947_p10, %p10946_p5 }
 0x14e   : > { %p10942_p7 = pneg %p10941_p4 }
 0x150   : > { %p10949_p11 = pnand %p10948_p8, %p10942_p7 }
 0x152   : > { %10952 = shalt.err (!%p10949_p11)
}
 0x153   : > { %10233 = dma.hbm_to_vmem [thread:$0]  (!%p11335_p12), %s11271_s24, 16, %s1012_s25, [#allocation36]  }
 0x154   : > { %p12483_p0 = scmp.ne.s32.totalorder %s12468_s2, 0 }
 0x155   : > { %p12484_p1 = scmp.eq.s32.totalorder (!%p12483_p0), %s11299_s15, 0 }
 0x156   : > { %1032 = sbr.rel (%p12483_p0) target bundleno = 4052 (0xfd4), region = 136 }
 0x15b   : > { %10996 = dma.done.wait (%p12484_p1), [#allocation3], 16   ;;  %p12485_p3 = pmov %p12484_p1 }
 0x15c   : > { %p12486_p13 = pmov %p12484_p1 }
 0x15d   : > { %10998 = vsyncadd (%p12485_p3), [#allocation3], 4294967280 }
 0x15e   : > { %11000 = dma.done.wait (%p12486_p13), [#allocation6], 400   ;;  %p12487_p2 = pmov %p12484_p1 }
 0x15f   : > { %p12488_p6 = pmov %p12484_p1 }
 0x160   : > { %11002 = vsyncadd (%p12487_p2), [#allocation6], 4294966896 }
 0x161   : > { %11004 = dma.done.wait (%p12488_p6), [#allocation9], 3088   ;;  %p12489_p12 = pmov %p12484_p1 }
 0x162   : > { %p12490_p9 = pmov %p12484_p1 }
 0x163   : > { %11006 = vsyncadd (%p12489_p12), [#allocation9], 4294964208 }
 0x164   : > { %11008 = dma.done.wait (%p12490_p9), [#allocation12], 208   ;;  %p12491_p4 = pmov %p12484_p1 }
 0x165   : > { %p12492_p7 = pmov %p12484_p1 }
 0x166   : > { %11010 = vsyncadd (%p12491_p4), [#allocation12], 4294967088 }
 0x167   : > { %11012 = dma.done.wait (%p12492_p7), [#allocation15], 3088   ;;  %p12493_p5 = pmov %p12484_p1 }
 0x168   : > { %p12494_p10 = pmov %p12484_p1 }
 0x169   : > { %11014 = vsyncadd (%p12493_p5), [#allocation15], 4294964208 }
 0x16a   : > { %11016 = dma.done.wait (%p12494_p10), [#allocation18], 1536   ;;  %p12495_p8 = pmov %p12484_p1 }
 0x16b   : > { %p12496_p11 = pmov %p12484_p1 }
 0x16c   : > { %11018 = vsyncadd (%p12495_p8), [#allocation18], 4294965760 }
 0x16d   : > { %11020 = dma.done.wait (%p12496_p11), [#allocation21], 32   ;;  %p12497_p0 = pmov %p12484_p1 }
 0x16f   : > { %11022 = vsyncadd (%p12497_p0), [#allocation21], 4294967264  ;;  %p12498_p1 = pmov %p12497_p0 }
 0x170   : > { %p12499_p3 = pmov %p12497_p0 }
 0x171   : > { %11024 = dma.done.wait (%p12498_p1), [#allocation24], 144  }
 0x172   : > { %11026 = vsyncadd (%p12499_p3), [#allocation24], 4294967152  ;;  %p12500_p13 = pmov %p12497_p0 }
 0x173   : > { %p12501_p2 = pmov %p12497_p0 }
 0x174   : > { %11028 = dma.done.wait (%p12500_p13), [#allocation27], 272  }
 0x175   : > { %11030 = vsyncadd (%p12501_p2), [#allocation27], 4294967024  ;;  %p12502_p6 = pmov %p12497_p0 }
 0x176   : > { %p12503_p12 = pmov %p12497_p0 }
 0x177   : > { %11032 = dma.done.wait (%p12502_p6), [#allocation30], 784  }
 0x178   : > { %11034 = vsyncadd (%p12503_p12), [#allocation30], 4294966512  ;;  %p12504_p9 = pmov %p12497_p0 }
 0x179   : > { %p12505_p4 = pmov %p12497_p0 }
 0x17a   : > { %11036 = dma.done.wait (%p12504_p9), [#allocation33], 2064  }
 0x17b   : > { %11038 = vsyncadd (%p12505_p4), [#allocation33], 4294965232  ;;  %p12506_p7 = pmov %p12497_p0 }
 0x17c   : > { %p12507_p5 = pmov %p12497_p0 }
 0x17d   : > { %11040 = dma.done.wait (%p12506_p7), [#allocation36], 16  }
 0x17e   : > { %11042 = vsyncadd (%p12507_p5), [#allocation36], 4294967280  ;;  %s12508_s18 = sld [smem:[#allocation51_spill]]  ;;  %p1191_p10 = scmp.lt.s32.totalorder %s11299_s15, 1  ;;  %vm1214_vm0 = vcmask 1043456   ;;  %vm1205_vm1 = vcmask 1046528   ;;  %v2282_v33 = vlaneseq }
 0x17f   : > { %s12509_s2 = sld [smem:[#allocation52_spill]]  ;;  %vm1209_vm2 = vcmask 31744   ;;  %vm1377_vm3 = vcmask 1045504   ;;  %vm1467_vm4 = vcmask 1044480   ;;  %vm1649_vm5 = vcmask 1042432   ;;  %s11119_s7 = smov 96  }
 0x180   : > { %s1192_s22 = scalar_select %p1191_p10, %s11299_s15, 1  ;;  %vm1833_vm6 = vcmask 1040384   ;;  %vm1741_vm7 = vcmask 1041408   ;;  %v11635_v42 = vand.u32 127, %v2282_v33  ;;  %v11658_v49 = vshrl.u32 %v2282_v33, 7 }
 0x181   : > { %v11118_v56 = vmov 0.0   ;;  %vm2302_vm9 = vcmask 195584   ;;  %v2402_v62 = vld [vmem:[#allocation5 + $0x4] sm:$0xf]  ;;  %v2607_v63 = vld [vmem:[#allocation5 + $0x8] sm:$0xf] }
 0x182   : > { %s10076_s11 = smul.u32 24, %s1192_s22  ;;  %v2289_v50 = vadd.s32 3, %v11635_v42  ;;  %v11684_v54 = vadd.s32 8, %v11658_v49  ;;  %v11690_v55 = vadd.s32 16, %v11658_v49  ;;  %v11699_v58 = vadd.s32 24, %v11658_v49  ;;  %s11121_s17 = smov 112  }
 0x183   : > { %vm11120_vm13 = vmmov 0   ;;  %vm3056_vm14 = vcmask 203776   ;;  %s12510_s26 = sld [smem:[#allocation57_spill]]  ;;  %s1189_s16 = sand.u32 1, %s11053_s10  }
 0x184   : > { %s11538_s1 = scalar_lea.vmem %s12508_s18, %s10076_s11  ;;  %vm2290_vm8 = vcmp.eq.s32.totalorder %v11658_v49, %v2289_v50  ;;  %vm2291_vm10 = vcmp.eq.s32.totalorder %v11684_v54, %v2289_v50  ;;  %vm2292_vm11 = vcmp.eq.s32.totalorder %v11690_v55, %v2289_v50  ;;  %vm2293_vm12 = vcmp.eq.s32.totalorder %v11699_v58, %v2289_v50  ;;  %s12511_s3 = sld [smem:[#allocation58_spill]] }
 0x185   : > { %v8877_v0 = vld [vmem:[%s12509_s2 + $0x4] sm:$0xf]  ;;  %v1200_v1 = vld [vmem:[%s12509_s2] sm:$0xf]  ;;  %v11548_v3 = vld [vmem:[%s11538_s1 + $0x8] sm:$0xff]  ;;  %v8925_v57 = vsel %vm2290_vm8, 1.0, %v11118_v56 }
 0x186   : > { %v11543_v2 = vld [vmem:[%s11538_s1] sm:$0xff]  ;;  %9440 = vmatprep.subr.msk.mxu0 %vm1214_vm0, %v8877_v0  ;;  %9445 = vmatprep.subr.msk.mxu1 %vm1214_vm0, %v1200_v1  ;;  %v8884_v5 = vld [vmem:[%s12509_s2 + $0x8] sm:$0xf]  ;;  %v11555_v7 = vrot.slane %v11548_v3, 1  ;;  %v11559_v8 = vrot.slane %v11548_v3, 2  ;;  %v11564_v11 = vrot.slane %v11548_v3, 3 }
 0x187   : > { %v1206_v4 = vrot.slane %v11543_v2, 1  ;;  %v1378_v6 = vrot.slane %v11543_v2, 2  ;;  %9441 = vmatpush3.msk.msra.mxu0 %vm1214_vm0, %v8877_v0  ;;  %9446 = vmatpush3.msk.msra.mxu1 %vm1214_vm0, %v1200_v1  ;;  %v8888_v9 = vld [vmem:[%s12509_s2 + $0xc] sm:$0xf]  ;;  %v1468_v10 = vrot.slane %v11543_v2, 3  ;;  %v1558_v12 = vrot.slane %v11543_v2, 4 }
 0x188   : > { %9447 = vmatprep.mubr.msk.f32.mxu1 %vm1209_vm2, %v11543_v2  ;;  %9450 = vmatprep.subr.msk.mxu0 %vm1214_vm0, %v8884_v5  ;;  %v1559_v13 = vrot.slane %v11548_v3, 4  ;;  %v1650_v14 = vrot.slane %v11543_v2, 5  ;;  %v11573_v15 = vld [vmem:[%s11538_s1 + $0x10] sm:$0xff]  ;;  %v1651_v19 = vrot.slane %v11548_v3, 5  ;;  %v1834_v24 = vrot.slane %v11543_v2, 7  ;;  %s12512_s25 = sld [smem:[#allocation59_spill]] }
 0x189   : > { %v11577_v16 = vsel %vm1205_vm1, %v1206_v4, %v11555_v7  ;;  %9448 = vmatmul.mubr.msk.f32.vlgmr.msra.gmra.mxu1 %vm1209_vm2, %v11548_v3  ;;  %v11583_v17 = vsel %vm1377_vm3, %v1378_v6, %v11559_v8  ;;  %9455 = vmatprep.subr.msk.mxu1 %vm1214_vm0, %v8888_v9  ;;  %v1470_v18 = vsel %vm1467_vm4, %v1468_v10, %v11564_v11  ;;  %v8892_v20 = vld [vmem:[%s12509_s2 + $0x10] sm:$0xf]  ;;  %v1653_v21 = vrot.slane %v11573_v15, 5  ;;  %v8896_v22 = vld [vmem:[%s12509_s2 + $0x14] sm:$0xf]  ;;  %s12513_s0 = sld [smem:[#allocation61_spill]] }
 0x18a   : > { %9442 = vmatprep.mubr.msk.f32.mxu0 %vm1209_vm2, %v11577_v16  ;;  %9456 = vmatpush3.msk.msra.mxu1 %vm1214_vm0, %v8888_v9  ;;  %v1652_v23 = vsel %vm1649_vm5, %v1650_v14, %v1651_v19  ;;  %v1561_v25 = vrot.slane %v11573_v15, 4  ;;  %v1835_v26 = vrot.slane %v11548_v3, 7  ;;  %v1560_v27 = vsel %vm1214_vm0, %v1558_v12, %v1559_v13  ;;  %v8900_v31 = vld [vmem:[%s12509_s2 + $0x18] sm:$0xf]  ;;  %v8904_v34 = vld [vmem:[%s12509_s2 + $0x1c] sm:$0xf] }
 0x18b   : > { %9443 = vmatmul.mubr.msk.f32.vlgmr.msra.gmra.mxu0 %vm1209_vm2, %v11555_v7  ;;  %9457 = vmatprep.mubr.msk.f32.mxu1 %vm1209_vm2, %v1470_v18  ;;  %v1742_v28 = vrot.slane %v11543_v2, 6  ;;  %v1743_v29 = vrot.slane %v11548_v3, 6  ;;  %v1654_v30 = vsel %vm1649_vm5, %v1651_v19, %v1653_v21  ;;  %v1837_v32 = vrot.slane %v11573_v15, 7  ;;  %v8908_v41 = vld [vmem:[%s12509_s2 + $0x20] sm:$0xf]  ;;  %s12514_s23 = sld [smem:[#allocation71_spill]] }
 0x18c   : > { %9451 = vmatpush3.msk.msra.mxu0 %vm1214_vm0, %v8884_v5  ;;  %9452 = vmatprep.mubr.msk.f32.mxu0 %vm1209_vm2, %v11583_v17  ;;  %v1836_v35 = vsel %vm1833_vm6, %v1834_v24, %v1835_v26  ;;  %v11622_v36 = vrot.slane %v11573_v15, 1  ;;  %v1562_v37 = vsel %vm1214_vm0, %v1559_v13, %v1561_v25  ;;  %v1745_v38 = vrot.slane %v11573_v15, 6  ;;  %v8912_v43 = vld [vmem:[%s12509_s2 + $0x24] sm:$0xf]  ;;  %v8916_v48 = vld [vmem:[%s12509_s2 + $0x28] sm:$0xf] }
 0x18d   : > { %9458 = vmatmul.mubr.msk.f32.vlgmr.msra.gmra.mxu1 %vm1209_vm2, %v11564_v11  ;;  %9460 = vmatprep.subr.msk.mxu0 %vm1214_vm0, %v8892_v20  ;;  %v1744_v39 = vsel %vm1741_vm7, %v1742_v28, %v1743_v29  ;;  %v1838_v40 = vsel %vm1833_vm6, %v1835_v26, %v1837_v32  ;;  %v2185_v45 = vrot.slane %v11573_v15, 3  ;;  %v11652_v47 = vrot.slane %v11573_v15, 2  ;;  %v8920_v51 = vld [vmem:[%s12509_s2 + $0x2c] sm:$0xf]  ;;  %v11719_v0 = vld [vmem:[#allocation5] sm:$0xf] }
 0x18e   : > { %9465 = vmatprep.subr.msk.mxu1 %vm1214_vm0, %v8896_v22  ;;  %9467 = vmatprep.mubr.msk.f32.mxu1 %vm1209_vm2, %v1652_v23  ;;  %v11643_v44 = vsel %vm1205_vm1, %v11555_v7, %v11622_v36  ;;  %v1746_v46 = vsel %vm1741_vm7, %v1743_v29, %v1745_v38  ;;  %v8926_v59 = vsel %vm2291_vm10, 1.0, %v11118_v56  ;;  %v8927_v60 = vsel %vm2292_vm11, 1.0, %v11118_v56  ;;  %v11721_v1 = vld [vmem:[#allocation5 + $0x10] sm:$0xf]  ;;  %s9119_s28 = sshll.u32 %s11299_s15, 4  ;;  %s1190_s18 = scalar_lea.vmem [#allocation37], %s1189_s16 }
 0x18f   : > { %9453 = vmatmul.mubr.msk.f32.vlgmr.msra.gmra.mxu0 %vm1209_vm2, %v11559_v8  ;;  %9466 = vmatpush3.msk.msra.mxu1 %vm1214_vm0, %v8896_v22  ;;  %v2186_v52 = vsel %vm1467_vm4, %v11564_v11, %v2185_v45  ;;  %v11675_v53 = vsel %vm1377_vm3, %v11559_v8, %v11652_v47  ;;  %v8928_v61 = vsel %vm2293_vm12, 1.0, %v11118_v56  ;;  %vm3153_vm8 = vcmask 130048   ;;  %s8532_s22 = sshll.u32 %s1190_s18, 4  ;;  %s8530_s11 = scalar_lea.hbm %s11276_s19, %s9119_s28  ;;  %s8533_s22 = int_to_ptr.vmem [resolvable:$true] %s8532_s22 }
 0x190   : > { %9461 = vmatpush3.msk.msra.mxu0 %vm1214_vm0, %v8892_v20  ;;  %9462 = vmatprep.mubr.msk.f32.mxu0 %vm1209_vm2, %v1560_v27  ;;  %vm4375_vm12 = vcmask 179200  }
 0x191   : > { %9468 = vmatmul.mubr.msk.f32.vlgmr.msra.gmra.mxu1 %vm1209_vm2, %v1654_v30  ;;  %9470 = vmatprep.subr.msk.mxu0 %vm1214_vm0, %v8900_v31  ;;  %p12515_p11 = scmp.ne.s32.totalorder %s12514_s23, 0 }
 0x192   : > { %9475 = vmatprep.subr.msk.mxu1 %vm1214_vm0, %v8904_v34  ;;  %9477 = vmatprep.mubr.msk.f32.mxu1 %vm1209_vm2, %v1836_v35 }
 0x193   : > { %9463 = vmatmul.mubr.msk.f32.vlgmr.msra.gmra.mxu0 %vm1209_vm2, %v1562_v37  ;;  %9476 = vmatpush3.msk.msra.mxu1 %vm1214_vm0, %v8904_v34 }
 0x194   : > { %9471 = vmatpush3.msk.msra.mxu0 %vm1214_vm0, %v8900_v31  ;;  %9472 = vmatprep.mubr.msk.f32.mxu0 %vm1209_vm2, %v1744_v39 }
 0x195   : > { %9478 = vmatmul.mubr.msk.f32.vlgmr.msra.gmra.mxu1 %vm1209_vm2, %v1838_v40  ;;  %9480 = vmatprep.subr.msk.mxu0 %vm1214_vm0, %v8908_v41 }
 0x196   : > { %9485 = vmatprep.subr.msk.mxu1 %vm1214_vm0, %v8912_v43  ;;  %9487 = vmatprep.mubr.msk.f32.mxu1 %vm1209_vm2, %v11643_v44 }
 0x197   : > { %9473 = vmatmul.mubr.msk.f32.vlgmr.msra.gmra.mxu0 %vm1209_vm2, %v1746_v46  ;;  %9486 = vmatpush3.msk.msra.mxu1 %vm1214_vm0, %v8912_v43 }
 0x198   : > { %9481 = vmatpush3.msk.msra.mxu0 %vm1214_vm0, %v8908_v41  ;;  %9482 = vmatprep.mubr.msk.f32.mxu0 %vm1209_vm2, %v11548_v3 }
 0x199   : > { %9490 = vmatprep.subr.msk.mxu0 %vm1214_vm0, %v8916_v48  ;;  %9488 = vmatmul.mubr.msk.f32.vlgmr.msra.gmra.mxu1 %vm1209_vm2, %v11622_v36 }
 0x19a   : > { %9495 = vmatprep.subr.msk.mxu1 %vm1214_vm0, %v8920_v51  ;;  %9497 = vmatprep.mubr.msk.f32.mxu1 %vm1209_vm2, %v2186_v52 }
 0x19b   : > { %9483 = vmatmul.mubr.msk.f32.vlgmr.msra.gmra.mxu0 %vm1209_vm2, %v11573_v15  ;;  %9496 = vmatpush3.msk.msra.mxu1 %vm1214_vm0, %v8920_v51 }
 0x19c   : > { %9491 = vmatpush3.msk.msra.mxu0 %vm1214_vm0, %v8916_v48  ;;  %9492 = vmatprep.mubr.msk.f32.mxu0 %vm1209_vm2, %v11675_v53 }
 0x19d   : > { %9500 = vmatprep.subr.mxu0 %v11573_v15  ;;  %9498 = vmatmul.mubr.msk.f32.vlgmr.msra.gmra.mxu1 %vm1209_vm2, %v2185_v45 }
 0x19e   : > { %9512 = vmatprep.subr.msk.mxu1 %vm1214_vm0, %v2402_v62 }
 0x19f   : > { %9493 = vmatmul.mubr.msk.f32.vlgmr.msra.gmra.mxu0 %vm1209_vm2, %v11652_v47  ;;  %9513 = vmatpush3.msk.msra.mxu1 %vm1214_vm0, %v2402_v62 }
 0x1a0   : > { %9501 = vmatpush3.msra.mxu0 %v11573_v15  ;;  %9506 = vmatprep.mubr.msk.f32.mxu0 %vm2302_vm9, %v8925_v57 }
 0x1a1   : > { %9502 = vmatprep.subr.mxu0 %v11548_v3  ;;  %9520 = vmatprep.subr.msk.mxu1 %vm1214_vm0, %v11719_v0 }
 0x1a2   : > { %9503 = vmatpush3.msra.mxu0 %v11548_v3 }
 0x1a3   : > { %9504 = vmatprep.subr.mxu0 %v11543_v2 }
 0x1a4   : > { %9505 = vmatpush3.msra.mxu0 %v11543_v2 }
 0x1a5   : > { %9507 = vmatmul.mubr.msk.f32.vlgmr.msra.gmra.mxu0 %vm2302_vm9, %v8926_v59  ;;  %9528 = vmatprep.subr.msk.mxu0 %vm1214_vm0, %v2607_v63 }
 0x1a6   : > { %9509 = vmatprep.mubr.msk.f32.mxu0 %vm2302_vm9, %v8927_v60  ;;  %9529 = vmatpush3.msk.msra.mxu0 %vm1214_vm0, %v2607_v63 }
 0x1a7   : > { %9544 = vmatprep.subr.msk.mxu0 %vm1214_vm0, %v11721_v1 }
 0x1a9   : > { %9510 = vmatmul.mubr.msk.f32.gmra.mxu0 %vm2302_vm9, %v8928_v61  ;;  %v8924_v61 = vld [vmem:[#allocation2] ss:$0 sm:$0xff] }
 0x249   : > { %v9449_v4 = vpop.f32.mrf.mxu1 }
 0x24b   : > { %v9444_v5 = vpop.f32.mrf.mxu0  ;;  %v1366_v6 = vpop.f32.mrf.mxu1 }
 0x24c   : > { %v1372_v9 = vadd.f32 %v9449_v4, %v9444_v5 }
 0x24d   : > { %v1284_v7 = vpop.f32.mrf.mxu0  ;;  %v9459_v8 = vpop.f32.mrf.mxu1 }
 0x24e   : > { %v1367_v12 = vadd.f32 %v1366_v6, %v1284_v7 }
 0x24f   : > { %v9454_v10 = vpop.f32.mrf.mxu0  ;;  %v1544_v11 = vpop.f32.mrf.mxu1 }
 0x250   : > { %v1464_v13 = vadd.f32 %v9454_v10, %v1372_v9 }
 0x251   : > { %v1454_v14 = vpop.f32.mrf.mxu0  ;;  %v9469_v18 = vpop.f32.mrf.mxu1 }
 0x252   : > { %v1463_v19 = vadd.f32 %v1454_v14, %v1367_v12  ;;  %v1554_v20 = vadd.f32 %v9459_v8, %v1464_v13 }
 0x253   : > { %v9464_v21 = vpop.f32.mrf.mxu0  ;;  %v1728_v22 = vpop.f32.mrf.mxu1 }
 0x254   : > { %v1553_v23 = vadd.f32 %v1544_v11, %v1463_v19  ;;  %v1646_v24 = vadd.f32 %v9464_v21, %v1554_v20 }
 0x255   : > { %v1636_v25 = vpop.f32.mrf.mxu0  ;;  %v9479_v26 = vpop.f32.mrf.mxu1 }
 0x256   : > { %v1645_v27 = vadd.f32 %v1636_v25, %v1553_v23  ;;  %v1738_v28 = vadd.f32 %v9469_v18, %v1646_v24 }
 0x257   : > { %v9474_v29 = vpop.f32.mrf.mxu0  ;;  %v1912_v30 = vpop.f32.mrf.mxu1 }
 0x258   : > { %v1737_v31 = vadd.f32 %v1728_v22, %v1645_v27  ;;  %v1830_v32 = vadd.f32 %v9474_v29, %v1738_v28 }
 0x259   : > { %v1820_v33 = vpop.f32.mrf.mxu0  ;;  %v9489_v34 = vpop.f32.mrf.mxu1 }
 0x25a   : > { %v1829_v35 = vadd.f32 %v1820_v33, %v1737_v31  ;;  %v1922_v40 = vadd.f32 %v9479_v26, %v1830_v32  ;;  %v2716_v31 = vld [vmem:[#allocation5 + $0xc] sm:$0xf] }
 0x25b   : > { %v9484_v37 = vpop.f32.mrf.mxu0  ;;  %v2084_v38 = vpop.f32.mrf.mxu1 }
 0x25c   : > { %v1921_v39 = vadd.f32 %v1912_v30, %v1829_v35  ;;  %v2006_v50 = vadd.f32 %v9484_v37, %v1922_v40 }
 0x25d   : > { %v1996_v41 = vpop.f32.mrf.mxu0  ;;  %v9499_v43 = vpop.f32.mrf.mxu1 }
 0x25e   : > { %v2005_v45 = vadd.f32 %v1996_v41, %v1921_v39  ;;  %v2094_v60 = vadd.f32 %v9489_v34, %v2006_v50 }
 0x25f   : > { %v9494_v46 = vpop.f32.mrf.mxu0  ;;  %v2260_v52 = vpop.f32.mrf.mxu1 }
 0x260   : > { %v2093_v48 = vadd.f32 %v2084_v38, %v2005_v45  ;;  %v2182_v10 = vadd.f32 %v9494_v46, %v2094_v60 }
 0x261   : > { %v2172_v51 = vpop.f32.mrf.mxu0 }
 0x262   : > { %v2181_v57 = vadd.f32 %v2172_v51, %v2093_v48  ;;  %v2270_v24 = vadd.f32 %v9499_v43, %v2182_v10  ;;  %v2934_v48 = vld [vmem:[#allocation5 + $0x14] sm:$0xf] }
 0x264   : > { %v2269_v59 = vadd.f32 %v2260_v52, %v2181_v57  ;;  %v11769_v33 = vadd.f32 %v8924_v61, %v2270_v24 }
 0x265   : > { %v11727_v62 = vpop.f32.mrf.mxu0 }
 0x266   : > { %v11729_v63 = vadd.f32 %v8924_v61, %v2269_v59  ;;  %v2408_v5 = vrot.slane %v11727_v62, 1  ;;  %v2609_v9 = vrot.slane %v11727_v62, 2  ;;  %v2827_v32 = vrot.slane %v11727_v62, 4 }
 0x267   : > { %v11731_v4 = vpop.f32.mrf.mxu0  ;;  %v11787_v39 = vmax.f32 %v11769_v33, 0.0  ;;  %v2936_v10 = vrot.slane %v11727_v62, 5 }
 0x268   : > { %v11735_v6 = vmax.f32 %v11729_v63, 0.0  ;;  %v2407_v7 = vrot.slane %v11731_v4, 1  ;;  %v2608_v8 = vrot.slane %v11731_v4, 2  ;;  %v2826_v29 = vrot.slane %v11731_v4, 4 }
 0x269   : > { %v11740_v11 = vpop.f32.mrf.mxu0  ;;  %v2717_v45 = vrot.slane %v11731_v4, 3  ;;  %v3700_v50 = vrot.slane %v11787_v39, 7  ;;  %v3937_v59 = vrot.slane %v11787_v39, 2 }
 0x26a   : > { %v2409_v12 = vsel %vm1205_vm1, %v2407_v7, %v2408_v5  ;;  %v2610_v13 = vsel %vm1377_vm3, %v2608_v8, %v2609_v9  ;;  %v3461_v14 = vrot.slane %v11735_v6, 4  ;;  %v3150_v18 = vrot.slane %v11735_v6, 1 }
 0x26b   : > { %v11746_v19 = vpop.f32.mrf.mxu0  ;;  %9514 = vmatprep.mubr.msk.f32.mxu1 %vm1209_vm2, %v2409_v12  ;;  %9530 = vmatprep.mubr.msk.f32.mxu0 %vm1209_vm2, %v2610_v13  ;;  %v2613_v21 = vrot.slane %v11740_v11, 2  ;;  %v2412_v23 = vrot.slane %v11740_v11, 1  ;;  %v3303_v30 = vrot.slane %v11735_v6, 2  ;;  %v2828_v35 = vsel %vm1214_vm0, %v2826_v29, %v2827_v32 }
 0x26c   : > { %v2611_v20 = vrot.slane %v11746_v19, 2  ;;  %3462 = vrot.lane.b32.xlu1 %v3461_v14, %s11119_s7  ;;  %3151 = vrot.lane.b32.xlu0 %v3150_v18, %s11119_s7  ;;  %v2410_v22 = vrot.slane %v11746_v19, 1  ;;  %v2829_v34 = vrot.slane %v11746_v19, 4  ;;  %v3382_v37 = vrot.slane %v11735_v6, 3  ;;  %v3145_v14 = vld [vmem:[#allocation8 + $0x8] sm:$0xff] }
 0x26d   : > { %v3619_v38 = vrot.slane %v11735_v6, 6  ;;  %v3540_v43 = vrot.slane %v11735_v6, 5  ;;  %v3699_v46 = vrot.slane %v11735_v6, 7  ;;  %v2720_v51 = vrot.slane %v11746_v19, 3 }
 0x26e   : > { %v2612_v25 = vsel %vm1377_vm3, %v2609_v9, %v2611_v20  ;;  %v2614_v26 = vsel %vm1377_vm3, %v2611_v20, %v2613_v21  ;;  %v2411_v27 = vsel %vm1205_vm1, %v2408_v5, %v2410_v22  ;;  %v2413_v28 = vsel %vm1205_vm1, %v2410_v22, %v2412_v23  ;;  %v3144_v20 = vld [vmem:[#allocation8] sm:$0xff] }
 0x26f   : > { %9531 = vmatmul.mubr.msk.f32.vlgmr.msra.gmra.mxu0 %vm1209_vm2, %v2612_v25  ;;  %9515 = vmatmul.mubr.msk.f32.vlgmr.msra.gmra.mxu1 %vm1209_vm2, %v2411_v27  ;;  %v2830_v40 = vsel %vm1214_vm0, %v2827_v32, %v2829_v34  ;;  %v3701_v57 = vsel %vm1833_vm6, %v3699_v46, %v3700_v50  ;;  %v2722_v60 = vrot.slane %v11740_v11, 3  ;;  %v4016_v5 = vrot.slane %v11787_v39, 3  ;;  %v3539_v27 = vld [vmem:[#allocation8 + $0x58] sm:$0xff]  ;;  %v4095_v46 = vld [vmem:[#allocation11] sm:$0xf] }
 0x270   : > { %9533 = vmatprep.mubr.msk.f32.mxu0 %vm1209_vm2, %v2614_v26  ;;  %9517 = vmatprep.mubr.msk.f32.mxu1 %vm1209_vm2, %v2413_v28  ;;  %v3858_v8 = vrot.slane %v11787_v39, 1  ;;  %v2935_v9 = vrot.slane %v11731_v4, 5  ;;  %v2938_v12 = vrot.slane %v11746_v19, 5  ;;  %v3380_v26 = vld [vmem:[#allocation8 + $0x30] sm:$0xff] }
 0x271   : > { %3226 = vrot.lane.b32.xlu1 %v11735_v6, %s11119_s7  ;;  %3304 = vrot.lane.b32.xlu0 %v3303_v30, %s11119_s7  ;;  %v2723_v7 = vsel %vm1467_vm4, %v2720_v51, %v2722_v60  ;;  %v3538_v30 = vld [vmem:[#allocation8 + $0x50] sm:$0xff] }
 0x272   : > { %9521 = vmatpush3.msk.msra.mxu1 %vm1214_vm0, %v11719_v0  ;;  %v2831_v0 = vrot.slane %v11740_v11, 4  ;;  %9545 = vmatpush3.msk.msra.mxu0 %vm1214_vm0, %v11721_v1  ;;  %v2718_v1 = vrot.slane %v11727_v62, 3  ;;  %v2937_v13 = vsel %vm1649_vm5, %v2935_v9, %v2936_v10  ;;  %v2939_v18 = vsel %vm1649_vm5, %v2936_v10, %v2938_v12 }
 0x273   : > { %9534 = vmatmul.mubr.msk.f32.gmra.mxu0 %vm1209_vm2, %v2613_v21  ;;  %9536 = vmatprep.subr.msk.mxu1 %vm1214_vm0, %v2716_v31 }
 0x274   : > { %9518 = vmatmul.mubr.msk.f32.gmra.mxu1 %vm1209_vm2, %v2412_v23  ;;  %9546 = vmatprep.mubr.msk.f32.mxu0 %vm1209_vm2, %v2828_v35  ;;  %v2832_v41 = vsel %vm1214_vm0, %v2829_v34, %v2831_v0  ;;  %v2719_v52 = vsel %vm1467_vm4, %v2717_v45, %v2718_v1  ;;  %v2721_v61 = vsel %vm1467_vm4, %v2718_v1, %v2720_v51  ;;  %v3381_v23 = vld [vmem:[#allocation8 + $0x38] sm:$0xff]  ;;  %v3696_v35 = vld [vmem:[#allocation8 + $0x70] sm:$0xff] }
 0x275   : > { %9522 = vmatprep.mubr.msk.f32.mxu1 %vm1209_vm2, %v11731_v4  ;;  %3383 = vrot.lane.b32.xlu1 %v3382_v37, %s11119_s7  ;;  %v2940_v4 = vrot.slane %v11740_v11, 5  ;;  %v3857_v37 = vld [vmem:[#allocation8 + $0x98] sm:$0xff]  ;;  %v4014_v45 = vld [vmem:[#allocation8 + $0xb0] sm:$0xff] }
 0x276   : > { %3620 = vrot.lane.b32.xlu0 %v3619_v38, %s11119_s7 }
 0x277   : > { %9547 = vmatmul.mubr.msk.f32.vlgmr.msra.gmra.mxu0 %vm1209_vm2, %v2830_v40  ;;  %v3856_v40 = vld [vmem:[#allocation8 + $0x90] sm:$0xff] }
 0x278   : > { %9523 = vmatmul.mubr.msk.f32.vlgmr.msra.gmra.mxu1 %vm1209_vm2, %v11727_v62  ;;  %9549 = vmatprep.mubr.msk.f32.mxu0 %vm1209_vm2, %v2832_v41  ;;  %v2941_v62 = vsel %vm1649_vm5, %v2938_v12, %v2940_v4  ;;  %v4015_v41 = vld [vmem:[#allocation8 + $0xb8] sm:$0xff] }
 0x279   : > { %9525 = vmatprep.mubr.msk.f32.mxu1 %vm1209_vm2, %v11746_v19  ;;  %3541 = vrot.lane.b32.xlu1 %v3540_v43, %s11119_s7 }
 0x27a   : > { %3780 = vrot.lane.b32.xlu0 %v11787_v39, %s11119_s7  ;;  %9537 = vmatpush3.msk.msra.mxu1 %vm1214_vm0, %v2716_v31  ;;  %v3697_v31 = vld [vmem:[#allocation8 + $0x78] sm:$0xff] }
 0x27b   : > { %9550 = vmatmul.mubr.msk.f32.gmra.mxu0 %vm1209_vm2, %v2831_v0  ;;  %9552 = vmatprep.subr.msk.mxu1 %vm1214_vm0, %v2934_v48 }
 0x27c   : > { %9526 = vmatmul.mubr.msk.f32.gmra.mxu1 %vm1209_vm2, %v11740_v11  ;;  %v3042_v11 = vmul.u32 2, %v11658_v49 }
 0x27d   : > { %9538 = vmatprep.mubr.msk.f32.mxu1 %vm1209_vm2, %v2719_v52  ;;  %3702 = vrot.lane.b32.xlu1 %v3701_v57, %s11119_s7 }
 0x27e   : > { %3938 = vrot.lane.b32.xlu0 %v3937_v59, %s11119_s7  ;;  %vm3044_vm15 = vcmp.eq.s32.totalorder %v11635_v42, %v3042_v11 }
 0x27f   : > { %v11850_v19 = vsel %vm3044_vm15, 1.0, %v11118_v56 }
 0x280   : > { %9539 = vmatmul.mubr.msk.f32.vlgmr.msra.gmra.mxu1 %vm1209_vm2, %v2721_v61  ;;  %9568 = vmatprep.mubr.msk.f32.mxu0 %vm3056_vm14, %v11850_v19 }
 0x281   : > { %9541 = vmatprep.mubr.msk.f32.mxu1 %vm1209_vm2, %v2723_v7  ;;  %4017 = vrot.lane.b32.xlu1 %v4016_v5, %s11119_s7 }
 0x282   : > { %3859 = vrot.lane.b32.xlu0 %v3858_v8, %s11119_s7  ;;  %9553 = vmatpush3.msk.msra.mxu1 %vm1214_vm0, %v2934_v48  ;;  %s10953_s7 = scalar_lea.vmem %s8533_s22, 16 }
 0x283   : > { %9578 = vmatprep.subr.mxu1 %v11118_v56  ;;  %p10954_p8 = scmp.ne.s32.totalorder %s8533_s22, %s10953_s7 }
 0x284   : > { %9542 = vmatmul.mubr.msk.f32.gmra.mxu1 %vm1209_vm2, %v2722_v60 }
 0x285   : > { %9554 = vmatprep.mubr.msk.f32.mxu1 %vm1209_vm2, %v2937_v13  ;;  %p10955_p0 = pnand %p10954_p8, %p12515_p11 }
 0x287   : > { %p10956_p1 = pneg %p10955_p0 }
 0x288   : > { %9555 = vmatmul.mubr.msk.f32.vlgmr.msra.gmra.mxu1 %vm1209_vm2, %v2939_v18 }
 0x289   : > { %9557 = vmatprep.mubr.msk.f32.mxu1 %vm1209_vm2, %v2941_v62  ;;  %9579 = vmatpush3.msra.mxu1 %v3145_v14 }
 0x28a   : > { %9580 = vmatprep.subr.mxu1 %v11118_v56 }
 0x28b   : > { %9581 = vmatpush3.msra.mxu1 %v3144_v20 }
 0x28c   : > { %9558 = vmatmul.mubr.msk.f32.gmra.mxu1 %vm1209_vm2, %v2940_v4  ;;  %9592 = vmatprep.subr.mxu1 %v11118_v56 }
 0x28d   : > { %9582 = vmatprep.mubr.msk.f32.mxu1 %vm11120_vm13, %v11118_v56 }
 0x2de   : > { %v11854_v21 = vpop.permute.xlu1 %3462  ;;  %v11856_v22 = vpop.permute.xlu0 %3151 }
 0x2e3   : > { %v3227_v24 = vpop.permute.xlu1 %3226  ;;  %v11858_v25 = vpop.permute.xlu0 %3304 }
 0x2e4   : > { %9583 = vmatmul.mubr.msk.f32.vlgmr.msra.gmra.mxu1 %vm3153_vm8, %v3227_v24 }
 0x2e5   : > { %9593 = vmatpush3.msra.mxu1 %v3381_v23  ;;  %9596 = vmatprep.mubr.msk.f32.mxu1 %vm11120_vm13, %v11118_v56 }
 0x2e6   : > { %9594 = vmatprep.subr.mxu1 %v11118_v56 }
 0x2e7   : > { %9595 = vmatpush3.msra.mxu1 %v3380_v26  ;;  %v3384_v28 = vpop.permute.xlu1 %3383 }
 0x2e8   : > { %v11864_v29 = vpop.permute.xlu0 %3620  ;;  %9597 = vmatmul.mubr.msk.f32.vlgmr.msra.gmra.mxu1 %vm3153_vm8, %v3384_v28  ;;  %9606 = vmatprep.subr.mxu1 %v11118_v56 }
 0x2e9   : > { %9607 = vmatpush3.msra.mxu1 %v3539_v27  ;;  %9610 = vmatprep.mubr.msk.f32.mxu1 %vm11120_vm13, %v11118_v56 }
 0x2ea   : > { %9608 = vmatprep.subr.mxu1 %v11118_v56 }
 0x2eb   : > { %9609 = vmatpush3.msra.mxu1 %v3538_v30  ;;  %v3542_v32 = vpop.permute.xlu1 %3541 }
 0x2ec   : > { %v11871_v34 = vpop.permute.xlu0 %3780  ;;  %9611 = vmatmul.mubr.msk.f32.vlgmr.msra.gmra.mxu1 %vm3153_vm8, %v3542_v32  ;;  %9620 = vmatprep.subr.mxu1 %v11118_v56 }
 0x2ed   : > { %9621 = vmatpush3.msra.mxu1 %v3697_v31  ;;  %9624 = vmatprep.mubr.msk.f32.mxu1 %vm11120_vm13, %v11118_v56 }
 0x2ee   : > { %9622 = vmatprep.subr.mxu1 %v11118_v56 }
 0x2ef   : > { %9623 = vmatpush3.msra.mxu1 %v3696_v35  ;;  %v3703_v38 = vpop.permute.xlu1 %3702 }
 0x2f0   : > { %v11878_v0 = vpop.permute.xlu0 %3938  ;;  %9625 = vmatmul.mubr.msk.f32.vlgmr.msra.gmra.mxu1 %vm3153_vm8, %v3703_v38  ;;  %9634 = vmatprep.subr.mxu1 %v11118_v56 }
 0x2f1   : > { %9635 = vmatpush3.msra.mxu1 %v3857_v37  ;;  %9638 = vmatprep.mubr.msk.f32.mxu1 %vm11120_vm13, %v11118_v56 }
 0x2f2   : > { %9636 = vmatprep.subr.mxu1 %v11118_v56 }
 0x2f3   : > { %9637 = vmatpush3.msra.mxu1 %v3856_v40  ;;  %v4018_v48 = vpop.permute.xlu1 %4017 }
 0x2f4   : > { %v3860_v43 = vpop.permute.xlu0 %3859  ;;  %9648 = vmatprep.subr.mxu1 %v11118_v56 }
 0x2f5   : > { %9639 = vmatmul.mubr.msk.f32.vlgmr.msra.gmra.mxu1 %vm3153_vm8, %v3860_v43 }
 0x2f6   : > { %9649 = vmatpush3.msra.mxu1 %v4015_v41  ;;  %9652 = vmatprep.mubr.msk.f32.mxu1 %vm11120_vm13, %v11118_v56 }
 0x2f7   : > { %9650 = vmatprep.subr.mxu1 %v11118_v56 }
 0x2f8   : > { %9651 = vmatpush3.msra.mxu1 %v4014_v45  ;;  %v3043_v45 = vmul.u32 2, %v11684_v54 }
 0x2f9   : > { %9653 = vmatmul.mubr.msk.f32.vlgmr.msra.gmra.mxu1 %vm3153_vm8, %v4018_v48  ;;  %9666 = vmatprep.subr.mxu1 %v11118_v56 }
 0x2fa   : > { %9667 = vmatpush3.msk.msra.mxu1 %vm1214_vm0, %v4095_v46  ;;  %9668 = vmatprep.mubr.msk.f32.mxu1 %vm11120_vm13, %v11118_v56  ;;  %vm3045_vm10 = vcmp.eq.s32.totalorder %v11635_v42, %v3043_v45 }
 0x2fb   : > { %9688 = vmatprep.subr.mxu1 %v11118_v56 }
 0x2fd   : > { %9669 = vmatmul.mubr.msk.f32.vlgmr.msra.gmra.mxu1 %vm1209_vm2, %v11543_v2 }
 0x2fe   : > { %9671 = vmatprep.mubr.msk.f32.mxu1 %vm11120_vm13, %v11118_v56 }
 0x301   : > { %9672 = vmatmul.mubr.msk.f32.gmra.mxu1 %vm1209_vm2, %v11548_v3 }
 0x302   : > { %9674 = vmatprep.mubr.msk.f32.mxu1 %vm11120_vm13, %v11118_v56 }
 0x305   : > { %9675 = vmatmul.mubr.msk.f32.gmra.mxu1 %vm1209_vm2, %v11573_v15 }
 0x306   : > { %9694 = vmatprep.mubr.msk.f32.mxu1 %vm11120_vm13, %v11118_v56 }
 0x32f   : > { %v9516_v1 = vpop.f32.mrf.mxu1  ;;  %v9532_v50 = vpop.f32.mrf.mxu0 }
 0x331   : > { %v2491_v51 = vpop.f32.mrf.mxu1  ;;  %v2692_v52 = vpop.f32.mrf.mxu0 }
 0x333   : > { %v9535_v59 = vpop.f32.mrf.mxu0 }
 0x334   : > { %v9519_v2 = vpop.f32.mrf.mxu1 }
 0x335   : > { %v2702_v5 = vpop.f32.mrf.mxu0 }
 0x336   : > { %v2501_v57 = vpop.f32.mrf.mxu1 }
 0x337   : > { %v9548_v8 = vpop.f32.mrf.mxu0 }
 0x338   : > { %v9524_v60 = vpop.f32.mrf.mxu1 }
 0x339   : > { %v2910_v13 = vpop.f32.mrf.mxu0  ;;  %v2593_v14 = vadd.f32 %v9524_v60, %v9516_v1  ;;  %v3302_v60 = vld [vmem:[#allocation8 + $0x28] sm:$0xff] }
 0x33a   : > { %v2587_v61 = vpop.f32.mrf.mxu1 }
 0x33b   : > { %v2588_v20 = vadd.f32 %v2587_v61, %v2491_v51  ;;  %v9551_v24 = vpop.f32.mrf.mxu0  ;;  %v2712_v27 = vadd.f32 %v9532_v50, %v2593_v14  ;;  %v3301_v61 = vld [vmem:[#allocation8 + $0x20] sm:$0xff] }
 0x33c   : > { %v9527_v3 = vpop.f32.mrf.mxu1 }
 0x33d   : > { %v2603_v10 = vadd.f32 %v9527_v3, %v9519_v2  ;;  %v2711_v32 = vadd.f32 %v2692_v52, %v2588_v20  ;;  %v2920_v37 = vpop.f32.mrf.mxu0  ;;  %v11913_v2 = vsel %vm3045_vm10, 1.0, %v11118_v56  ;;  %v3459_v3 = vld [vmem:[#allocation8 + $0x40] sm:$0xff] }
 0x33e   : > { %v2597_v7 = vpop.f32.mrf.mxu1 }
 0x33f   : > { %v2598_v15 = vadd.f32 %v2597_v7, %v2501_v57  ;;  %v2714_v18 = vadd.f32 %v9535_v59, %v2603_v10  ;;  %v3148_v57 = vld [vmem:[#allocation8 + $0x18] sm:$0xff]  ;;  %v3147_v59 = vld [vmem:[#allocation8 + $0x10] sm:$0xff]  ;;  %v3617_v7 = vld [vmem:[#allocation8 + $0x60] sm:$0xff] }
 0x340   : > { %v9540_v9 = vpop.f32.mrf.mxu1 }
 0x341   : > { %v2713_v23 = vadd.f32 %v2702_v5, %v2598_v15  ;;  %v2821_v31 = vadd.f32 %v9540_v9, %v2712_v27  ;;  %v3460_v5 = vld [vmem:[#allocation8 + $0x48] sm:$0xff]  ;;  %v3935_v9 = vld [vmem:[#allocation8 + $0xa0] sm:$0xff] }
 0x342   : > { %v2801_v12 = vpop.f32.mrf.mxu1 }
 0x343   : > { %v2820_v40 = vadd.f32 %v2801_v12, %v2711_v32  ;;  %v2930_v48 = vadd.f32 %v9548_v8, %v2821_v31  ;;  %v3778_v8 = vld [vmem:[#allocation8 + $0x80] sm:$0xff] }
 0x344   : > { %v9543_v4 = vpop.f32.mrf.mxu1 }
 0x345   : > { %v2823_v11 = vadd.f32 %v9543_v4, %v2714_v18  ;;  %v2929_v51 = vadd.f32 %v2910_v13, %v2820_v40 }
 0x346   : > { %v2811_v62 = vpop.f32.mrf.mxu1 }
 0x347   : > { %v2822_v28 = vadd.f32 %v2811_v62, %v2713_v23  ;;  %v2932_v35 = vadd.f32 %v9551_v24, %v2823_v11 }
 0x348   : > { %v9556_v26 = vpop.f32.mrf.mxu1 }
 0x349   : > { %v2931_v43 = vadd.f32 %v2920_v37, %v2822_v28  ;;  %v3039_v50 = vadd.f32 %v9556_v26, %v2930_v48 }
 0x34a   : > { %v3019_v30 = vpop.f32.mrf.mxu1 }
 0x34b   : > { %v3038_v52 = vadd.f32 %v3019_v30, %v2929_v51 }
 0x34c   : > { %v9559_v38 = vpop.f32.mrf.mxu1 }
 0x34d   : > { %v3041_v41 = vadd.f32 %v9559_v38, %v2932_v35 }
 0x34e   : > { %v3029_v46 = vpop.f32.mrf.mxu1 }
 0x34f   : > { %v3040_v1 = vadd.f32 %v3029_v46, %v2931_v43  ;;  %9560 = vmatprep.subr.msk.mxu0 %vm1833_vm6, %v3041_v41 }
 0x350   : > { %9561 = vmatpush3.msk.msra.mxu0 %vm1833_vm6, %v3041_v41 }
 0x351   : > { %9562 = vmatprep.subr.mxu0 %v3040_v1 }
 0x352   : > { %9563 = vmatpush3.msra.mxu0 %v3040_v1 }
 0x353   : > { %9564 = vmatprep.subr.mxu0 %v3039_v50 }
 0x354   : > { %9565 = vmatpush3.msra.mxu0 %v3039_v50 }
 0x355   : > { %9566 = vmatprep.subr.mxu0 %v3038_v52 }
 0x356   : > { %9567 = vmatpush3.msra.mxu0 %v3038_v52 }
 0x357   : > { %9569 = vmatmul.mubr.msk.f32.vlgmr.msra.gmra.mxu0 %vm3056_vm14, %v11913_v2  ;;  %9571 = vmatprep.subr.mxu0 %v11118_v56 }
 0x358   : > { %9572 = vmatpush3.msra.mxu0 %v3148_v57  ;;  %9575 = vmatprep.mubr.msk.f32.mxu0 %vm11120_vm13, %v11118_v56 }
 0x359   : > { %9573 = vmatprep.subr.mxu0 %v11118_v56 }
 0x35a   : > { %9574 = vmatpush3.msra.mxu0 %v3147_v59 }
 0x35b   : > { %9576 = vmatmul.mubr.msk.f32.vlgmr.msra.gmra.mxu0 %vm3153_vm8, %v11856_v22  ;;  %9585 = vmatprep.subr.mxu0 %v11118_v56  ;;  %v3618_v22 = vld [vmem:[#allocation8 + $0x68] sm:$0xff] }
 0x35c   : > { %9586 = vmatpush3.msra.mxu0 %v3302_v60  ;;  %9589 = vmatprep.mubr.msk.f32.mxu0 %vm11120_vm13, %v11118_v56 }
 0x35d   : > { %9587 = vmatprep.subr.mxu0 %v11118_v56 }
 0x35e   : > { %9588 = vmatpush3.msra.mxu0 %v3301_v61 }
 0x35f   : > { %9590 = vmatmul.mubr.msk.f32.vlgmr.msra.gmra.mxu0 %vm3153_vm8, %v11858_v25  ;;  %9599 = vmatprep.subr.mxu0 %v11118_v56  ;;  %v3779_v25 = vld [vmem:[#allocation8 + $0x88] sm:$0xff] }
 0x360   : > { %9600 = vmatpush3.msra.mxu0 %v3460_v5  ;;  %9603 = vmatprep.mubr.msk.f32.mxu0 %vm11120_vm13, %v11118_v56 }
 0x361   : > { %9601 = vmatprep.subr.mxu0 %v11118_v56 }
 0x362   : > { %9602 = vmatpush3.msra.mxu0 %v3459_v3 }
 0x363   : > { %9604 = vmatmul.mubr.msk.f32.vlgmr.msra.gmra.mxu0 %vm3153_vm8, %v11854_v21  ;;  %9613 = vmatprep.subr.mxu0 %v11118_v56  ;;  %v3936_v21 = vld [vmem:[#allocation8 + $0xa8] sm:$0xff] }
 0x364   : > { %9614 = vmatpush3.msra.mxu0 %v3618_v22  ;;  %9617 = vmatprep.mubr.msk.f32.mxu0 %vm11120_vm13, %v11118_v56 }
 0x365   : > { %9615 = vmatprep.subr.mxu0 %v11118_v56 }
 0x366   : > { %9616 = vmatpush3.msra.mxu0 %v3617_v7 }
 0x367   : > { %9618 = vmatmul.mubr.msk.f32.vlgmr.msra.gmra.mxu0 %vm3153_vm8, %v11864_v29  ;;  %9627 = vmatprep.subr.mxu0 %v11118_v56  ;;  %v4097_v29 = vld [vmem:[#allocation11 + $0x4] sm:$0xf] }
 0x368   : > { %9628 = vmatpush3.msra.mxu0 %v3779_v25  ;;  %9631 = vmatprep.mubr.msk.f32.mxu0 %vm11120_vm13, %v11118_v56 }
 0x369   : > { %9629 = vmatprep.subr.mxu0 %v11118_v56 }
 0x36a   : > { %9630 = vmatpush3.msra.mxu0 %v3778_v8 }
 0x36b   : > { %9632 = vmatmul.mubr.msk.f32.vlgmr.msra.gmra.mxu0 %vm3153_vm8, %v11871_v34  ;;  %9641 = vmatprep.subr.mxu0 %v11118_v56  ;;  %v4265_v34 = vld [vmem:[#allocation11 + $0x8] sm:$0xf] }
 0x36c   : > { %9642 = vmatpush3.msra.mxu0 %v3936_v21  ;;  %9645 = vmatprep.mubr.msk.f32.mxu0 %vm11120_vm13, %v11118_v56 }
 0x36d   : > { %9643 = vmatprep.subr.mxu0 %v11118_v56 }
 0x36e   : > { %9644 = vmatpush3.msra.mxu0 %v3935_v9  ;;  %v8993_v9 = vld [vmem:[#allocation13] ss:$0 sm:$0xff] }
 0x36f   : > { %9646 = vmatmul.mubr.msk.f32.vlgmr.msra.gmra.mxu0 %vm3153_vm8, %v11878_v0  ;;  %9655 = vmatprep.subr.mxu0 %v11118_v56 }
 0x370   : > { %9656 = vmatpush3.msk.msra.mxu0 %vm1214_vm0, %v4097_v29  ;;  %9657 = vmatprep.mubr.msk.f32.mxu0 %vm11120_vm13, %v11118_v56 }
 0x371   : > { %9677 = vmatprep.subr.mxu0 %v11118_v56 }
 0x373   : > { %9658 = vmatmul.mubr.msk.f32.vlgmr.msra.gmra.mxu0 %vm1209_vm2, %v11577_v16 }
 0x374   : > { %9660 = vmatprep.mubr.msk.f32.mxu0 %vm11120_vm13, %v11118_v56  ;;  %9678 = vmatpush3.msk.msra.mxu0 %vm1214_vm0, %v4265_v34 }
 0x377   : > { %9661 = vmatmul.mubr.msk.f32.gmra.mxu0 %vm1209_vm2, %v11643_v44 }
 0x378   : > { %9663 = vmatprep.mubr.msk.f32.mxu0 %vm11120_vm13, %v11118_v56 }
 0x37b   : > { %9664 = vmatmul.mubr.msk.f32.gmra.mxu0 %vm1209_vm2, %v11622_v36 }
 0x37c   : > { %9679 = vmatprep.mubr.msk.f32.mxu0 %vm11120_vm13, %v11118_v56 }
 0x37f   : > { %9680 = vmatmul.mubr.msk.f32.vlgmr.msra.gmra.mxu0 %vm1209_vm2, %v11583_v17 }
 0x380   : > { %9682 = vmatprep.mubr.msk.f32.mxu0 %vm11120_vm13, %v11118_v56 }
 0x383   : > { %9683 = vmatmul.mubr.msk.f32.gmra.mxu0 %vm1209_vm2, %v11675_v53 }
 0x384   : > { %9685 = vmatprep.mubr.msk.f32.mxu0 %vm11120_vm13, %v11118_v56 }
 0x387   : > { %9686 = vmatmul.mubr.msk.f32.gmra.mxu0 %vm1209_vm2, %v11652_v47 }
 0x3a4   : > { %v3296_v16 = vpop.f32.mrf.mxu1 }
 0x3a6   : > { %v9584_v36 = vpop.f32.mrf.mxu1 }
 0x3a8   : > { %v3453_v44 = vpop.f32.mrf.mxu1 }
 0x3aa   : > { %v9598_v0 = vpop.f32.mrf.mxu1 }
 0x3ac   : > { %v3611_v10 = vpop.f32.mrf.mxu1 }
 0x3ae   : > { %v9612_v12 = vpop.f32.mrf.mxu1 }
 0x3b0   : > { %v3772_v15 = vpop.f32.mrf.mxu1 }
 0x3b2   : > { %v9626_v17 = vpop.f32.mrf.mxu1 }
 0x3b5   : > { %v3929_v13 = vpop.f32.mrf.mxu1 }
 0x3b7   : > { %v9640_v4 = vpop.f32.mrf.mxu1 }
 0x3b9   : > { %v11981_v14 = vpop.f32.mrf.mxu1 }
 0x3bb   : > { %v9654_v18 = vpop.f32.mrf.mxu1 }
 0x3bd   : > { %v4250_v53 = vpop.f32.mrf.mxu1 }
 0x3bf   : > { %v9670_v62 = vpop.f32.mrf.mxu1 }
 0x3c1   : > { %v4255_v20 = vpop.f32.mrf.mxu1 }
 0x3c3   : > { %v9673_v11 = vpop.f32.mrf.mxu1 }
 0x3c5   : > { %v4260_v23 = vpop.f32.mrf.mxu1 }
 0x3c7   : > { %v9676_v24 = vpop.f32.mrf.mxu1 }
 0x417   : > { %v11983_v47 = vpop.f32.mrf.mxu0 }
 0x419   : > { %v11985_v26 = vpop.f32.mrf.mxu0 }
 0x41b   : > { %v3222_v27 = vpop.f32.mrf.mxu0 }
 0x41c   : > { %v3297_v30 = vadd.f32 %v3296_v16, %v3222_v27 }
 0x41d   : > { %v9577_v28 = vpop.f32.mrf.mxu0 }
 0x41f   : > { %v3374_v31 = vpop.f32.mrf.mxu0 }
 0x420   : > { %v3378_v32 = vadd.f32 %v3374_v31, %v3297_v30 }
 0x421   : > { %v9591_v35 = vpop.f32.mrf.mxu0 }
 0x422   : > { %v3457_v37 = vadd.f32 %v3453_v44, %v3378_v32 }
 0x423   : > { %v3532_v38 = vpop.f32.mrf.mxu0 }
 0x424   : > { %v3536_v40 = vadd.f32 %v3532_v38, %v3457_v37 }
 0x425   : > { %v9605_v41 = vpop.f32.mrf.mxu0 }
 0x426   : > { %v3615_v43 = vadd.f32 %v3611_v10, %v3536_v40 }
 0x427   : > { %v3690_v45 = vpop.f32.mrf.mxu0 }
 0x428   : > { %v3694_v46 = vadd.f32 %v3690_v45, %v3615_v43 }
 0x429   : > { %v9619_v48 = vpop.f32.mrf.mxu0 }
 0x42a   : > { %v3776_v1 = vadd.f32 %v3772_v15, %v3694_v46  ;;  %v4469_v46 = vld [vmem:[#allocation14 + $0x8] sm:$0xff]  ;;  %v4468_v48 = vld [vmem:[#allocation14] sm:$0xff] }
 0x42b   : > { %v3850_v50 = vpop.f32.mrf.mxu0 }
 0x42c   : > { %v3854_v51 = vadd.f32 %v3850_v50, %v3776_v1  ;;  %v4472_v1 = vld [vmem:[#allocation14 + $0x18] sm:$0xff] }
 0x42d   : > { %v9633_v52 = vpop.f32.mrf.mxu0  ;;  %9703 = vmatprep.subr.mxu0 %v4472_v1  ;;  %v4725_v50 = vld [vmem:[#allocation14 + $0x38] sm:$0xff] }
 0x42e   : > { %v3933_v57 = vadd.f32 %v3929_v13, %v3854_v51  ;;  %9704 = vmatpush3.msra.mxu0 %v4472_v1  ;;  %v4471_v51 = vld [vmem:[#allocation14 + $0x10] sm:$0xff]  ;;  %v4638_v52 = vld [vmem:[#allocation14 + $0x28] sm:$0xff] }
 0x42f   : > { %v4008_v59 = vpop.f32.mrf.mxu0  ;;  %9705 = vmatprep.subr.mxu0 %v4471_v51 }
 0x430   : > { %v11987_v60 = vadd.f32 %v4008_v59, %v3933_v57  ;;  %9706 = vmatpush3.msra.mxu0 %v4471_v51 }
 0x431   : > { %v9647_v61 = vpop.f32.mrf.mxu0  ;;  %9717 = vmatprep.subr.mxu0 %v4638_v52 }
 0x433   : > { %v4167_v5 = vpop.f32.mrf.mxu0 }
 0x434   : > { %v4251_v21 = vadd.f32 %v4250_v53, %v4167_v5  ;;  %v11990_v53 = vadd.s32 1, %v11635_v42  ;;  %v4724_v5 = vld [vmem:[#allocation14 + $0x30] sm:$0xff] }
 0x435   : > { %v9659_v3 = vpop.f32.mrf.mxu0 }
 0x436   : > { %vm4366_vm11 = vcmp.eq.s32.totalorder %v11658_v49, %v11990_v53  ;;  %vm4367_vm15 = vcmp.eq.s32.totalorder %v11684_v54, %v11990_v53  ;;  %vm4368_vm10 = vcmp.eq.s32.totalorder %v11690_v55, %v11990_v53 }
 0x437   : > { %v4172_v22 = vpop.f32.mrf.mxu0  ;;  %v12002_v35 = vsel %vm4366_vm11, 1.0, %v11118_v56  ;;  %v12013_v41 = vsel %vm4367_vm15, 1.0, %v11118_v56  ;;  %v12025_v45 = vsel %vm4368_vm10, 1.0, %v11118_v56  ;;  %vm6465_vm11 = vcmp.eq.s32.totalorder %v11699_v58, %v11990_v53 }
 0x438   : > { %v4256_v36 = vadd.f32 %v4255_v20, %v4172_v22 }
 0x439   : > { %v9662_v7 = vpop.f32.mrf.mxu0 }
 0x43b   : > { %v4177_v25 = vpop.f32.mrf.mxu0 }
 0x43c   : > { %v4261_v15 = vadd.f32 %v4260_v23, %v4177_v25 }
 0x43d   : > { %v9665_v8 = vpop.f32.mrf.mxu0 }
 0x43f   : > { %v4335_v29 = vpop.f32.mrf.mxu0 }
 0x440   : > { %v4349_v34 = vadd.f32 %v4335_v29, %v4251_v21 }
 0x441   : > { %v9681_v16 = vpop.f32.mrf.mxu0 }
 0x442   : > { %v4358_v44 = vadd.f32 %v8993_v9, %v4349_v34  ;;  %v4902_v34 = vld [vmem:[#allocation14 + $0x58] sm:$0xff] }
 0x443   : > { %v4340_v0 = vpop.f32.mrf.mxu0 }
 0x444   : > { %v4350_v10 = vadd.f32 %v4340_v0, %v4256_v36  ;;  %v4361_v17 = vmax.f32 %v4358_v44, 0.0 }
 0x445   : > { %v9684_v12 = vpop.f32.mrf.mxu0 }
 0x446   : > { %v4359_v13 = vadd.f32 %v8993_v9, %v4350_v10  ;;  %v5525_v27 = vrot.slane %v4361_v17, 1  ;;  %v5717_v37 = vrot.slane %v4361_v17, 2 }
 0x447   : > { %v4345_v4 = vpop.f32.mrf.mxu0 }
 0x448   : > { %v4362_v18 = vmax.f32 %v4359_v13, 0.0  ;;  %v4351_v62 = vadd.f32 %v4345_v4, %v4261_v15  ;;  %v4637_v15 = vld [vmem:[#allocation14 + $0x20] sm:$0xff] }
 0x449   : > { %v9687_v11 = vpop.f32.mrf.mxu0 }
 0x44a   : > { %v4360_v24 = vadd.f32 %v8993_v9, %v4351_v62  ;;  %v5526_v28 = vrot.slane %v4362_v18, 1  ;;  %v5718_v32 = vrot.slane %v4362_v18, 2 }
 0x44c   : > { %v4363_v30 = vmax.f32 %v4360_v24, 0.0  ;;  %v5527_v20 = vsel %vm1205_vm1, %v5525_v27, %v5526_v28  ;;  %v5719_v38 = vsel %vm1377_vm3, %v5717_v37, %v5718_v32  ;;  %v5080_v24 = vld [vmem:[#allocation14 + $0x78] sm:$0xff] }
 0x44d   : > { %5530 = vrot.lane.b32.xlu0 %v5527_v20, %s11121_s17 }
 0x44e   : > { %9689 = vmatpush3.msk.msra.mxu1 %vm1377_vm3, %v4363_v30  ;;  %v5528_v23 = vrot.slane %v4363_v30, 1  ;;  %v5720_v40 = vrot.slane %v4363_v30, 2 }
 0x44f   : > { %9690 = vmatprep.subr.mxu1 %v11118_v56 }
 0x450   : > { %9691 = vmatpush3.msra.mxu1 %v4362_v18  ;;  %v5529_v31 = vsel %vm1205_vm1, %v5526_v28, %v5528_v23  ;;  %v5721_v43 = vsel %vm1377_vm3, %v5718_v32, %v5720_v40 }
 0x451   : > { %5534 = vrot.lane.b32.xlu0 %v5528_v23, %s11121_s17  ;;  %5532 = vrot.lane.b32.xlu1 %v5529_v31, %s11121_s17  ;;  %v4811_v23 = vld [vmem:[#allocation14 + $0x40] sm:$0xff]  ;;  %v5079_v31 = vld [vmem:[#allocation14 + $0x70] sm:$0xff] }
 0x452   : > { %9692 = vmatprep.subr.mxu1 %v11118_v56 }
 0x453   : > { %9693 = vmatpush3.msra.mxu1 %v4361_v17 }
 0x454   : > { %9695 = vmatmul.mubr.msk.f32.vlgmr.msra.gmra.mxu1 %vm4375_vm12, %v12002_v35  ;;  %9710 = vmatprep.subr.mxu1 %v4469_v46 }
 0x455   : > { %5722 = vrot.lane.b32.xlu0 %v5719_v38, %s11121_s17  ;;  %5622 = vrot.lane.b32.xlu1 %v4361_v17, %s11121_s17  ;;  %v4901_v17 = vld [vmem:[#allocation14 + $0x50] sm:$0xff] }
 0x456   : > { %9697 = vmatprep.mubr.msk.f32.mxu1 %vm11120_vm13, %v11118_v56  ;;  %9711 = vmatpush3.msra.mxu1 %v4469_v46  ;;  %v5251_v46 = vld [vmem:[#allocation14 + $0x98] sm:$0xff] }
 0x457   : > { %9712 = vmatprep.subr.mxu1 %v4468_v48 }
 0x458   : > { %9698 = vmatmul.mubr.msk.f32.gmra.mxu1 %vm4375_vm12, %v12013_v41 }
 0x459   : > { %5724 = vrot.lane.b32.xlu0 %v5721_v43, %s11121_s17  ;;  %5624 = vrot.lane.b32.xlu1 %v4362_v18, %s11121_s17  ;;  %v4812_v18 = vld [vmem:[#allocation14 + $0x48] sm:$0xff] }
 0x45a   : > { %9700 = vmatprep.mubr.msk.f32.mxu1 %vm11120_vm13, %v11118_v56  ;;  %9713 = vmatpush3.msra.mxu1 %v4468_v48 }
 0x45b   : > { %9724 = vmatprep.subr.mxu1 %v4725_v50 }
 0x45c   : > { %9701 = vmatmul.mubr.msk.f32.gmra.mxu1 %vm4375_vm12, %v12025_v45 }
 0x45d   : > { %5726 = vrot.lane.b32.xlu0 %v5720_v40, %s11121_s17  ;;  %5626 = vrot.lane.b32.xlu1 %v4363_v30, %s11121_s17  ;;  %v4991_v40 = vld [vmem:[#allocation14 + $0x68] sm:$0xff] }
 0x514   : > { %v12033_v57 = vpop.f32.mrf.mxu1 }
 0x515   : > { %9714 = vmatprep.mubr.msk.f32.mxu1 %vm3153_vm8, %v12033_v57  ;;  %v4475_v3 = vrot.slane %v12033_v57, 1  ;;  %v4726_v7 = vrot.slane %v12033_v57, 3  ;;  %v4639_v44 = vrot.slane %v12033_v57, 2  ;;  %v4903_v0 = vrot.slane %v12033_v57, 5 }
 0x516   : > { %v9696_v59 = vpop.f32.mrf.mxu1  ;;  %v4814_v28 = vrot.slane %v12033_v57, 4  ;;  %v5081_v30 = vrot.slane %v12033_v57, 7 }
 0x517   : > { %v4990_v59 = vld [vmem:[#allocation14 + $0x60] sm:$0xff] }
 0x518   : > { %v12037_v61 = vpop.f32.mrf.mxu1 }
 0x519   : > { %9715 = vmatmul.mubr.msk.f32.vlgmr.msra.gmra.mxu1 %vm3153_vm8, %v12037_v61  ;;  %v12043_v22 = vrot.slane %v12037_v61, 1  ;;  %v12047_v25 = vrot.slane %v12037_v61, 3  ;;  %v12050_v21 = vrot.slane %v12037_v61, 2  ;;  %v4904_v16 = vrot.slane %v12037_v61, 5 }
 0x51a   : > { %v9699_v8 = vpop.f32.mrf.mxu1  ;;  %9725 = vmatpush3.msra.mxu1 %v4725_v50  ;;  %v4815_v62 = vrot.slane %v12037_v61, 4  ;;  %v5082_v27 = vrot.slane %v12037_v61, 7  ;;  %v4993_v43 = vrot.slane %v12037_v61, 6  ;;  %v4992_v50 = vrot.slane %v12033_v57, 6 }
 0x51b   : > { %9726 = vmatprep.subr.mxu1 %v4724_v5  ;;  %v4477_v9 = vsel %vm1205_vm1, %v4475_v3, %v12043_v22  ;;  %v4728_v29 = vsel %vm1467_vm4, %v4726_v7, %v12047_v25  ;;  %v4641_v12 = vsel %vm1377_vm3, %v4639_v44, %v12050_v21  ;;  %v4905_v4 = vsel %vm1649_vm5, %v4903_v0, %v4904_v16  ;;  %v5169_v7 = vld [vmem:[#allocation14 + $0x88] sm:$0xff]  ;;  %v5423_v8 = vld [vmem:[#allocation14 + $0xb8] sm:$0xff] }
 0x51c   : > { %v12057_v36 = vpop.f32.mrf.mxu1  ;;  %9707 = vmatprep.mubr.msk.f32.mxu0 %vm3153_vm8, %v4477_v9  ;;  %9727 = vmatpush3.msra.mxu1 %v4724_v5  ;;  %v4816_v20 = vsel %vm1214_vm0, %v4814_v28, %v4815_v62  ;;  %v5083_v37 = vsel %vm1833_vm6, %v5081_v30, %v5082_v27  ;;  %v5250_v5 = vld [vmem:[#allocation14 + $0x90] sm:$0xff]  ;;  %v5337_v0 = vld [vmem:[#allocation14 + $0xa8] sm:$0xff] }
 0x51d   : > { %9728 = vmatprep.mubr.msk.f32.mxu1 %vm3153_vm8, %v4728_v29  ;;  %9708 = vmatmul.mubr.msk.f32.vlgmr.msra.gmra.mxu0 %vm3153_vm8, %v12043_v22  ;;  %v4906_v10 = vrot.slane %v12057_v36, 5  ;;  %v4817_v32 = vrot.slane %v12057_v36, 4  ;;  %v5084_v38 = vrot.slane %v12057_v36, 7  ;;  %v5252_v48 = vrot.slane %v12057_v36, 1 }
 0x51e   : > { %9729 = vmatmul.mubr.msk.f32.vlgmr.msra.gmra.mxu1 %vm3153_vm8, %v12047_v25  ;;  %9738 = vmatprep.subr.mxu1 %v4902_v34  ;;  %v9702_v13 = vpop.f32.mrf.mxu1  ;;  %v4995_v3 = vrot.slane %v12057_v36, 6  ;;  %v5424_v9 = vrot.slane %v12057_v36, 3 }
 0x51f   : > { %9718 = vmatpush3.msra.mxu0 %v4638_v52  ;;  %9721 = vmatprep.mubr.msk.f32.mxu0 %vm3153_vm8, %v4641_v12  ;;  %v4907_v11 = vsel %vm1649_vm5, %v4904_v16, %v4906_v10  ;;  %v4818_v1 = vsel %vm1214_vm0, %v4815_v62, %v4817_v32  ;;  %v5085_v51 = vsel %vm1833_vm6, %v5082_v27, %v5084_v38  ;;  %v5533_v16 = vpop.permute.xlu1 %5532  ;;  %v5338_v10 = vrot.slane %v12057_v36, 2  ;;  %v5336_v12 = vld [vmem:[#allocation14 + $0xa0] sm:$0xff]  ;;  %v5531_v13 = vpop.permute.xlu0 %5530  ;;  %v5833_v32 = vld [vmem:[#allocation17 + $0x10] sm:$0xff] }
 0x520   : > { %9739 = vmatpush3.msra.mxu1 %v4902_v34  ;;  %9742 = vmatprep.mubr.msk.f32.mxu1 %vm3153_vm8, %v4905_v4  ;;  %v4994_v52 = vsel %vm1741_vm7, %v4992_v50, %v4993_v43  ;;  %v5253_v57 = vsel %vm1205_vm1, %v12043_v22, %v5252_v48  ;;  %v4996_v29 = vsel %vm1741_vm7, %v4993_v43, %v4995_v3  ;;  %v5168_v22 = vld [vmem:[#allocation14 + $0x80] sm:$0xff]  ;;  %v5422_v34 = vld [vmem:[#allocation14 + $0xb0] sm:$0xff] }
 0x521   : > { %9719 = vmatprep.subr.mxu0 %v4637_v15  ;;  %9740 = vmatprep.subr.mxu1 %v4901_v17  ;;  %v5425_v44 = vsel %vm1467_vm4, %v12047_v25, %v5424_v9  ;;  %v5339_v25 = vsel %vm1377_vm3, %v12050_v21, %v5338_v10 }
 0x522   : > { %9720 = vmatpush3.msra.mxu0 %v4637_v15  ;;  %9741 = vmatpush3.msra.mxu1 %v4901_v17  ;;  %v5518_v17 = vld [vmem:[%s12510_s26] sm:$0xff] }
 0x523   : > { %9722 = vmatmul.mubr.msk.f32.vlgmr.msra.gmra.mxu0 %vm3153_vm8, %v12050_v21  ;;  %9731 = vmatprep.subr.mxu0 %v4812_v18  ;;  %v5623_v15 = vpop.permute.xlu1 %5622  ;;  %v9026_v21 = vld [vmem:[%s12510_s26 + $0x10] sm:$0xff]  ;;  %v5535_v62 = vpop.permute.xlu0 %5534 }
 0x524   : > { %9743 = vmatmul.mubr.msk.f32.vlgmr.msra.gmra.mxu1 %vm3153_vm8, %v4907_v11  ;;  %9752 = vmatprep.subr.mxu1 %v5080_v24  ;;  %v9034_v11 = vld [vmem:[%s12510_s26 + $0x20] sm:$0xff] }
 0x525   : > { %9732 = vmatpush3.msra.mxu0 %v4812_v18  ;;  %9735 = vmatprep.mubr.msk.f32.mxu0 %vm3153_vm8, %v4816_v20  ;;  %v9035_v18 = vld [vmem:[%s12510_s26 + $0x28] sm:$0xff]  ;;  %v5831_v20 = vld [vmem:[#allocation17 + $0x8] sm:$0xff] }
 0x526   : > { %9753 = vmatpush3.msra.mxu1 %v5080_v24  ;;  %9756 = vmatprep.mubr.msk.f32.mxu1 %vm3153_vm8, %v5083_v37 }
 0x527   : > { %9733 = vmatprep.subr.mxu0 %v4811_v23  ;;  %9754 = vmatprep.subr.mxu1 %v5079_v31  ;;  %v5625_v4 = vpop.permute.xlu1 %5624  ;;  %v5723_v27 = vpop.permute.xlu0 %5722 }
 0x528   : > { %9734 = vmatpush3.msra.mxu0 %v4811_v23  ;;  %9755 = vmatpush3.msra.mxu1 %v5079_v31  ;;  %v5830_v23 = vld [vmem:[#allocation17] sm:$0xff]  ;;  %v5834_v31 = vld [vmem:[#allocation17 + $0x18] sm:$0xff] }
 0x529   : > { %9736 = vmatmul.mubr.msk.f32.vlgmr.msra.gmra.mxu0 %vm3153_vm8, %v4818_v1  ;;  %9745 = vmatprep.subr.mxu0 %v4991_v40 }
 0x52a   : > { %9757 = vmatmul.mubr.msk.f32.vlgmr.msra.gmra.mxu1 %vm3153_vm8, %v5085_v51  ;;  %9766 = vmatprep.subr.mxu1 %v5251_v46 }
 0x52b   : > { %9746 = vmatpush3.msra.mxu0 %v4991_v40  ;;  %9749 = vmatprep.mubr.msk.f32.mxu0 %vm3153_vm8, %v4994_v52  ;;  %v5627_v24 = vpop.permute.xlu1 %5626  ;;  %v5725_v28 = vpop.permute.xlu0 %5724 }
 0x52c   : > { %9767 = vmatpush3.msra.mxu1 %v5251_v46  ;;  %9770 = vmatprep.mubr.msk.f32.mxu1 %vm3153_vm8, %v5253_v57 }
 0x52d   : > { %9747 = vmatprep.subr.mxu0 %v4990_v59  ;;  %9768 = vmatprep.subr.mxu1 %v5250_v5 }
 0x52e   : > { %9748 = vmatpush3.msra.mxu0 %v4990_v59  ;;  %9769 = vmatpush3.msra.mxu1 %v5250_v5 }
 0x52f   : > { %9750 = vmatmul.mubr.msk.f32.vlgmr.msra.gmra.mxu0 %vm3153_vm8, %v4996_v29  ;;  %9759 = vmatprep.subr.mxu0 %v5169_v7  ;;  %v5727_v30 = vpop.permute.xlu0 %5726 }
 0x530   : > { %9771 = vmatmul.mubr.msk.f32.vlgmr.msra.gmra.mxu1 %vm3153_vm8, %v5252_v48  ;;  %9780 = vmatprep.subr.mxu1 %v5423_v8 }
 0x531   : > { %9760 = vmatpush3.msra.mxu0 %v5169_v7  ;;  %9763 = vmatprep.mubr.msk.f32.mxu0 %vm3153_vm8, %v12037_v61  ;;  %v5519_v61 = vld [vmem:[%s12510_s26 + $0x8] sm:$0xff] }
 0x532   : > { %9781 = vmatpush3.msra.mxu1 %v5423_v8  ;;  %9784 = vmatprep.mubr.msk.f32.mxu1 %vm3153_vm8, %v5425_v44 }
 0x533   : > { %9761 = vmatprep.subr.mxu0 %v5168_v22  ;;  %9782 = vmatprep.subr.mxu1 %v5422_v34 }
 0x534   : > { %9762 = vmatpush3.msra.mxu0 %v5168_v22  ;;  %9783 = vmatpush3.msra.mxu1 %v5422_v34 }
 0x535   : > { %9764 = vmatmul.mubr.msk.f32.vlgmr.msra.gmra.mxu0 %vm3153_vm8, %v12057_v36  ;;  %9773 = vmatprep.subr.mxu0 %v5337_v0  ;;  %v9027_v36 = vld [vmem:[%s12510_s26 + $0x18] sm:$0xff] }
 0x536   : > { %9785 = vmatmul.mubr.msk.f32.vlgmr.msra.gmra.mxu1 %vm3153_vm8, %v5424_v9  ;;  %9800 = vmatprep.subr.mxu1 %v11118_v56 }
 0x537   : > { %9774 = vmatpush3.msra.mxu0 %v5337_v0  ;;  %9777 = vmatprep.mubr.msk.f32.mxu0 %vm3153_vm8, %v5339_v25 }
 0x538   : > { %9801 = vmatpush3.msra.mxu1 %v5519_v61  ;;  %9775 = vmatprep.subr.mxu0 %v5336_v12 }
 0x539   : > { %9802 = vmatprep.subr.mxu1 %v11118_v56  ;;  %9776 = vmatpush3.msra.mxu0 %v5336_v12 }
 0x53a   : > { %9803 = vmatpush3.msra.mxu1 %v5518_v17  ;;  %9804 = vmatprep.mubr.msk.f32.mxu1 %vm11120_vm13, %v11118_v56 }
 0x53b   : > { %9778 = vmatmul.mubr.msk.f32.vlgmr.msra.gmra.mxu0 %vm3153_vm8, %v5338_v10  ;;  %9787 = vmatprep.subr.mxu0 %v11118_v56 }
 0x53c   : > { %9805 = vmatmul.mubr.msk.f32.vlgmr.msra.gmra.mxu1 %vm3153_vm8, %v5623_v15  ;;  %9788 = vmatpush3.msra.mxu0 %v9027_v36 }
 0x53d   : > { %9789 = vmatprep.subr.mxu0 %v11118_v56  ;;  %9791 = vmatprep.mubr.msk.f32.mxu0 %vm11120_vm13, %v11118_v56 }
 0x53e   : > { %9790 = vmatpush3.msra.mxu0 %v9026_v21  ;;  %9807 = vmatprep.mubr.msk.f32.mxu1 %vm11120_vm13, %v11118_v56 }
 0x53f   : > { %9792 = vmatmul.mubr.msk.f32.vlgmr.msra.gmra.mxu0 %vm3153_vm8, %v5531_v13  ;;  %9813 = vmatprep.subr.mxu0 %v11118_v56 }
 0x540   : > { %9808 = vmatmul.mubr.msk.f32.gmra.mxu1 %vm3153_vm8, %v5625_v4  ;;  %9794 = vmatprep.mubr.msk.f32.mxu0 %vm11120_vm13, %v11118_v56 }
 0x541   : > { %9810 = vmatprep.mubr.msk.f32.mxu1 %vm11120_vm13, %v11118_v56  ;;  %9814 = vmatpush3.msra.mxu0 %v9035_v18 }
 0x542   : > { %9815 = vmatprep.subr.mxu0 %v11118_v56  ;;  %9826 = vmatprep.subr.mxu1 %v11118_v56 }
 0x543   : > { %9795 = vmatmul.mubr.msk.f32.gmra.mxu0 %vm3153_vm8, %v5533_v16  ;;  %9827 = vmatpush3.msra.mxu1 %v5834_v31 }
 0x544   : > { %9811 = vmatmul.mubr.msk.f32.gmra.mxu1 %vm3153_vm8, %v5627_v24  ;;  %9797 = vmatprep.mubr.msk.f32.mxu0 %vm11120_vm13, %v11118_v56 }
 0x545   : > { %9816 = vmatpush3.msra.mxu0 %v9034_v11  ;;  %9830 = vmatprep.mubr.msk.f32.mxu1 %vm11120_vm13, %v11118_v56 }
 0x546   : > { %9839 = vmatprep.subr.mxu0 %v11118_v56  ;;  %9828 = vmatprep.subr.mxu1 %v11118_v56 }
 0x547   : > { %9798 = vmatmul.mubr.msk.f32.gmra.mxu0 %vm3153_vm8, %v5535_v62  ;;  %9829 = vmatpush3.msra.mxu1 %v5833_v32 }
 0x548   : > { %9817 = vmatprep.mubr.msk.f32.mxu0 %vm11120_vm13, %v11118_v56  ;;  %9852 = vmatprep.subr.mxu1 %v11118_v56 }
 0x54b   : > { %9818 = vmatmul.mubr.msk.f32.vlgmr.msra.gmra.mxu0 %vm3153_vm8, %v5723_v27 }
 0x54c   : > { %9820 = vmatprep.mubr.msk.f32.mxu0 %vm11120_vm13, %v11118_v56  ;;  %9840 = vmatpush3.msra.mxu0 %v5831_v20 }
 0x54d   : > { %9841 = vmatprep.subr.mxu0 %v11118_v56 }
 0x54e   : > { %9842 = vmatpush3.msra.mxu0 %v5830_v23 }
 0x54f   : > { %9821 = vmatmul.mubr.msk.f32.gmra.mxu0 %vm3153_vm8, %v5725_v28 }
 0x550   : > { %9823 = vmatprep.mubr.msk.f32.mxu0 %vm11120_vm13, %v11118_v56 }
 0x553   : > { %9824 = vmatmul.mubr.msk.f32.gmra.mxu0 %vm3153_vm8, %v5727_v30 }
 0x554   : > { %9843 = vmatprep.mubr.msk.f32.mxu0 %vm11120_vm13, %v11118_v56 }
 0x5d9   : > { %v9716_v37 = vpop.f32.mrf.mxu1 }
 0x5db   : > { %v4627_v38 = vpop.f32.mrf.mxu1 }
 0x5dd   : > { %v9709_v40 = vpop.f32.mrf.mxu0 }
 0x5de   : > { %v4633_v43 = vadd.f32 %v9716_v37, %v9709_v40  ;;  %v9730_v46 = vpop.f32.mrf.mxu1 }
 0x5df   : > { %v4548_v48 = vpop.f32.mrf.mxu0 }
 0x5e0   : > { %v4628_v1 = vadd.f32 %v4627_v38, %v4548_v48  ;;  %v4799_v50 = vpop.f32.mrf.mxu1 }
 0x5e3   : > { %v9723_v51 = vpop.f32.mrf.mxu0 }
 0x5e4   : > { %v4722_v52 = vadd.f32 %v9723_v51, %v4633_v43  ;;  %v9744_v59 = vpop.f32.mrf.mxu1 }
 0x5e5   : > { %v4712_v5 = vpop.f32.mrf.mxu0 }
 0x5e6   : > { %v4721_v3 = vadd.f32 %v4712_v5, %v4628_v1  ;;  %v4978_v57 = vpop.f32.mrf.mxu1  ;;  %v4809_v7 = vadd.f32 %v9730_v46, %v4722_v52 }
 0x5e8   : > { %v4808_v8 = vadd.f32 %v4799_v50, %v4721_v3 }
 0x5e9   : > { %v9737_v9 = vpop.f32.mrf.mxu0 }
 0x5ea   : > { %v4899_v29 = vadd.f32 %v9737_v9, %v4809_v7  ;;  %v9758_v22 = vpop.f32.mrf.mxu1 }
 0x5eb   : > { %v4889_v34 = vpop.f32.mrf.mxu0 }
 0x5ec   : > { %v4898_v16 = vadd.f32 %v4889_v34, %v4808_v8  ;;  %v5156_v44 = vpop.f32.mrf.mxu1  ;;  %v4988_v0 = vadd.f32 %v9744_v59, %v4899_v29  ;;  %v9039_v8 = vld [vmem:[%s12511_s3] ss:$0 sm:$0xff] }
 0x5ee   : > { %v4987_v10 = vadd.f32 %v4978_v57, %v4898_v16 }
 0x5ef   : > { %v9751_v61 = vpop.f32.mrf.mxu0 }
 0x5f0   : > { %v5077_v12 = vadd.f32 %v9751_v61, %v4988_v0  ;;  %v9772_v25 = vpop.f32.mrf.mxu1 }
 0x5f1   : > { %v5067_v15 = vpop.f32.mrf.mxu0 }
 0x5f2   : > { %v5076_v17 = vadd.f32 %v5067_v15, %v4987_v10  ;;  %v5324_v36 = vpop.f32.mrf.mxu1  ;;  %v5166_v13 = vadd.f32 %v9758_v22, %v5077_v12 }
 0x5f4   : > { %v5165_v21 = vadd.f32 %v5156_v44, %v5076_v17 }
 0x5f5   : > { %v9765_v4 = vpop.f32.mrf.mxu0 }
 0x5f6   : > { %v5248_v18 = vadd.f32 %v9765_v4, %v5166_v13  ;;  %v9786_v62 = vpop.f32.mrf.mxu1 }
 0x5f7   : > { %v5238_v11 = vpop.f32.mrf.mxu0 }
 0x5f8   : > { %v5247_v24 = vadd.f32 %v5238_v11, %v5165_v21  ;;  %v5496_v27 = vpop.f32.mrf.mxu1  ;;  %v5334_v28 = vadd.f32 %v9772_v25, %v5248_v18 }
 0x5fa   : > { %v5333_v30 = vadd.f32 %v5324_v36, %v5247_v24  ;;  %v6017_v24 = vld [vmem:[#allocation17 + $0x28] sm:$0xff] }
 0x5fb   : > { %v9779_v20 = vpop.f32.mrf.mxu0 }
 0x5fc   : > { %v5420_v23 = vadd.f32 %v9779_v20, %v5334_v28  ;;  %v5700_v31 = vpop.f32.mrf.mxu1  ;;  %v6016_v28 = vld [vmem:[#allocation17 + $0x20] sm:$0xff] }
 0x5fd   : > { %v5410_v32 = vpop.f32.mrf.mxu0 }
 0x5fe   : > { %v12165_v37 = vadd.f32 %v9786_v62, %v5420_v23  ;;  %v5419_v38 = vadd.f32 %v5410_v32, %v5333_v30  ;;  %v9806_v40 = vpop.f32.mrf.mxu1 }
 0x5ff   : > { %v5608_v43 = vpop.f32.mrf.mxu0  ;;  %v6126_v40 = vld [vmem:[#allocation19 + $0x8] sm:$0xff] }
 0x600   : > { %v12167_v46 = vadd.f32 %v5496_v27, %v5419_v38  ;;  %v5705_v48 = vpop.f32.mrf.mxu1  ;;  %v5701_v7 = vadd.f32 %v5700_v31, %v5608_v43  ;;  %v6125_v43 = vld [vmem:[#allocation19] sm:$0xff] }
 0x601   : > { %v9793_v1 = vpop.f32.mrf.mxu0 }
 0x602   : > { %v9809_v50 = vpop.f32.mrf.mxu1  ;;  %v6128_v1 = vld [vmem:[#allocation19 + $0x10] sm:$0xff] }
 0x603   : > { %v5613_v51 = vpop.f32.mrf.mxu0  ;;  %v6298_v50 = vld [vmem:[#allocation19 + $0x28] sm:$0xff] }
 0x604   : > { %v5710_v52 = vpop.f32.mrf.mxu1  ;;  %v5706_v34 = vadd.f32 %v5705_v48, %v5613_v51  ;;  %v6129_v48 = vld [vmem:[#allocation19 + $0x18] sm:$0xff] }
 0x605   : > { %v9796_v59 = vpop.f32.mrf.mxu0  ;;  %9865 = vmatprep.subr.mxu0 %v6129_v48 }
 0x606   : > { %v9812_v5 = vpop.f32.mrf.mxu1 }
 0x607   : > { %v5618_v3 = vpop.f32.mrf.mxu0 }
 0x608   : > { %v5711_v12 = vadd.f32 %v5710_v52, %v5618_v3 }
 0x609   : > { %v9799_v57 = vpop.f32.mrf.mxu0 }
 0x60b   : > { %v5800_v9 = vpop.f32.mrf.mxu0 }
 0x60c   : > { %v5814_v29 = vadd.f32 %v5800_v9, %v5701_v7 }
 0x60d   : > { %v9819_v22 = vpop.f32.mrf.mxu0 }
 0x60e   : > { %v5823_v16 = vadd.f32 %v9039_v8, %v5814_v29 }
 0x60f   : > { %v5805_v44 = vpop.f32.mrf.mxu0 }
 0x610   : > { %v5826_v0 = vmax.f32 %v5823_v16, 0.0  ;;  %v5815_v10 = vadd.f32 %v5805_v44, %v5706_v34  ;;  %v9049_v44 = vld [vmem:[%s12512_s25] ss:$0 sm:$0xff] }
 0x611   : > { %v9822_v61 = vpop.f32.mrf.mxu0 }
 0x612   : > { %v5824_v25 = vadd.f32 %v9039_v8, %v5815_v10  ;;  %9844 = vmatmul.mubr.msk.f32.vlgmr.msra.gmra.mxu0 %vm3153_vm8, %v5826_v0  ;;  %v5838_v21 = vrot.slane %v5826_v0, 1  ;;  %v6018_v23 = vrot.slane %v5826_v0, 2 }
 0x613   : > { %v5810_v15 = vpop.f32.mrf.mxu0  ;;  %9846 = vmatprep.mubr.msk.f32.mxu0 %vm11120_vm13, %v11118_v56  ;;  %9866 = vmatpush3.msra.mxu0 %v6129_v48  ;;  %v6297_v48 = vld [vmem:[#allocation19 + $0x20] sm:$0xff] }
 0x614   : > { %v5827_v17 = vmax.f32 %v5824_v25, 0.0  ;;  %v5816_v36 = vadd.f32 %v5810_v15, %v5711_v12  ;;  %9867 = vmatprep.subr.mxu0 %v6128_v1 }
 0x615   : > { %v9825_v13 = vpop.f32.mrf.mxu0  ;;  %9868 = vmatpush3.msra.mxu0 %v6128_v1 }
 0x616   : > { %v5839_v4 = vrot.slane %v5827_v17, 1  ;;  %v5825_v18 = vadd.f32 %v9039_v8, %v5816_v36  ;;  %9847 = vmatmul.mubr.msk.f32.gmra.mxu0 %vm3153_vm8, %v5827_v17  ;;  %v6019_v20 = vrot.slane %v5827_v17, 2  ;;  %9879 = vmatprep.subr.mxu0 %v6298_v50 }
 0x617   : > { %9849 = vmatprep.mubr.msk.f32.mxu0 %vm11120_vm13, %v11118_v56 }
 0x618   : > { %v5828_v62 = vmax.f32 %v5825_v18, 0.0  ;;  %v5840_v11 = vsel %vm1205_vm1, %v5838_v21, %v5839_v4  ;;  %v6020_v32 = vsel %vm1377_vm3, %v6018_v23, %v6019_v20 }
 0x619   : > { %9831 = vmatmul.mubr.msk.f32.vlgmr.msra.gmra.mxu1 %vm3153_vm8, %v5840_v11 }
 0x61a   : > { %v5841_v27 = vrot.slane %v5828_v62, 1  ;;  %9850 = vmatmul.mubr.msk.f32.gmra.mxu0 %vm3153_vm8, %v5828_v62  ;;  %9833 = vmatprep.mubr.msk.f32.mxu1 %vm11120_vm13, %v11118_v56  ;;  %v6021_v31 = vrot.slane %v5828_v62, 2 }
 0x61b   : > { %9853 = vmatpush3.msra.mxu1 %v6017_v24 }
 0x61c   : > { %v5842_v30 = vsel %vm1205_vm1, %v5839_v4, %v5841_v27  ;;  %9854 = vmatprep.subr.mxu1 %v11118_v56  ;;  %v6022_v38 = vsel %vm1377_vm3, %v6019_v20, %v6021_v31 }
 0x61d   : > { %9834 = vmatmul.mubr.msk.f32.gmra.mxu1 %vm3153_vm8, %v5842_v30 }
 0x61e   : > { %9836 = vmatprep.mubr.msk.f32.mxu1 %vm11120_vm13, %v11118_v56  ;;  %9855 = vmatpush3.msra.mxu1 %v6016_v28 }
 0x61f   : > { %9872 = vmatprep.subr.mxu1 %v6126_v40 }
 0x621   : > { %9837 = vmatmul.mubr.msk.f32.gmra.mxu1 %vm3153_vm8, %v5841_v27 }
 0x622   : > { %9856 = vmatprep.mubr.msk.f32.mxu1 %vm11120_vm13, %v11118_v56 }
 0x625   : > { %9857 = vmatmul.mubr.msk.f32.vlgmr.msra.gmra.mxu1 %vm3153_vm8, %v6020_v32 }
 0x626   : > { %9859 = vmatprep.mubr.msk.f32.mxu1 %vm11120_vm13, %v11118_v56  ;;  %9873 = vmatpush3.msra.mxu1 %v6126_v40 }
 0x627   : > { %9874 = vmatprep.subr.mxu1 %v6125_v43 }
 0x628   : > { %9875 = vmatpush3.msra.mxu1 %v6125_v43 }
 0x629   : > { %9860 = vmatmul.mubr.msk.f32.gmra.mxu1 %vm3153_vm8, %v6022_v38  ;;  %9886 = vmatprep.subr.mxu1 %v11118_v56 }
 0x62a   : > { %9862 = vmatprep.mubr.msk.f32.mxu1 %vm11120_vm13, %v11118_v56 }
 0x62d   : > { %9863 = vmatmul.mubr.msk.f32.gmra.mxu1 %vm3153_vm8, %v6021_v31 }
 0x6d2   : > { %v6001_v51 = vpop.f32.mrf.mxu0 }
 0x6d4   : > { %v9845_v52 = vpop.f32.mrf.mxu0 }
 0x6d5   : > { %v10378_v52 = vld [vmem:[%s11538_s1 + $0x10] sm:$0xff] }
 0x6d6   : > { %v6006_v59 = vpop.f32.mrf.mxu0 }
 0x6d8   : > { %v9848_v5 = vpop.f32.mrf.mxu0 }
 0x6d9   : > { %v5915_v3 = vpop.f32.mrf.mxu1  ;;  %v10380_v5 = vld [vmem:[%s11538_s1] sm:$0xff] }
 0x6da   : > { %v6011_v57 = vpop.f32.mrf.mxu0  ;;  %v6002_v16 = vadd.f32 %v6001_v51, %v5915_v3 }
 0x6db   : > { %v9832_v7 = vpop.f32.mrf.mxu1 }
 0x6dc   : > { %v9851_v8 = vpop.f32.mrf.mxu0 }
 0x6dd   : > { %v5920_v9 = vpop.f32.mrf.mxu1 }
 0x6de   : > { %v6007_v12 = vadd.f32 %v6006_v59, %v5920_v9  ;;  %v10379_v59 = vld [vmem:[%s11538_s1 + $0x8] sm:$0xff]  ;;  %s8520_s1 = scalar_lea.sflag [#allocation4], %s1189_s16 }
 0x6df   : > { %v9835_v29 = vpop.f32.mrf.mxu1 }
 0x6e1   : > { %v5925_v22 = vpop.f32.mrf.mxu1 }
 0x6e2   : > { %v6012_v21 = vadd.f32 %v6011_v57, %v5925_v22 }
 0x6e3   : > { %v9838_v34 = vpop.f32.mrf.mxu1 }
 0x6e5   : > { %v6095_v0 = vpop.f32.mrf.mxu1 }
 0x6e6   : > { %v6109_v10 = vadd.f32 %v6095_v0, %v6002_v16  ;;  %v6562_v16 = vld [vmem:[%s12513_s0] sm:$0xf] }
 0x6e7   : > { %v9858_v61 = vpop.f32.mrf.mxu1 }
 0x6e8   : > { %v6118_v25 = vadd.f32 %v9049_v44, %v6109_v10 }
 0x6e9   : > { %v6100_v15 = vpop.f32.mrf.mxu1 }
 0x6ea   : > { %v6121_v17 = vmax.f32 %v6118_v25, 0.0  ;;  %v6110_v36 = vadd.f32 %v6100_v15, %v6007_v12 }
 0x6eb   : > { %v9861_v13 = vpop.f32.mrf.mxu1 }
 0x6ec   : > { %v6119_v4 = vadd.f32 %v9049_v44, %v6110_v36  ;;  %9876 = vmatprep.mubr.msk.f32.mxu1 %vm3153_vm8, %v6121_v17  ;;  %v6133_v27 = vrot.slane %v6121_v17, 1  ;;  %v6299_v38 = vrot.slane %v6121_v17, 2 }
 0x6ed   : > { %v6105_v18 = vpop.f32.mrf.mxu1 }
 0x6ee   : > { %v6122_v62 = vmax.f32 %v6119_v4, 0.0  ;;  %v6111_v11 = vadd.f32 %v6105_v18, %v6012_v21 }
 0x6ef   : > { %v9864_v24 = vpop.f32.mrf.mxu1 }
 0x6f0   : > { %v6134_v28 = vrot.slane %v6122_v62, 1  ;;  %v6120_v30 = vadd.f32 %v9049_v44, %v6111_v11  ;;  %9877 = vmatmul.mubr.msk.f32.vlgmr.msra.gmra.mxu1 %vm3153_vm8, %v6122_v62  ;;  %v6300_v31 = vrot.slane %v6122_v62, 2 }
 0x6f1   : > { %9890 = vmatprep.mubr.msk.f32.mxu1 %vm11120_vm13, %v11118_v56 }
 0x6f2   : > { %v6123_v20 = vmax.f32 %v6120_v30, 0.0  ;;  %v6135_v23 = vsel %vm1205_vm1, %v6133_v27, %v6134_v28  ;;  %v6301_v1 = vsel %vm1377_vm3, %v6299_v38, %v6300_v31 }
 0x6f3   : > { %9869 = vmatprep.mubr.msk.f32.mxu0 %vm3153_vm8, %v6135_v23 }
 0x6f4   : > { %v6136_v32 = vrot.slane %v6123_v20, 1  ;;  %v6302_v40 = vrot.slane %v6123_v20, 2  ;;  %v9068_v20 = vld [vmem:[#allocation22] ss:$0 sm:$0xff] }
 0x6f6   : > { %v6137_v43 = vsel %vm1205_vm1, %v6134_v28, %v6136_v32  ;;  %v6303_v51 = vsel %vm1377_vm3, %v6300_v31, %v6302_v40  ;;  %v6784_v28 = vld [vmem:[#allocation23] sm:$0xf] }
 0x6f7   : > { %9870 = vmatmul.mubr.msk.f32.vlgmr.msra.gmra.mxu0 %vm3153_vm8, %v6137_v43 }
 0x6f8   : > { %9880 = vmatpush3.msra.mxu0 %v6298_v50  ;;  %9883 = vmatprep.mubr.msk.f32.mxu0 %vm3153_vm8, %v6301_v1  ;;  %v9058_v50 = vsel %vm6465_vm11, 1.0, %v11118_v56 }
 0x6f9   : > { %9881 = vmatprep.subr.mxu0 %v6297_v48 }
 0x6fa   : > { %9882 = vmatpush3.msra.mxu0 %v6297_v48 }
 0x6fb   : > { %9893 = vmatprep.subr.mxu0 %v10378_v52  ;;  %9884 = vmatmul.mubr.msk.f32.vlgmr.msra.gmra.mxu0 %vm3153_vm8, %v6303_v51 }
 0x6fc   : > { %9894 = vmatpush3.msra.mxu0 %v10378_v52  ;;  %9899 = vmatprep.mubr.msk.f32.mxu0 %vm2302_vm9, %v12002_v35 }
 0x6fd   : > { %9895 = vmatprep.subr.mxu0 %v10379_v59 }
 0x6fe   : > { %9896 = vmatpush3.msra.mxu0 %v10379_v59 }
 0x6ff   : > { %9897 = vmatprep.subr.mxu0 %v10380_v5 }
 0x700   : > { %9898 = vmatpush3.msra.mxu0 %v10380_v5 }
 0x701   : > { %9900 = vmatmul.mubr.msk.f32.vlgmr.msra.gmra.mxu0 %vm2302_vm9, %v12013_v41 }
 0x702   : > { %9902 = vmatprep.mubr.msk.f32.mxu0 %vm2302_vm9, %v12025_v45  ;;  %v6786_v45 = vld [vmem:[#allocation23 + $0x4] sm:$0xf] }
 0x705   : > { %9903 = vmatmul.mubr.msk.f32.gmra.mxu0 %vm2302_vm9, %v9058_v50  ;;  %vm6669_vm9 = vcmask 211968  }
 0x706   : > { %9921 = vmatprep.mubr.msk.f32.mxu0 %vm6669_vm9, %v11850_v19 }
 0x7b0   : > { %v9878_v3 = vpop.f32.mrf.mxu1 }
 0x7b2   : > { %v6287_v9 = vpop.f32.mrf.mxu1 }
 0x7b7   : > { %v9871_v57 = vpop.f32.mrf.mxu0 }
 0x7b8   : > { %v6293_v8 = vadd.f32 %v9878_v3, %v9871_v57 }
 0x7b9   : > { %v6208_v7 = vpop.f32.mrf.mxu0 }
 0x7ba   : > { %v6288_v22 = vadd.f32 %v6287_v9, %v6208_v7 }
 0x7bb   : > { %v9885_v29 = vpop.f32.mrf.mxu0 }
 0x7bc   : > { %v6384_v58 = vadd.f32 %v9885_v29, %v6293_v8 }
 0x7bd   : > { %v6374_v53 = vpop.f32.mrf.mxu0 }
 0x7be   : > { %v6383_v34 = vadd.f32 %v6374_v53, %v6288_v22  ;;  %9887 = vmatpush3.msra.mxu1 %v6384_v58 }
 0x7bf   : > { %9888 = vmatprep.subr.mxu1 %v11118_v56 }
 0x7c0   : > { %9889 = vmatpush3.msra.mxu1 %v6383_v34 }
 0x7c1   : > { %v9901_v44 = vpop.f32.mrf.mxu0  ;;  %9891 = vmatmul.mubr.msk.f32.vlgmr.msra.gmra.mxu1 %vm3153_vm8, %v11850_v19  ;;  %9905 = vmatprep.subr.msk.mxu1 %vm1214_vm0, %v6562_v16 }
 0x7c2   : > { %9906 = vmatpush3.msk.msra.mxu1 %vm1214_vm0, %v6562_v16  ;;  %v6788_v10 = vrot.slane %v9901_v44, 1 }
 0x7c3   : > { %v6543_v0 = vpop.f32.mrf.mxu0  ;;  %9924 = vmatprep.subr.msk.mxu1 %vm1214_vm0, %v6786_v45 }
 0x7c4   : > { %9907 = vmatprep.mubr.msk.f32.mxu1 %vm1209_vm2, %v6543_v0  ;;  %v6787_v61 = vrot.slane %v6543_v0, 1 }
 0x7c5   : > { %v9904_v12 = vpop.f32.mrf.mxu0  ;;  %9908 = vmatmul.mubr.msk.f32.vlgmr.msra.gmra.mxu1 %vm1209_vm2, %v9901_v44 }
 0x7c6   : > { %9925 = vmatpush3.msk.msra.mxu1 %vm1214_vm0, %v6786_v45  ;;  %v6792_v17 = vrot.slane %v9904_v12, 1  ;;  %v6789_v36 = vsel %vm1205_vm1, %v6787_v61, %v6788_v10 }
 0x7c7   : > { %v6553_v25 = vpop.f32.mrf.mxu0 }
 0x7c8   : > { %v6790_v15 = vrot.slane %v6553_v25, 1  ;;  %9910 = vmatprep.mubr.msk.f32.mxu1 %vm1209_vm2, %v6553_v25 }
 0x7c9   : > { %9911 = vmatmul.mubr.msk.f32.gmra.mxu1 %vm1209_vm2, %v9904_v12 }
 0x7ca   : > { %9926 = vmatprep.mubr.msk.f32.mxu1 %vm1209_vm2, %v6789_v36  ;;  %v6791_v13 = vsel %vm1205_vm1, %v6788_v10, %v6790_v15  ;;  %v6793_v21 = vsel %vm1205_vm1, %v6790_v15, %v6792_v17 }
 0x7cd   : > { %9927 = vmatmul.mubr.msk.f32.vlgmr.msra.gmra.mxu1 %vm1209_vm2, %v6791_v13 }
 0x7ce   : > { %9929 = vmatprep.mubr.msk.f32.mxu1 %vm1209_vm2, %v6793_v21 }
 0x7d1   : > { %9930 = vmatmul.mubr.msk.f32.gmra.mxu1 %vm1209_vm2, %v6792_v17  ;;  %v9056_v17 = vld [vmem:[#allocation20] ss:$0 sm:$0xff] }
 0x7d2   : > { %9948 = vmatprep.mubr.msk.f32.mxu1 %vm3056_vm14, %v11850_v19 }
 0x881   : > { %v12248_v4 = vpop.f32.mrf.mxu1 }
 0x883   : > { %v9892_v18 = vpop.f32.mrf.mxu1 }
 0x885   : > { %v9909_v62 = vpop.f32.mrf.mxu1 }
 0x887   : > { %v6644_v11 = vpop.f32.mrf.mxu1 }
 0x889   : > { %v9912_v24 = vpop.f32.mrf.mxu1 }
 0x88a   : > { %9913 = vmatprep.subr.msk.mxu0 %vm1741_vm7, %v9912_v24 }
 0x88b   : > { %v6654_v27 = vpop.f32.mrf.mxu1  ;;  %9914 = vmatpush3.msk.msra.mxu0 %vm1741_vm7, %v9912_v24  ;;  %vm7100_vm7 = vcmask 105472  }
 0x88c   : > { %9915 = vmatprep.subr.mxu0 %v6654_v27 }
 0x88d   : > { %9916 = vmatpush3.msra.mxu0 %v6654_v27  ;;  %v9928_v30 = vpop.f32.mrf.mxu1  ;;  %v7183_v27 = vld [vmem:[#allocation26 + $0x8] sm:$0xff] }
 0x88e   : > { %9917 = vmatprep.subr.mxu0 %v9909_v62 }
 0x88f   : > { %9918 = vmatpush3.msra.mxu0 %v9909_v62  ;;  %v6871_v32 = vpop.f32.mrf.mxu1 }
 0x890   : > { %9919 = vmatprep.subr.mxu0 %v6644_v11 }
 0x891   : > { %9920 = vmatpush3.msra.mxu0 %v6644_v11  ;;  %v9931_v57 = vpop.f32.mrf.mxu1 }
 0x892   : > { %9922 = vmatmul.mubr.msk.f32.vlgmr.msra.gmra.mxu0 %vm6669_vm9, %v11913_v2  ;;  %9932 = vmatprep.subr.msk.mxu0 %vm1214_vm0, %v6784_v28 }
 0x893   : > { %9934 = vmatprep.mubr.msk.f32.mxu0 %vm1209_vm2, %v6543_v0  ;;  %9933 = vmatpush3.msk.msra.mxu0 %vm1214_vm0, %v6784_v28  ;;  %v6881_v10 = vpop.f32.mrf.mxu1  ;;  %v8965_v28 = vld [vmem:[#allocation7] ss:$0 sm:$0xff] }
 0x896   : > { %9935 = vmatmul.mubr.msk.f32.vlgmr.msra.gmra.mxu0 %vm1209_vm2, %v9901_v44 }
 0x897   : > { %9937 = vmatprep.mubr.msk.f32.mxu0 %vm1209_vm2, %v6553_v25 }
 0x89a   : > { %9938 = vmatmul.mubr.msk.f32.gmra.mxu0 %vm1209_vm2, %v9904_v12 }
 0x89b   : > { %9955 = vmatprep.mubr.msk.f32.mxu0 %vm7100_vm7, %v12002_v35 }
 0x952   : > { %v9923_v23 = vpop.f32.mrf.mxu0 }
 0x953   : > { %v6749_v31 = vadd.f32 %v9923_v23, %v9068_v20  ;;  %v3133_v23 = vadd.f32 %v8965_v28, %v11985_v26 }
 0x954   : > { %v6743_v38 = vpop.f32.mrf.mxu0 }
 0x955   : > { %v6744_v40 = vadd.f32 %v9068_v20, %v6743_v38  ;;  %v6757_v43 = vrot.slane %v6749_v31, 1  ;;  %v6762_v48 = vrot.slane %v6749_v31, 2  ;;  %v6767_v1 = vrot.slane %v6749_v31, 3 }
 0x956   : > { %v9936_v51 = vpop.f32.mrf.mxu0  ;;  %v6753_v52 = vmax.f32 %v6749_v31, 0.0  ;;  %v6772_v3 = vrot.slane %v6749_v31, 4  ;;  %v6777_v29 = vrot.slane %v6749_v31, 5  ;;  %v3138_v20 = vadd.f32 %v11983_v47, %v8965_v28 }
 0x957   : > { %v6752_v59 = vmax.f32 %v6744_v40, 0.0  ;;  %v6756_v5 = vrot.slane %v6744_v40, 1  ;;  %v6761_v50 = vrot.slane %v6744_v40, 2  ;;  %v6766_v7 = vrot.slane %v6744_v40, 3 }
 0x958   : > { %7097 = vrot.lane.b32.xlu1 %v6753_v52, %s11121_s17  ;;  %v6959_v35 = vpop.f32.mrf.mxu0  ;;  %v6771_v8 = vrot.slane %v6744_v40, 4  ;;  %v6776_v9 = vrot.slane %v6744_v40, 5  ;;  %v6965_v36 = vadd.f32 %v9936_v51, %v9928_v30  ;;  %v4091_v30 = vadd.f32 %v11981_v14, %v11987_v60 }
 0x959   : > { %7095 = vrot.lane.b32.xlu0 %v6752_v59, %s11121_s17  ;;  %v6758_v22 = vsel %vm1205_vm1, %v6756_v5, %v6757_v43  ;;  %v6763_v58 = vsel %vm1377_vm3, %v6761_v50, %v6762_v48  ;;  %v6768_v16 = vsel %vm1467_vm4, %v6766_v7, %v6767_v1  ;;  %v6960_v21 = vadd.f32 %v6959_v35, %v6871_v32  ;;  %v7182_v7 = vld [vmem:[#allocation26] sm:$0xff] }
 0x95a   : > { %v9939_v53 = vpop.f32.mrf.mxu0  ;;  %v6760_v34 = vmax.f32 %v6744_v40, %v6758_v22  ;;  %v6773_v45 = vsel %vm1214_vm0, %v6771_v8, %v6772_v3  ;;  %v6778_v44 = vsel %vm1649_vm5, %v6776_v9, %v6777_v29  ;;  %v3142_v32 = vmax.f32 %v3138_v20, 0.0 }
 0x95b   : > { %v6975_v0 = vadd.f32 %v9939_v53, %v9931_v57  ;;  %v3141_v38 = vmax.f32 %v3133_v23, 0.0  ;;  %v7362_v1 = vsub.s32 0, %v11658_v49 }
 0x95c   : > { %7354 = vrot.lane.b32.xlu1 %v11769_v33, %s11121_s17  ;;  %v6969_v61 = vpop.f32.mrf.mxu0  ;;  %v6765_v12 = vmax.f32 %v6760_v34, %v6763_v58  ;;  %v6460_v33 = vadd.f32 %v9056_v17, %v12248_v4  ;;  %v3143_v4 = vld [vmem:[#allocation10] sm:$0x1]  ;;  %v7349_v47 = vadd.f32 %v3142_v32, %v11787_v39 }
 0x95d   : > { %v6970_v25 = vadd.f32 %v6969_v61, %v6881_v10  ;;  %9940 = vmatprep.subr.msk.mxu1 %vm1833_vm6, %v6975_v0  ;;  %7352 = vrot.lane.b32.xlu0 %v11729_v63, %s11121_s17  ;;  %v4092_v31 = vadd.f32 %v4091_v30, %v3143_v4  ;;  %v7348_v51 = vadd.f32 %v3141_v38, %v11735_v6  ;;  %v9082_v6 = vld [vmem:[#allocation25] ss:$0 sm:$0xff]  ;;  %v7372_v30 = vadd.s32 2, %v11635_v42  ;;  %s11122_s17 = smov [#allocation37]  }
 0x95e   : > { %9941 = vmatpush3.msk.msra.mxu1 %vm1833_vm6, %v6975_v0  ;;  %v6770_v15 = vmax.f32 %v6765_v12, %v6768_v16  ;;  %v6463_v63 = vmax.f32 %v6460_v33, 0.0  ;;  %v7475_v38 = vld [vmem:[#allocation29 + $0x8] sm:$0xff]  ;;  %s10957_s3 = sshll.u32 %s11122_s17, 4  ;;  %s10958_s3 = int_to_ptr.vmem [resolvable:$false] %s10957_s3 }
 0x95f   : > { %9942 = vmatprep.subr.mxu1 %v6970_v25  ;;  %v4093_v43 = vmax.f32 %v4092_v31, 0.0  ;;  %vm7373_vm2 = vcmp.eq.s32.totalorder %v11658_v49, %v7372_v30  ;;  %s10959_s25 = scalar_lea.vmem %s10958_s3, 32  ;;  %p10960_p3 = scmp.lt.s32.totalorder %s8533_s22, %s10958_s3 }
 0x960   : > { %9943 = vmatpush3.msra.mxu1 %v6970_v25  ;;  %v6775_v13 = vmax.f32 %v6770_v15, %v6773_v45  ;;  %v9094_v23 = vsel %vm7373_vm2, 1.0, %v11118_v56  ;;  %p10961_p13 = scmp.lt.s32.totalorder %s10959_s25, %s10953_s7 }
 0x961   : > { %9944 = vmatprep.subr.mxu1 %v6965_v36  ;;  %v7363_v52 = vrot.slane %v4093_v43, %v7362_v1 }
 0x962   : > { %9945 = vmatpush3.msra.mxu1 %v6965_v36  ;;  %v6780_v18 = vmax.f32 %v6775_v13, %v6778_v44  ;;  %p10962_p2 = por %p10961_p13, %p10960_p3 }
 0x963   : > { %9946 = vmatprep.subr.mxu1 %v6960_v21 }
 0x964   : > { %9947 = vmatpush3.msra.mxu1 %v6960_v21  ;;  %v6781_v62 = vmul.f32 0.999995, %v6780_v18  ;;  %p10963_p6 = pnand %p10962_p2, %p10956_p1 }
 0x965   : > { %9949 = vmatmul.mubr.msk.f32.vlgmr.msra.gmra.mxu1 %vm3056_vm14, %v11913_v2  ;;  %9958 = vmatprep.subr.mxu1 %v7183_v27  ;;  %v9025_v2 = vld [vmem:[#allocation16] ss:$0 sm:$0xff] }
 0x966   : > { %v6782_v11 = vmax.f32 %v6781_v62, 0.0  ;;  %9959 = vmatpush3.msra.mxu1 %v7183_v27  ;;  %v5514_v14 = vadd.f32 %v9025_v2, %v12165_v37  ;;  %v5513_v26 = vadd.f32 %v9025_v2, %v12167_v46 }
 0x967   : > { %9960 = vmatprep.subr.mxu1 %v7182_v7 }
 0x968   : > { %v12278_v24 = vadd.f32 %v6782_v11, %v6463_v63  ;;  %v5516_v37 = vmax.f32 %v5514_v14, 0.0  ;;  %v5515_v3 = vmax.f32 %v5513_v26, 0.0  ;;  %9961 = vmatpush3.msra.mxu1 %v7182_v7  ;;  %v7474_v26 = vld [vmem:[#allocation29] sm:$0xff] }
 0x969   : > { %9972 = vmatprep.subr.mxu1 %v11118_v56 }
 0x9ca   : > { %v7098_v40 = vpop.permute.xlu1 %7097 }
 0x9cb   : > { %9951 = vmatprep.subr.msk.mxu0 %vm1467_vm4, %v7098_v40  ;;  %v7096_v48 = vpop.permute.xlu0 %7095 }
 0x9cc   : > { %9952 = vmatpush3.msk.msra.mxu0 %vm1467_vm4, %v7098_v40 }
 0x9cd   : > { %9953 = vmatprep.subr.mxu0 %v7096_v48 }
 0x9ce   : > { %v7355_v60 = vpop.permute.xlu1 %7354  ;;  %9954 = vmatpush3.msra.mxu0 %v7096_v48 }
 0x9cf   : > { %v7359_v59 = vadd.f32 %v7355_v60, %v7349_v47  ;;  %9956 = vmatmul.mubr.msk.f32.vlgmr.msra.gmra.mxu0 %vm7100_vm7, %v12013_v41  ;;  %v7353_v5 = vpop.permute.xlu0 %7352  ;;  %9965 = vmatprep.subr.mxu0 %v11118_v56 }
 0x9d0   : > { %v7358_v50 = vadd.f32 %v7353_v5, %v7348_v51  ;;  %9969 = vmatprep.mubr.msk.f32.mxu0 %vm11120_vm13, %v11118_v56 }
 0x9d1   : > { %v7365_v39 = vadd.f32 %v7363_v52, %v7359_v59 }
 0x9d2   : > { %v7364_v46 = vadd.f32 %v7363_v52, %v7358_v50  ;;  %v7644_v52 = vld [vmem:[#allocation29 + $0x28] sm:$0xff]  ;;  %v7643_v50 = vld [vmem:[#allocation29 + $0x20] sm:$0xff] }
 0x9d3   : > { %v7367_v57 = vadd.f32 %v7365_v39, %v5516_v37 }
 0x9d4   : > { %v7366_v35 = vadd.f32 %v7364_v46, %v5515_v3  ;;  %v9091_v3 = vld [vmem:[#allocation28] ss:$0 sm:$0xff] }
 0xa25   : > { %v9950_v41 = vpop.f32.mrf.mxu1 }
 0xa26   : > { %v7059_v8 = vadd.f32 %v9950_v41, %v9082_v6 }
 0xa27   : > { %v7053_v9 = vpop.f32.mrf.mxu1 }
 0xa28   : > { %v7065_v29 = vrot.slane %v7059_v8, 1  ;;  %v7070_v22 = vrot.slane %v7059_v8, 2  ;;  %v7054_v58 = vadd.f32 %v9082_v6, %v7053_v9  ;;  %v7075_v53 = vrot.slane %v7059_v8, 3 }
 0xa29   : > { %v7080_v44 = vrot.slane %v7059_v8, 4  ;;  %v7085_v25 = vrot.slane %v7059_v8, 5 }
 0xa2a   : > { %v7064_v34 = vrot.slane %v7054_v58, 1  ;;  %v7069_v16 = vrot.slane %v7054_v58, 2  ;;  %v7074_v45 = vrot.slane %v7054_v58, 3  ;;  %v7079_v61 = vrot.slane %v7054_v58, 4 }
 0xa2b   : > { %v7084_v17 = vrot.slane %v7054_v58, 5 }
 0xa2c   : > { %v7066_v0 = vsel %vm1205_vm1, %v7064_v34, %v7065_v29  ;;  %v7071_v10 = vsel %vm1377_vm3, %v7069_v16, %v7070_v22  ;;  %v7076_v15 = vsel %vm1467_vm4, %v7074_v45, %v7075_v53  ;;  %v7081_v13 = vsel %vm1214_vm0, %v7079_v61, %v7080_v44  ;;  %v7815_v44 = vld [vmem:[#allocation32 + $0x8] sm:$0xff]  ;;  %v7891_v61 = vld [vmem:[#allocation32 + $0x10] sm:$0xff] }
 0xa2d   : > { %v7068_v12 = vadd.f32 %v7066_v0, %v7054_v58  ;;  %v7086_v33 = vsel %vm1649_vm5, %v7084_v17, %v7085_v25  ;;  %vm7374_vm0 = vcmp.eq.s32.totalorder %v11684_v54, %v7372_v30  ;;  %vm7271_vm5 = vcmask 121856   ;;  %v7814_v0 = vld [vmem:[#allocation32] sm:$0xff] }
 0xa2e   : > { %v9095_v42 = vsel %vm7374_vm0, 1.0, %v11118_v56 }
 0xa2f   : > { %v7073_v36 = vadd.f32 %v7071_v10, %v7068_v12  ;;  %v7892_v10 = vld [vmem:[#allocation32 + $0x18] sm:$0xff] }
 0xa31   : > { %v7078_v21 = vadd.f32 %v7076_v15, %v7073_v36 }
 0xa33   : > { %v7083_v18 = vadd.f32 %v7081_v13, %v7078_v21  ;;  %v7969_v13 = vld [vmem:[#allocation32 + $0x28] sm:$0xff] }
 0xa35   : > { %v7088_v62 = vadd.f32 %v7086_v33, %v7083_v18  ;;  %v7968_v33 = vld [vmem:[#allocation32 + $0x20] sm:$0xff]  ;;  %v8046_v18 = vld [vmem:[#allocation32 + $0x38] sm:$0xff] }
 0xa37   : > { %v7089_v63 = vmul.f32 0.16666667, %v7088_v62 }
 0xa39   : > { %v7090_v11 = vmul.f32 0.999995, %v7089_v63  ;;  %v8045_v63 = vld [vmem:[#allocation32 + $0x30] sm:$0xff] }
 0xa3b   : > { %v7091_v27 = vmax.f32 %v7090_v11, 0.0  ;;  %v8123_v11 = vld [vmem:[#allocation32 + $0x48] sm:$0xff] }
 0xa3d   : > { %v12303_v28 = vadd.f32 %v12278_v24, %v7091_v27  ;;  %v7478_v24 = vld [vmem:[#allocation29 + $0x18] sm:$0xff] }
 0xa8f   : > { %v9957_v4 = vpop.f32.mrf.mxu0 }
 0xa91   : > { %v7173_v20 = vpop.f32.mrf.mxu0 }
 0xa92   : > { %9962 = vmatprep.mubr.msk.f32.mxu1 %vm3153_vm8, %v7173_v20  ;;  %v8199_v20 = vld [vmem:[#allocation32 + $0x50] sm:$0xff] }
 0xa93   : > { %9963 = vmatmul.mubr.msk.f32.vlgmr.msra.gmra.mxu1 %vm3153_vm8, %v9957_v4 }
 0xa94   : > { %9973 = vmatpush3.msk.msra.mxu1 %vm1467_vm4, %v7367_v57  ;;  %9976 = vmatprep.mubr.msk.f32.mxu1 %vm11120_vm13, %v11118_v56  ;;  %vm7375_vm4 = vcmp.eq.s32.totalorder %v11690_v55, %v7372_v30  ;;  %v7477_v55 = vld [vmem:[#allocation29 + $0x10] sm:$0xff] }
 0xa95   : > { %9974 = vmatprep.subr.mxu1 %v11118_v56  ;;  %v9096_v49 = vsel %vm7375_vm4, 1.0, %v11118_v56  ;;  %v8200_v30 = vld [vmem:[#allocation32 + $0x58] sm:$0xff] }
 0xa96   : > { %9975 = vmatpush3.msra.mxu1 %v7366_v35 }
 0xa97   : > { %9977 = vmatmul.mubr.msk.f32.vlgmr.msra.gmra.mxu1 %vm7100_vm7, %v9094_v23  ;;  %10006 = vmatprep.subr.mxu1 %v11118_v56  ;;  %v8277_v23 = vld [vmem:[#allocation32 + $0x68] sm:$0xff] }
 0xa98   : > { %9979 = vmatprep.mubr.msk.f32.mxu1 %vm11120_vm13, %v11118_v56 }
 0xa9b   : > { %9980 = vmatmul.mubr.msk.f32.gmra.mxu1 %vm7100_vm7, %v9095_v42 }
 0xa9c   : > { %9982 = vmatprep.mubr.msk.f32.mxu1 %vm11120_vm13, %v11118_v56 }
 0xa9f   : > { %9983 = vmatmul.mubr.msk.f32.gmra.mxu1 %vm7100_vm7, %v9096_v49  ;;  %v8276_v49 = vld [vmem:[#allocation32 + $0x60] sm:$0xff] }
 0xaa0   : > { %10010 = vmatprep.mubr.msk.f32.mxu1 %vm11120_vm13, %v11118_v56 }
 0xb53   : > { %v9964_v54 = vpop.f32.mrf.mxu1 }
 0xb54   : > { %9966 = vmatpush3.msk.msra.mxu0 %vm1205_vm1, %v9964_v54  ;;  %v8354_v54 = vld [vmem:[#allocation32 + $0x78] sm:$0xff] }
 0xb55   : > { %v7256_v31 = vpop.f32.mrf.mxu1  ;;  %9967 = vmatprep.subr.mxu0 %v11118_v56 }
 0xb56   : > { %9968 = vmatpush3.msra.mxu0 %v7256_v31  ;;  %v8353_v31 = vld [vmem:[#allocation32 + $0x70] sm:$0xff] }
 0xb57   : > { %9970 = vmatmul.mubr.msk.f32.vlgmr.msra.gmra.mxu0 %vm7271_vm5, %v11850_v19  ;;  %v7460_v32 = vpop.f32.mrf.mxu1  ;;  %9985 = vmatprep.subr.mxu0 %v7478_v24 }
 0xb58   : > { %9986 = vmatpush3.msra.mxu0 %v7478_v24  ;;  %v7481_v43 = vrot.slane %v7460_v32, 1  ;;  %v7646_v59 = vrot.slane %v7460_v32, 2 }
 0xb59   : > { %v9978_v2 = vpop.f32.mrf.mxu1  ;;  %9987 = vmatprep.subr.mxu0 %v7477_v55 }
 0xb5a   : > { %9988 = vmatpush3.msra.mxu0 %v7477_v55  ;;  %v7813_v2 = vld [vmem:[#allocation34] sm:$0x1] }
 0xb5b   : > { %v7465_v40 = vpop.f32.mrf.mxu1  ;;  %9992 = vmatprep.subr.mxu0 %v7475_v38 }
 0xb5c   : > { %v7482_v48 = vrot.slane %v7465_v40, 1  ;;  %v7647_v60 = vrot.slane %v7465_v40, 2 }
 0xb5d   : > { %v9981_v1 = vpop.f32.mrf.mxu1 }
 0xb5e   : > { %v7483_v14 = vsel %vm1205_vm1, %v7481_v43, %v7482_v48  ;;  %v7648_v37 = vsel %vm1377_vm3, %v7646_v59, %v7647_v60 }
 0xb5f   : > { %v7470_v47 = vpop.f32.mrf.mxu1  ;;  %9989 = vmatprep.mubr.msk.f32.mxu0 %vm3153_vm8, %v7483_v14 }
 0xb60   : > { %9990 = vmatmul.mubr.msk.f32.vlgmr.msra.gmra.mxu0 %vm3153_vm8, %v7482_v48  ;;  %v7649_v5 = vrot.slane %v7470_v47, 2 }
 0xb61   : > { %9993 = vmatpush3.msra.mxu0 %v7475_v38  ;;  %9996 = vmatprep.mubr.msk.f32.mxu0 %vm3153_vm8, %v7460_v32  ;;  %v9984_v51 = vpop.f32.mrf.mxu1  ;;  %v8431_v32 = vld [vmem:[%s11266_s20 + $0x8] sm:$0xff]  ;;  %v8430_v38 = vld [vmem:[%s11266_s20] sm:$0xff] }
 0xb62   : > { %9994 = vmatprep.subr.mxu0 %v7474_v26  ;;  %v7650_v39 = vsel %vm1377_vm3, %v7647_v60, %v7649_v5 }
 0xb63   : > { %9995 = vmatpush3.msra.mxu0 %v7474_v26 }
 0xb64   : > { %9997 = vmatmul.mubr.msk.f32.vlgmr.msra.gmra.mxu0 %vm3153_vm8, %v7465_v40  ;;  %9999 = vmatprep.subr.mxu0 %v7644_v52 }
 0xb65   : > { %10000 = vmatpush3.msra.mxu0 %v7644_v52  ;;  %10003 = vmatprep.mubr.msk.f32.mxu0 %vm3153_vm8, %v7648_v37 }
 0xb66   : > { %10001 = vmatprep.subr.mxu0 %v7643_v50 }
 0xb67   : > { %10002 = vmatpush3.msra.mxu0 %v7643_v50 }
 0xb68   : > { %10004 = vmatmul.mubr.msk.f32.vlgmr.msra.gmra.mxu0 %vm3153_vm8, %v7650_v39  ;;  %10013 = vmatprep.subr.mxu0 %v11118_v56 }
 0xb69   : > { %10017 = vmatprep.mubr.msk.f32.mxu0 %vm11120_vm13, %v11118_v56  ;;  %10014 = vmatpush3.msra.mxu0 %v7815_v44 }
 0xb6a   : > { %10015 = vmatprep.subr.mxu0 %v11118_v56 }
 0xb6b   : > { %10016 = vmatpush3.msra.mxu0 %v7814_v0 }
 0xb6c   : > { %10027 = vmatprep.subr.mxu0 %v11118_v56 }
 0xc17   : > { %v7343_v46 = vpop.f32.mrf.mxu0 }
 0xc18   : > { %v7344_v57 = vadd.f32 %v9091_v3, %v7343_v46 }
 0xc19   : > { %v9971_v35 = vpop.f32.mrf.mxu0 }
 0xc1a   : > { %v7347_v7 = vmax.f32 %v7344_v57, 0.0 }
 0xc1c   : > { %v7370_v6 = vadd.f32 %v12303_v28, %v7347_v7  ;;  %v8122_v28 = vld [vmem:[#allocation32 + $0x40] sm:$0xff] }
 0xc20   : > { %v9991_v41 = vpop.f32.mrf.mxu0 }
 0xc22   : > { %v7554_v8 = vpop.f32.mrf.mxu0 }
 0xc24   : > { %v9998_v9 = vpop.f32.mrf.mxu0 }
 0xc25   : > { %v7639_v22 = vadd.f32 %v9998_v9, %v9991_v41 }
 0xc26   : > { %v7633_v29 = vpop.f32.mrf.mxu0 }
 0xc27   : > { %v7634_v53 = vadd.f32 %v7633_v29, %v7554_v8  ;;  %v8432_v29 = vld [vmem:[#allocation35] sm:$0x1] }
 0xc28   : > { %v10005_v58 = vpop.f32.mrf.mxu0 }
 0xc29   : > { %v7731_v34 = vadd.f32 %v10005_v58, %v7639_v22 }
 0xc2a   : > { %v7721_v16 = vpop.f32.mrf.mxu0 }
 0xc2b   : > { %v7730_v45 = vadd.f32 %v7721_v16, %v7634_v53  ;;  %10007 = vmatpush3.msk.msra.mxu1 %vm1205_vm1, %v7731_v34  ;;  %vm8506_vm1 = vcmask 32768  }
 0xc2c   : > { %10008 = vmatprep.subr.mxu1 %v11118_v56 }
 0xc2d   : > { %10009 = vmatpush3.msra.mxu1 %v7730_v45 }
 0xc2e   : > { %10011 = vmatmul.mubr.msk.f32.vlgmr.msra.gmra.mxu1 %vm7271_vm5, %v11850_v19  ;;  %10020 = vmatprep.subr.mxu1 %v11118_v56  ;;  %v9107_v19 = vld [vmem:[#allocation31] ss:$0 sm:$0xff] }
 0xc2f   : > { %10024 = vmatprep.mubr.msk.f32.mxu1 %vm11120_vm13, %v11118_v56  ;;  %10021 = vmatpush3.msra.mxu1 %v7892_v10 }
 0xc30   : > { %10022 = vmatprep.subr.mxu1 %v11118_v56 }
 0xc31   : > { %10023 = vmatpush3.msra.mxu1 %v7891_v61 }
 0xc32   : > { %10034 = vmatprep.subr.mxu1 %v11118_v56 }
 0xcee   : > { %v7807_v12 = vpop.f32.mrf.mxu1 }
 0xcef   : > { %v7808_v25 = vadd.f32 %v9107_v19, %v7807_v12 }
 0xcf0   : > { %v10012_v15 = vpop.f32.mrf.mxu1 }
 0xcf1   : > { %v7811_v17 = vmax.f32 %v7808_v25, 0.0 }
 0xcf3   : > { %v7812_v36 = vadd.f32 %v7811_v17, %v7370_v6 }
 0xcf5   : > { %10018 = vmatmul.mubr.msk.f32.vlgmr.msra.gmra.mxu0 %vm3153_vm8, %v7812_v36  ;;  %v7893_v21 = vrot.slane %v7812_v36, 1  ;;  %v7970_v62 = vrot.slane %v7812_v36, 2  ;;  %v8047_v27 = vrot.slane %v7812_v36, 3  ;;  %v8124_v4 = vrot.slane %v7812_v36, 4 }
 0xcf6   : > { %10028 = vmatpush3.msra.mxu0 %v7969_v13  ;;  %10031 = vmatprep.mubr.msk.f32.mxu0 %vm11120_vm13, %v11118_v56  ;;  %v8201_v42 = vrot.slane %v7812_v36, 5  ;;  %v8278_v24 = vrot.slane %v7812_v36, 6  ;;  %v8355_v55 = vrot.slane %v7812_v36, 7 }
 0xcf7   : > { %10025 = vmatmul.mubr.msk.f32.vlgmr.msra.gmra.mxu1 %vm3153_vm8, %v7893_v21  ;;  %10029 = vmatprep.subr.mxu0 %v11118_v56 }
 0xcf8   : > { %10030 = vmatpush3.msra.mxu0 %v7968_v33  ;;  %10035 = vmatpush3.msra.mxu1 %v8046_v18 }
 0xcf9   : > { %10032 = vmatmul.mubr.msk.f32.vlgmr.msra.gmra.mxu0 %vm3153_vm8, %v7970_v62  ;;  %10036 = vmatprep.subr.mxu1 %v11118_v56 }
 0xcfa   : > { %10041 = vmatprep.subr.mxu0 %v11118_v56  ;;  %10037 = vmatpush3.msra.mxu1 %v8045_v63 }
 0xcfb   : > { %10038 = vmatprep.mubr.msk.f32.mxu1 %vm11120_vm13, %v11118_v56  ;;  %10042 = vmatpush3.msra.mxu0 %v8123_v11 }
 0xcfc   : > { %10039 = vmatmul.mubr.msk.f32.vlgmr.msra.gmra.mxu1 %vm3153_vm8, %v8047_v27  ;;  %10043 = vmatprep.subr.mxu0 %v11118_v56 }
 0xcfd   : > { %10048 = vmatprep.subr.mxu1 %v11118_v56  ;;  %10044 = vmatpush3.msra.mxu0 %v8122_v28 }
 0xcfe   : > { %10045 = vmatprep.mubr.msk.f32.mxu0 %vm11120_vm13, %v11118_v56  ;;  %10049 = vmatpush3.msra.mxu1 %v8200_v30 }
 0xcff   : > { %10046 = vmatmul.mubr.msk.f32.vlgmr.msra.gmra.mxu0 %vm3153_vm8, %v8124_v4  ;;  %10050 = vmatprep.subr.mxu1 %v11118_v56 }
 0xd00   : > { %10055 = vmatprep.subr.mxu0 %v11118_v56  ;;  %10051 = vmatpush3.msra.mxu1 %v8199_v20 }
 0xd01   : > { %10052 = vmatprep.mubr.msk.f32.mxu1 %vm11120_vm13, %v11118_v56  ;;  %10056 = vmatpush3.msra.mxu0 %v8277_v23 }
 0xd02   : > { %10053 = vmatmul.mubr.msk.f32.vlgmr.msra.gmra.mxu1 %vm3153_vm8, %v8201_v42  ;;  %10057 = vmatprep.subr.mxu0 %v11118_v56 }
 0xd03   : > { %10062 = vmatprep.subr.mxu1 %v11118_v56  ;;  %10058 = vmatpush3.msra.mxu0 %v8276_v49 }
 0xd04   : > { %10059 = vmatprep.mubr.msk.f32.mxu0 %vm11120_vm13, %v11118_v56  ;;  %10063 = vmatpush3.msra.mxu1 %v8354_v54 }
 0xd05   : > { %10060 = vmatmul.mubr.msk.f32.vlgmr.msra.gmra.mxu0 %vm3153_vm8, %v8278_v24  ;;  %10064 = vmatprep.subr.mxu1 %v11118_v56 }
 0xd06   : > { %10065 = vmatpush3.msra.mxu1 %v8353_v31  ;;  %10066 = vmatprep.mubr.msk.f32.mxu1 %vm11120_vm13, %v11118_v56 }
 0xd07   : > { %10067 = vmatmul.mubr.msk.f32.vlgmr.msra.gmra.mxu1 %vm3153_vm8, %v8355_v55  ;;  %10069 = vmatprep.subr.mxu0 %v11118_v56 }
 0xd08   : > { %10073 = vmatprep.mubr.msk.f32.mxu0 %vm11120_vm13, %v11118_v56  ;;  %10070 = vmatpush3.msra.mxu0 %v8431_v32 }
 0xd09   : > { %10071 = vmatprep.subr.mxu0 %v11118_v56 }
 0xd0a   : > { %10072 = vmatpush3.msra.mxu0 %v8430_v38 }
 0xdb5   : > { %v7885_v40 = vpop.f32.mrf.mxu0 }
 0xdb6   : > { %v7889_v43 = vadd.f32 %v7885_v40, %v7813_v2 }
 0xdb7   : > { %v10019_v48 = vpop.f32.mrf.mxu0  ;;  %v7962_v1 = vpop.f32.mrf.mxu1 }
 0xdb8   : > { %v7966_v14 = vadd.f32 %v7962_v1, %v7889_v43 }
 0xdb9   : > { %v10026_v47 = vpop.f32.mrf.mxu1  ;;  %v8039_v26 = vpop.f32.mrf.mxu0 }
 0xdba   : > { %v8043_v60 = vadd.f32 %v8039_v26, %v7966_v14 }
 0xdbb   : > { %v10033_v51 = vpop.f32.mrf.mxu0 }
 0xdbc   : > { %v8116_v52 = vpop.f32.mrf.mxu1 }
 0xdbd   : > { %v8120_v59 = vadd.f32 %v8116_v52, %v8043_v60 }
 0xdbe   : > { %v10040_v5 = vpop.f32.mrf.mxu1 }
 0xdbf   : > { %v8193_v50 = vpop.f32.mrf.mxu0 }
 0xdc0   : > { %v8197_v37 = vadd.f32 %v8193_v50, %v8120_v59 }
 0xdc1   : > { %v10047_v39 = vpop.f32.mrf.mxu0 }
 0xdc2   : > { %v8270_v3 = vpop.f32.mrf.mxu1 }
 0xdc3   : > { %v8274_v56 = vadd.f32 %v8270_v3, %v8197_v37 }
 0xdc4   : > { %v10054_v46 = vpop.f32.mrf.mxu1 }
 0xdc5   : > { %v8347_v57 = vpop.f32.mrf.mxu0 }
 0xdc6   : > { %v8351_v35 = vadd.f32 %v8347_v57, %v8274_v56 }
 0xdc7   : > { %v10061_v7 = vpop.f32.mrf.mxu0  ;;  %v8424_v6 = vpop.f32.mrf.mxu1 }
 0xdc8   : > { %v8428_v41 = vadd.f32 %v8424_v6, %v8351_v35 }
 0xdc9   : > { %v10068_v8 = vpop.f32.mrf.mxu1 }
 0xdca   : > { %v8429_v9 = vmax.f32 %v8428_v41, 0.0 }
 0xdcc   : > { %10074 = vmatmul.mubr.msk.f32.vlgmr.msra.gmra.mxu0 %vm3153_vm8, %v8429_v9 }
 0xe8c   : > { %v8502_v22 = vpop.f32.mrf.mxu0 }
 0xe8d   : > { %v8503_v58 = vadd.f32 %v8502_v22, %v8432_v29 }
 0xe8e   : > { %v10075_v53 = vpop.f32.mrf.mxu0 }
 0xe8f   : > { %v8507_v34 = vsel %vm8506_vm1, %v8503_v58, -inf }
 0xe90   : > { %8508 = vmax.xlane.f32.xlu1 %v8507_v34 }
 0xf19   : > { %v8509_v16 = vpop.xlane.xlu1 %8508 }
 0xf1a   : > { %v8510_v45 = vsub.f32 %v8503_v58, %v8509_v16 }
 0xf1c   : > { %v8511_v44 = vmul.f32 1.442695, %v8510_v45 }
 0xf1e   : > { %10374 = vpow2.f32 %v8511_v44 }
 0xf2b   : > { %v10375_v0 = vpop.eup %10374 }
 0xf2c   : > { %v8513_v10 = vsel %vm8506_vm1, %v10375_v0, 0.0 }
 0xf2d   : > { %8514 = vadd.xlane.f32.xlu0 %v8513_v10 }
 0xfb6   : > { %v8515_v61 = vpop.xlane.xlu0 %8514 }
 0xfb7   : > { %10376 = vrcp.f32 %v8515_v61 }
 0xfc4   : > { %v10377_v19 = vpop.eup %10376 }
 0xfc5   : > { %v8517_v12 = vmul.f32 %v10377_v19, %v10375_v0 }
 0xfc7   : > { %8518 = vst.msk [vmem:[%s1190_s18] sm:$0x1] %vm8506_vm1, %v8517_v12 }
 0xfc8   : > { %10966 = shalt.err (!%p10963_p6)
}
 0xfc9   : > { %s10967_s15 = scalar_lea.hbm %s8530_s11, 16  ;;  %s10971_s0 = scalar_lea.hbm %s11276_s19, 32 }
 0xfca   : > { %p10968_p12 = scmp.ne.s32.totalorder %s8530_s11, %s10967_s15  ;;  %p10972_p7 = scmp.lt.s32.totalorder %s8530_s11, %s11276_s19 }
 0xfcb   : > { %p10973_p5 = scmp.lt.s32.totalorder %s10971_s0, %s10967_s15 }
 0xfcc   : > { %p10969_p9 = pnand %p10968_p12, %p12515_p11 }
 0xfcd   : > { %p10974_p10 = por %p10973_p5, %p10972_p7 }
 0xfce   : > { %p10970_p4 = pneg %p10969_p9 }
 0xfd0   : > { %p10975_p8 = pnand %p10974_p10, %p10970_p4 }
 0xfd2   : > { %10978 = shalt.err (!%p10975_p8)
}
 0xfd3   : > { %10165 = dma.vmem_to_hbm [thread:$0]  (%p12515_p11), %s8533_s22, 16, %s8530_s11, %s8520_s1  }
 0xfd4 PF: > { %s12516_s16 = sld [smem:[#allocation68_spill]] }
 0xfd5   : > { %s12517_s28 = sld [smem:[#allocation66_spill]] }
 0xfd6   : > { %s12518_s18 = sld [smem:[#allocation72_spill]] }
 0xfda   : > { %p10282_p0 = scmp.ge.s32.totalorder %s12516_s16, 2 }
 0xfdb   : > { %s8544_s7 = sand.u32 1, %s12517_s28  }
 0xfdc   : > { %p12519_p1 = scmp.ne.s32.totalorder %s12518_s18, 0  ;;  %s8545_s17 = scalar_lea.sflag [#allocation4], %s8544_s7 }
 0xfde   : > { %p10235_p3 = pnand %p10282_p0, %p12519_p1 }
 0xfe0   : > { %p10236_p13 = pneg %p10235_p3 }
 0xfe2   : > { %11044 = dma.done.wait (%p10236_p13), %s8545_s17, 16  }
 0xfe3   : > { %11046 = vsyncadd (%p10236_p13), %s8545_s17, 4294967280  ;;  %s12520_s11 = sld [smem:[#allocation69_spill]]  ;;  %s12523_s7 = smov %s11053_s10 }
 0xfe4   : > { %s12521_s3 = sld [smem:[#allocation67_spill]] }
 0xfe5   : > { %s12522_s0 = sld [smem:[#allocation70_spill]] }
 0xfe9   : > { %p81_p2 = scmp.ge.s32.totalorder %s12520_s11, 4  }
 0xfea   : > { %s12524_s10 = smov %s12521_s3 }
 0xfeb   :  { %83 = sbr.rel (!%p81_p2) target bundleno = 62 (0x3e), region = 345 }
 0xff0   :  { %8549 = vsyncpa [#allocation3], 1 }
 0xff1   :  { %8551 = vsyncpa [#allocation3 + $0x1], 1 }
 0xff2   :  { %8552 = vsyncpa [#allocation6], 1 }
 0xff3   :  { %8553 = vsyncpa [#allocation9], 1 }
 0xff4   :  { %8554 = vsyncpa [#allocation12], 1 }
 0xff5   :  { %8555 = vsyncpa [#allocation15], 1 }
 0xff6   :  { %8556 = vsyncpa [#allocation18], 1 }
 0xff7   :  { %8557 = vsyncpa [#allocation21], 1 }
 0xff8   :  { %8558 = vsyncpa [#allocation24], 1 }
 0xff9   :  { %8559 = vsyncpa [#allocation27], 1 }
 0xffa   :  { %8560 = vsyncpa [#allocation30], 1 }
 0xffb   :  { %8561 = vsyncpa [#allocation33], 1 }
 0xffc   :  { %8562 = vsyncpa [#allocation36], 1 }
 0xffd   :  { %8563 = vsyncpa [#allocation4], 1 }
 0xffe   :  { %8565 = vsyncpa [#allocation4 + $0x1], 1 }

</bundles_post_ra>
